<compile_context>
chip_gen: v6e
topology: v6e:2x2x1
jax: 0.10.0
libtpu: 0.0.40
codegen_flags: <defaults>
</compile_context>

<pallas_src>
import math

import jax
import jax.numpy as jnp
from jax import lax
from jax.experimental import pallas as pl
from jax.experimental.pallas import tpu as pltpu


def _mha(x_f32, w_vmem, b_ref, num_heads, mask_add):
    """Multi-head self-attention on one (S, D) slab resident in VMEM.

    Matmuls run on the MXU with bf16 operands and f32 accumulation; softmax
    statistics stay in f32 (also correct for v5e, which has no bf16 VPU/EUP).
    """
    S, D = x_f32.shape
    hd = D // num_heads
    scale = 1.0 / math.sqrt(hd)

    x_bf = x_f32.astype(jnp.bfloat16)
    # Single-buffered resident bf16 weight stack [Wq, Wk, Wv, Wo].
    wq, wk, wv, wo = w_vmem[0], w_vmem[1], w_vmem[2], w_vmem[3]
    b_all = b_ref[...]                       # (4, D) f32
    bq = b_all[0:1, :]
    bk = b_all[1:2, :]
    bv = b_all[2:3, :]
    bo = b_all[3:4, :]

    # Lane-dense (S, D) projections: one wide MXU matmul each.
    q = jnp.dot(x_bf, wq, preferred_element_type=jnp.float32) + bq
    k = jnp.dot(x_bf, wk, preferred_element_type=jnp.float32) + bk
    v = jnp.dot(x_bf, wv, preferred_element_type=jnp.float32) + bv
    q = q * scale  # fold 1/sqrt(hd) here: S*D mults instead of H*S*S

    # Explicit head-major relayout (one transpose per tensor), then batched
    # per-head contractions with a leading head batch dim.
    qh = q.reshape(S, num_heads, hd).swapaxes(0, 1).astype(jnp.bfloat16)  # (H,S,hd)
    kh = k.reshape(S, num_heads, hd).swapaxes(0, 1).astype(jnp.bfloat16)
    vh = v.reshape(S, num_heads, hd).swapaxes(0, 1).astype(jnp.bfloat16)

    s = jnp.einsum('hqe,hke->hqk', qh, kh,
                   preferred_element_type=jnp.float32)        # (H, S, S) f32

    if mask_add is not None:
        s = s + mask_add[None, :, :]

    s = s - jnp.max(s, axis=-1, keepdims=True)
    p = jnp.exp(s)
    inv = pl.reciprocal(jnp.sum(p, axis=-1, keepdims=True), approx=True)
    p = p * inv

    o = jnp.einsum('hqk,hke->hqe', p.astype(jnp.bfloat16), vh,
                   preferred_element_type=jnp.float32)        # (H, S, hd) f32
    o = o.swapaxes(0, 1).reshape(S, D).astype(jnp.bfloat16)
    return jnp.dot(o, wo, preferred_element_type=jnp.float32) + bo


def _linear_layernorm(x_f32, w_bf16, b, gamma, beta):
    """nn.Linear(dim, dim) + nn.LayerNorm(dim) on an (S, D) slab."""
    y = jnp.dot(x_f32.astype(jnp.bfloat16), w_bf16,
                preferred_element_type=jnp.float32) + b
    # Fused statistics: mean and mean-of-squares (independent reductions),
    # var = E[y^2] - E[y]^2.
    mu = jnp.mean(y, axis=-1, keepdims=True)
    ms = jnp.mean(y * y, axis=-1, keepdims=True)
    var = ms - mu * mu
    yn = (y - mu) * lax.rsqrt(var + 1e-5)    # nn.LayerNorm default eps
    return yn * gamma + beta


def _make_decoder_kernel(num_heads, n_lin, causal, has_enc):
    def kernel(*refs):
        it = iter(refs)
        x_ref = next(it)
        enc_ref = next(it) if has_enc else None
        w1_hbm = next(it)
        b1_ref = next(it)
        w2_hbm = next(it)
        b2_ref = next(it)
        if n_lin > 0:
            lw_hbm = next(it)
            lb_ref = next(it)
            lg_ref = next(it)
            lbt_ref = next(it)
        o_ref = next(it)
        # scratch
        w1_vmem = next(it)
        w2_vmem = next(it)
        lw_vmem = next(it) if n_lin > 0 else None
        sem = next(it)

        # Stage the large weight stacks HBM -> VMEM exactly once (first grid
        # step); they stay resident (single-buffered) for all later batch
        # steps.  Requires the batch grid axis to be "arbitrary" (sequential).
        @pl.when(pl.program_id(0) == 0)
        def _():
            cps = [pltpu.make_async_copy(w1_hbm, w1_vmem, sem.at[0]),
                   pltpu.make_async_copy(w2_hbm, w2_vmem, sem.at[1])]
            if n_lin > 0:
                cps.append(pltpu.make_async_copy(lw_hbm, lw_vmem, sem.at[2]))
            for cp in cps:
                cp.start()
            for cp in cps:
                cp.wait()

        S = x_ref.shape[1]
        x = x_ref[0].astype(jnp.float32)     # bf16 in, f32 math inside

        # Causal mask built once, reused by both attention calls.
        mask_add = None
        if causal:
            row = lax.broadcasted_iota(jnp.int32, (S, S), 0)
            col = lax.broadcasted_iota(jnp.int32, (S, S), 1)
            mask_add = jnp.where(col > row,
                                 jnp.float32(-jnp.inf), jnp.float32(0.0))

        # x = x + attention1(x, mask)
        x = x + _mha(x, w1_vmem, b1_ref, num_heads, mask_add)
        # x = x + encoder_result  (static branch: nothing streamed if absent)
        if has_enc:
            x = x + enc_ref[0].astype(jnp.float32)
        # x = x + attention2(x, mask)
        x = x + _mha(x, w2_vmem, b2_ref, num_heads, mask_add)

        # residual Linear + LayerNorm blocks (block_num - 3 of them)
        if n_lin > 0:
            def one_layer(l, xc):
                return xc + _linear_layernorm(
                    xc,
                    lw_vmem[l],
                    lb_ref[pl.ds(l, 1), :],
                    lg_ref[pl.ds(l, 1), :],
                    lbt_ref[pl.ds(l, 1), :])

            if n_lin <= 4:
                # small fixed count: unroll for LLO scheduler visibility
                for l in range(n_lin):
                    x = one_layer(l, x)
            else:
                # bound vreg live ranges / code size for many layers
                x = lax.fori_loop(0, n_lin, one_layer, x)

        o_ref[0] = x.astype(o_ref.dtype)

    return kernel


def init_params(key, block_num, num_heads, max_length, dim):
    assert block_num >= 3
    assert dim % num_heads == 0
    n_lin = block_num - 3
    keys = jax.random.split(key, 6)

    def w(k, shape, scale=0.05):
        return (scale * jax.random.normal(k, shape)).astype(jnp.float32)

    return dict(
        num_heads=num_heads, max_length=max_length, dim=dim,
        # each attention: stacked [Wq, Wk, Wv, Wo] and [bq, bk, bv, bo]
        attn1_w=w(keys[0], (4, dim, dim)),
        attn1_b=w(keys[1], (4, dim)),
        attn2_w=w(keys[2], (4, dim, dim)),
        attn2_b=w(keys[3], (4, dim)),
        lin_w=w(keys[4], (max(n_lin, 1), dim, dim))[:n_lin],
        lin_b=w(keys[5], (max(n_lin, 1), dim))[:n_lin],
        ln_g=jnp.ones((n_lin, dim), jnp.float32),
        ln_b=jnp.zeros((n_lin, dim), jnp.float32),
    )


def decoder_forward(params, x, encoder_result=None, self_circulation=False):
    num_heads = params["num_heads"]
    S = params["max_length"]
    D = params["dim"]
    B, n, d = x.shape
    assert d == D and n <= S

    # length_adjust: zero-pad the sequence axis up to max_length
    if n < S:
        x = jnp.pad(x, ((0, 0), (0, S - n), (0, 0)))

    has_enc = encoder_result is not None
    causal = bool(self_circulation)

    # bf16 activations into the kernel (halves HBM<->VMEM DMA);
    # bf16 weights for the MXU; biases / LN params stay f32.
    x_in = x.astype(jnp.bfloat16)
    w1 = params["attn1_w"].astype(jnp.bfloat16)
    b1 = params["attn1_b"].astype(jnp.float32)
    w2 = params["attn2_w"].astype(jnp.bfloat16)
    b2 = params["attn2_b"].astype(jnp.float32)
    lw = params["lin_w"].astype(jnp.bfloat16)
    lb = params["lin_b"].astype(jnp.float32)
    lg = params["ln_g"].astype(jnp.float32)
    lbt = params["ln_b"].astype(jnp.float32)
    n_lin = params["lin_w"].shape[0]

    def full(arr):
        nd = arr.ndim
        return pl.BlockSpec(arr.shape, lambda b, nd=nd: (0,) * nd)

    def hbm():
        # Left in HBM, DMA'd once by the kernel into single-buffered scratch.
        return pl.BlockSpec(memory_space=pl.ANY)

    inputs = [x_in]
    in_specs = [pl.BlockSpec((1, S, D), lambda b: (b, 0, 0))]
    if has_enc:
        enc = encoder_result.astype(jnp.bfloat16)
        assert encoder_result.shape == (B, S, D)
        inputs.append(enc)
        in_specs.append(pl.BlockSpec((1, S, D), lambda b: (b, 0, 0)))
    inputs += [w1, b1, w2, b2]
    in_specs += [hbm(), full(b1), hbm(), full(b2)]
    if n_lin > 0:
        inputs += [lw, lb, lg, lbt]
        in_specs += [hbm(), full(lb), full(lg), full(lbt)]

    kernel = _make_decoder_kernel(num_heads, n_lin, causal, has_enc)

    # Single-buffered VMEM scratch for the weight stacks + DMA semaphores.
    scratch_shapes = [pltpu.VMEM((4, D, D), jnp.bfloat16),
                      pltpu.VMEM((4, D, D), jnp.bfloat16)]
    if n_lin > 0:
        scratch_shapes.append(pltpu.VMEM((n_lin, D, D), jnp.bfloat16))
    scratch_shapes.append(pltpu.SemaphoreType.DMA((3,)))

    # VMEM budget (single-counted), clamped to real per-core capacity.
    try:
        vmem_cap = int(pltpu.get_tpu_info().vmem_capacity_bytes)
    except Exception:  # pragma: no cover - conservative fallback (v7x size)
        vmem_cap = 64 * 1024 * 1024
    act_bytes = 2 * (1 + int(has_enc)) * S * D * 2      # bf16, double-buffered
    out_bytes = 2 * S * D * 4                            # f32, double-buffered
    weight_bytes = sum(int(a.size) * a.dtype.itemsize    # single-buffered
                       for a in (w1, b1, w2, b2, lw, lb, lg, lbt))
    score_bytes = 2 * num_heads * S * S * 4              # scores + probs (f32)
    transient_bytes = 12 * S * D * 4                     # q/k/v/intermediates
    vmem_limit = int(min(vmem_cap,
                         max(32 * 1024 * 1024,
                             act_bytes + out_bytes + weight_bytes
                             + score_bytes + transient_bytes + (8 << 20))))

    grid_spec = pltpu.PrefetchScalarGridSpec(
        num_scalar_prefetch=0,
        grid=(B,),
        in_specs=in_specs,
        out_specs=pl.BlockSpec((1, S, D), lambda b: (b, 0, 0)),
        scratch_shapes=scratch_shapes,
    )

    return pl.pallas_call(
        kernel,
        grid_spec=grid_spec,
        out_shape=jax.ShapeDtypeStruct((B, S, D), jnp.float32),
        compiler_params=pltpu.CompilerParams(
            # "arbitrary": the one-shot weight staging is guarded on
            # program_id(0)==0 and must see the first iteration on every core.
            dimension_semantics=("arbitrary",),
            vmem_limit_bytes=vmem_limit),
    )(*inputs)


if __name__ == "__main__":
    key = jax.random.PRNGKey(0)
    kp, kx, ke = jax.random.split(key, 3)

    # Lane-dense small config: D = 128 (one full lane width), S multiple of 8.
    block_num, num_heads, max_length, dim = 5, 4, 16, 128
    B, n = 2, 12   # input shorter than max_length exercises length_adjust

    params = init_params(kp, block_num, num_heads, max_length, dim)
    x = jax.random.normal(kx, (B, n, dim), dtype=jnp.float32)
    encoder_result = jax.random.normal(ke, (B, max_length, dim),
                                       dtype=jnp.float32)

    # Training-style path: encoder result present + causal mask.
    out = decoder_forward(params, x, encoder_result=encoder_result,
                          self_circulation=True)
    jax.block_until_ready(out)
    assert out.shape == (B, max_length, dim)
    assert bool(jnp.all(jnp.isfinite(out)))

    # Inference-style path: no encoder result, no mask (static branches drop
    # the extra input and the mask add entirely).
    out2 = decoder_forward(params, x, encoder_result=None,
                           self_circulation=False)
    jax.block_until_ready(out2)
    assert out2.shape == (B, max_length, dim)
    assert bool(jnp.all(jnp.isfinite(out2)))

    print("KERNEL_OK")
</pallas_src>

<mosaic_0001>
module attributes {stable_mosaic.version = 11 : i64} {
  func.func @kernel(%arg0: i32, %arg1: memref<1x16x128xbf16, #tpu.memory_space<vmem>>, %arg2: memref<1x16x128xbf16, #tpu.memory_space<vmem>>, %arg3: memref<4x128x128xbf16, #tpu.memory_space<any>>, %arg4: memref<4x128xf32, #tpu.memory_space<vmem>>, %arg5: memref<4x128x128xbf16, #tpu.memory_space<any>>, %arg6: memref<4x128xf32, #tpu.memory_space<vmem>>, %arg7: memref<2x128x128xbf16, #tpu.memory_space<any>>, %arg8: memref<2x128xf32, #tpu.memory_space<vmem>>, %arg9: memref<2x128xf32, #tpu.memory_space<vmem>>, %arg10: memref<2x128xf32, #tpu.memory_space<vmem>>, %arg11: memref<1x16x128xf32, #tpu.memory_space<vmem>>, %arg12: memref<4x128x128xbf16, #tpu.memory_space<vmem>>, %arg13: memref<4x128x128xbf16, #tpu.memory_space<vmem>>, %arg14: memref<2x128x128xbf16, #tpu.memory_space<vmem>>, %arg15: memref<3x!tpu.dma_semaphore, #tpu.memory_space<semaphore_mem>>) attributes {dimension_semantics = [#tpu.dimension_semantics<arbitrary>], iteration_bounds = array<i64: 2>, scalar_prefetch = 0 : i64, scratch_operands = 4 : i64, tpu.core_type = #tpu.core_type<tc>, window_params = [{transform_indices = @transform_0, window_bounds = array<i64: 1, 16, 128>}, {transform_indices = @transform_1, window_bounds = array<i64: 1, 16, 128>}, {}, {pipeline_mode = #tpu.pipeline_mode<synchronous>, transform_indices = @transform_3, window_bounds = array<i64: 4, 128>}, {}, {pipeline_mode = #tpu.pipeline_mode<synchronous>, transform_indices = @transform_5, window_bounds = array<i64: 4, 128>}, {}, {pipeline_mode = #tpu.pipeline_mode<synchronous>, transform_indices = @transform_7, window_bounds = array<i64: 2, 128>}, {pipeline_mode = #tpu.pipeline_mode<synchronous>, transform_indices = @transform_8, window_bounds = array<i64: 2, 128>}, {pipeline_mode = #tpu.pipeline_mode<synchronous>, transform_indices = @transform_9, window_bounds = array<i64: 2, 128>}, {transform_indices = @transform_10, window_bounds = array<i64: 1, 16, 128>}]} {
    %c0_i32 = arith.constant 0 : i32
    %0 = arith.cmpi eq, %arg0, %c0_i32 : i32
    %1 = arith.extui %0 : i1 to i32
    %c0_i32_0 = arith.constant 0 : i32
    %2 = arith.cmpi ne, %1, %c0_i32_0 : i32
    scf.if %2 {
      %c0_i32_83 = arith.constant 0 : i32
      %197 = tpu.memref_slice %arg15[%c0_i32_83] : memref<3x!tpu.dma_semaphore, #tpu.memory_space<semaphore_mem>> -> memref<1x!tpu.dma_semaphore, #tpu.memory_space<semaphore_mem>>
      %198 = tpu.memref_squeeze %197 : memref<1x!tpu.dma_semaphore, #tpu.memory_space<semaphore_mem>> -> memref<!tpu.dma_semaphore, #tpu.memory_space<semaphore_mem>>
      tpu.enqueue_dma source(%arg3 : memref<4x128x128xbf16, #tpu.memory_space<any>>) target(%arg12 : memref<4x128x128xbf16, #tpu.memory_space<vmem>>) target_semaphore(%198 : memref<!tpu.dma_semaphore, #tpu.memory_space<semaphore_mem>>)
      %c1_i32 = arith.constant 1 : i32
      %199 = tpu.memref_slice %arg15[%c1_i32] : memref<3x!tpu.dma_semaphore, #tpu.memory_space<semaphore_mem>> -> memref<1x!tpu.dma_semaphore, #tpu.memory_space<semaphore_mem>>
      %200 = tpu.memref_squeeze %199 : memref<1x!tpu.dma_semaphore, #tpu.memory_space<semaphore_mem>> -> memref<!tpu.dma_semaphore, #tpu.memory_space<semaphore_mem>>
      tpu.enqueue_dma source(%arg5 : memref<4x128x128xbf16, #tpu.memory_space<any>>) target(%arg13 : memref<4x128x128xbf16, #tpu.memory_space<vmem>>) target_semaphore(%200 : memref<!tpu.dma_semaphore, #tpu.memory_space<semaphore_mem>>)
      %c2_i32 = arith.constant 2 : i32
      %201 = tpu.memref_slice %arg15[%c2_i32] : memref<3x!tpu.dma_semaphore, #tpu.memory_space<semaphore_mem>> -> memref<1x!tpu.dma_semaphore, #tpu.memory_space<semaphore_mem>>
      %202 = tpu.memref_squeeze %201 : memref<1x!tpu.dma_semaphore, #tpu.memory_space<semaphore_mem>> -> memref<!tpu.dma_semaphore, #tpu.memory_space<semaphore_mem>>
      tpu.enqueue_dma source(%arg7 : memref<2x128x128xbf16, #tpu.memory_space<any>>) target(%arg14 : memref<2x128x128xbf16, #tpu.memory_space<vmem>>) target_semaphore(%202 : memref<!tpu.dma_semaphore, #tpu.memory_space<semaphore_mem>>)
      %c0_i32_84 = arith.constant 0 : i32
      %203 = tpu.memref_slice %arg15[%c0_i32_84] : memref<3x!tpu.dma_semaphore, #tpu.memory_space<semaphore_mem>> -> memref<1x!tpu.dma_semaphore, #tpu.memory_space<semaphore_mem>>
      %204 = tpu.memref_squeeze %203 : memref<1x!tpu.dma_semaphore, #tpu.memory_space<semaphore_mem>> -> memref<!tpu.dma_semaphore, #tpu.memory_space<semaphore_mem>>
      tpu.wait_dma2 semaphore(%204 : memref<!tpu.dma_semaphore, #tpu.memory_space<semaphore_mem>>) src(%arg3 : memref<4x128x128xbf16, #tpu.memory_space<any>>) dst(%arg12 : memref<4x128x128xbf16, #tpu.memory_space<vmem>>)
      %c1_i32_85 = arith.constant 1 : i32
      %205 = tpu.memref_slice %arg15[%c1_i32_85] : memref<3x!tpu.dma_semaphore, #tpu.memory_space<semaphore_mem>> -> memref<1x!tpu.dma_semaphore, #tpu.memory_space<semaphore_mem>>
      %206 = tpu.memref_squeeze %205 : memref<1x!tpu.dma_semaphore, #tpu.memory_space<semaphore_mem>> -> memref<!tpu.dma_semaphore, #tpu.memory_space<semaphore_mem>>
      tpu.wait_dma2 semaphore(%206 : memref<!tpu.dma_semaphore, #tpu.memory_space<semaphore_mem>>) src(%arg5 : memref<4x128x128xbf16, #tpu.memory_space<any>>) dst(%arg13 : memref<4x128x128xbf16, #tpu.memory_space<vmem>>)
      %c2_i32_86 = arith.constant 2 : i32
      %207 = tpu.memref_slice %arg15[%c2_i32_86] : memref<3x!tpu.dma_semaphore, #tpu.memory_space<semaphore_mem>> -> memref<1x!tpu.dma_semaphore, #tpu.memory_space<semaphore_mem>>
      %208 = tpu.memref_squeeze %207 : memref<1x!tpu.dma_semaphore, #tpu.memory_space<semaphore_mem>> -> memref<!tpu.dma_semaphore, #tpu.memory_space<semaphore_mem>>
      tpu.wait_dma2 semaphore(%208 : memref<!tpu.dma_semaphore, #tpu.memory_space<semaphore_mem>>) src(%arg7 : memref<2x128x128xbf16, #tpu.memory_space<any>>) dst(%arg14 : memref<2x128x128xbf16, #tpu.memory_space<vmem>>)
    } else {
    }
    %c0 = arith.constant 0 : index
    %c0_1 = arith.constant 0 : index
    %c0_2 = arith.constant 0 : index
    %3 = vector.load %arg1[%c0, %c0_1, %c0_2] : memref<1x16x128xbf16, #tpu.memory_space<vmem>>, vector<1x16x128xbf16>
    %4 = vector.shape_cast %3 : vector<1x16x128xbf16> to vector<16x128xbf16>
    %5 = arith.extf %4 : vector<16x128xbf16> to vector<16x128xf32>
    %6 = tpu.iota {dimensions = array<i32: 0>} : vector<16x16xi32>
    %7 = tpu.iota {dimensions = array<i32: 1>} : vector<16x16xi32>
    %8 = arith.cmpi sgt, %7, %6 : vector<16x16xi32>
    %cst = arith.constant 0xFF800000 : f32
    %cst_3 = arith.constant 0.000000e+00 : f32
    %9 = vector.broadcast %cst : f32 to vector<16x16xf32>
    %10 = vector.broadcast %cst_3 : f32 to vector<16x16xf32>
    %11 = arith.select %8, %9, %10 : vector<16x16xi1>, vector<16x16xf32>
    %12 = arith.truncf %5 : vector<16x128xf32> to vector<16x128xbf16>
    %c0_4 = arith.constant 0 : index
    %c0_5 = arith.constant 0 : index
    %c0_6 = arith.constant 0 : index
    %13 = vector.load %arg12[%c0_4, %c0_5, %c0_6] : memref<4x128x128xbf16, #tpu.memory_space<vmem>>, vector<1x128x128xbf16>
    %14 = vector.shape_cast %13 : vector<1x128x128xbf16> to vector<128x128xbf16>
    %c1 = arith.constant 1 : index
    %c0_7 = arith.constant 0 : index
    %c0_8 = arith.constant 0 : index
    %15 = vector.load %arg12[%c1, %c0_7, %c0_8] : memref<4x128x128xbf16, #tpu.memory_space<vmem>>, vector<1x128x128xbf16>
    %16 = vector.shape_cast %15 : vector<1x128x128xbf16> to vector<128x128xbf16>
    %c2 = arith.constant 2 : index
    %c0_9 = arith.constant 0 : index
    %c0_10 = arith.constant 0 : index
    %17 = vector.load %arg12[%c2, %c0_9, %c0_10] : memref<4x128x128xbf16, #tpu.memory_space<vmem>>, vector<1x128x128xbf16>
    %18 = vector.shape_cast %17 : vector<1x128x128xbf16> to vector<128x128xbf16>
    %c3 = arith.constant 3 : index
    %c0_11 = arith.constant 0 : index
    %c0_12 = arith.constant 0 : index
    %19 = vector.load %arg12[%c3, %c0_11, %c0_12] : memref<4x128x128xbf16, #tpu.memory_space<vmem>>, vector<1x128x128xbf16>
    %20 = vector.shape_cast %19 : vector<1x128x128xbf16> to vector<128x128xbf16>
    %c0_13 = arith.constant 0 : index
    %c0_14 = arith.constant 0 : index
    %21 = vector.load %arg4[%c0_13, %c0_14] : memref<4x128xf32, #tpu.memory_space<vmem>>, vector<4x128xf32>
    %22 = vector.extract_strided_slice %21 {offsets = [0, 0], sizes = [1, 128], strides = [1, 1]} : vector<4x128xf32> to vector<1x128xf32>
    %23 = vector.extract_strided_slice %21 {offsets = [1, 0], sizes = [1, 128], strides = [1, 1]} : vector<4x128xf32> to vector<1x128xf32>
    %24 = vector.extract_strided_slice %21 {offsets = [2, 0], sizes = [1, 128], strides = [1, 1]} : vector<4x128xf32> to vector<1x128xf32>
    %25 = vector.extract_strided_slice %21 {offsets = [3, 0], sizes = [1, 128], strides = [1, 1]} : vector<4x128xf32> to vector<1x128xf32>
    %cst_15 = arith.constant dense<0.000000e+00> : vector<16x128xf32>
    %26 = tpu.matmul %12, %14, %cst_15 {dimension_numbers = #tpu.dot_dimension_numbers<[1], [0], [0], [1], [0, 0, 1, 1], [], []>} : vector<16x128xbf16>, vector<128x128xbf16>, vector<16x128xf32> -> vector<16x128xf32>
    %27 = vector.broadcast %22 : vector<1x128xf32> to vector<16x128xf32>
    %28 = arith.addf %26, %27 : vector<16x128xf32>
    %cst_16 = arith.constant dense<0.000000e+00> : vector<16x128xf32>
    %29 = tpu.matmul %12, %16, %cst_16 {dimension_numbers = #tpu.dot_dimension_numbers<[1], [0], [0], [1], [0, 0, 1, 1], [], []>} : vector<16x128xbf16>, vector<128x128xbf16>, vector<16x128xf32> -> vector<16x128xf32>
    %30 = vector.broadcast %23 : vector<1x128xf32> to vector<16x128xf32>
    %31 = arith.addf %29, %30 : vector<16x128xf32>
    %cst_17 = arith.constant dense<0.000000e+00> : vector<16x128xf32>
    %32 = tpu.matmul %12, %18, %cst_17 {dimension_numbers = #tpu.dot_dimension_numbers<[1], [0], [0], [1], [0, 0, 1, 1], [], []>} : vector<16x128xbf16>, vector<128x128xbf16>, vector<16x128xf32> -> vector<16x128xf32>
    %33 = vector.broadcast %24 : vector<1x128xf32> to vector<16x128xf32>
    %34 = arith.addf %32, %33 : vector<16x128xf32>
    %cst_18 = arith.constant 0.176776692 : f32
    %35 = vector.broadcast %cst_18 : f32 to vector<16x128xf32>
    %36 = arith.mulf %28, %35 : vector<16x128xf32>
    %37 = vector.shape_cast %36 : vector<16x128xf32> to vector<16x4x32xf32>
    %38 = tpu.transpose %37, [1, 0, 2] : vector<16x4x32xf32> -> vector<4x16x32xf32>
    %39 = arith.truncf %38 : vector<4x16x32xf32> to vector<4x16x32xbf16>
    %40 = vector.shape_cast %31 : vector<16x128xf32> to vector<16x4x32xf32>
    %41 = tpu.transpose %40, [1, 0, 2] : vector<16x4x32xf32> -> vector<4x16x32xf32>
    %42 = arith.truncf %41 : vector<4x16x32xf32> to vector<4x16x32xbf16>
    %43 = vector.shape_cast %34 : vector<16x128xf32> to vector<16x4x32xf32>
    %44 = tpu.transpose %43, [1, 0, 2] : vector<16x4x32xf32> -> vector<4x16x32xf32>
    %45 = arith.truncf %44 : vector<4x16x32xf32> to vector<4x16x32xbf16>
    "tpu.trace_start"() <{level = 10 : i32, message = "hqe,hke->hqk"}> : () -> ()
    %cst_19 = arith.constant dense<0.000000e+00> : vector<4x16x16xf32>
    %46 = tpu.matmul %39, %42, %cst_19 {dimension_numbers = #tpu.dot_dimension_numbers<[2], [2], [1], [1], [0, 0, 0, 1, 1, 1], [0], [0]>} : vector<4x16x32xbf16>, vector<4x16x32xbf16>, vector<4x16x16xf32> -> vector<4x16x16xf32>
    "tpu.trace_stop"() : () -> ()
    %47 = vector.shape_cast %11 : vector<16x16xf32> to vector<1x16x16xf32>
    %48 = vector.broadcast %47 : vector<1x16x16xf32> to vector<4x16x16xf32>
    %49 = arith.addf %46, %48 : vector<4x16x16xf32>
    %cst_20 = arith.constant dense<0xFF800000> : vector<4x16xf32>
    %50 = vector.multi_reduction <maximumf>, %49, %cst_20 [2] : vector<4x16x16xf32> to vector<4x16xf32>
    %51 = vector.shape_cast %50 : vector<4x16xf32> to vector<4x16x1xf32>
    %52 = vector.broadcast %51 : vector<4x16x1xf32> to vector<4x16x16xf32>
    %53 = arith.subf %49, %52 : vector<4x16x16xf32>
    %54 = math.exp %53 : vector<4x16x16xf32>
    %cst_21 = arith.constant dense<0.000000e+00> : vector<4x16xf32>
    %55 = vector.multi_reduction <add>, %54, %cst_21 [2] : vector<4x16x16xf32> to vector<4x16xf32>
    %56 = vector.shape_cast %55 : vector<4x16xf32> to vector<4x16x1xf32>
    %57 = tpu.reciprocal %56 {approx = true} : vector<4x16x1xf32> -> vector<4x16x1xf32>
    %58 = vector.broadcast %57 : vector<4x16x1xf32> to vector<4x16x16xf32>
    %59 = arith.mulf %54, %58 : vector<4x16x16xf32>
    %60 = arith.truncf %59 : vector<4x16x16xf32> to vector<4x16x16xbf16>
    "tpu.trace_start"() <{level = 10 : i32, message = "hqk,hke->hqe"}> : () -> ()
    %cst_22 = arith.constant dense<0.000000e+00> : vector<4x16x32xf32>
    %61 = tpu.matmul %60, %45, %cst_22 {dimension_numbers = #tpu.dot_dimension_numbers<[2], [1], [1], [2], [0, 0, 0, 1, 1, 2], [0], [0]>} : vector<4x16x16xbf16>, vector<4x16x32xbf16>, vector<4x16x32xf32> -> vector<4x16x32xf32>
    "tpu.trace_stop"() : () -> ()
    %62 = tpu.transpose %61, [1, 0, 2] : vector<4x16x32xf32> -> vector<16x4x32xf32>
    %63 = vector.shape_cast %62 : vector<16x4x32xf32> to vector<16x128xf32>
    %64 = arith.truncf %63 : vector<16x128xf32> to vector<16x128xbf16>
    %cst_23 = arith.constant dense<0.000000e+00> : vector<16x128xf32>
    %65 = tpu.matmul %64, %20, %cst_23 {dimension_numbers = #tpu.dot_dimension_numbers<[1], [0], [0], [1], [0, 0, 1, 1], [], []>} : vector<16x128xbf16>, vector<128x128xbf16>, vector<16x128xf32> -> vector<16x128xf32>
    %66 = vector.broadcast %25 : vector<1x128xf32> to vector<16x128xf32>
    %67 = arith.addf %65, %66 : vector<16x128xf32>
    %68 = arith.addf %5, %67 : vector<16x128xf32>
    %c0_24 = arith.constant 0 : index
    %c0_25 = arith.constant 0 : index
    %c0_26 = arith.constant 0 : index
    %69 = vector.load %arg2[%c0_24, %c0_25, %c0_26] : memref<1x16x128xbf16, #tpu.memory_space<vmem>>, vector<1x16x128xbf16>
    %70 = vector.shape_cast %69 : vector<1x16x128xbf16> to vector<16x128xbf16>
    %71 = arith.extf %70 : vector<16x128xbf16> to vector<16x128xf32>
    %72 = arith.addf %68, %71 : vector<16x128xf32>
    %73 = arith.truncf %72 : vector<16x128xf32> to vector<16x128xbf16>
    %c0_27 = arith.constant 0 : index
    %c0_28 = arith.constant 0 : index
    %c0_29 = arith.constant 0 : index
    %74 = vector.load %arg13[%c0_27, %c0_28, %c0_29] : memref<4x128x128xbf16, #tpu.memory_space<vmem>>, vector<1x128x128xbf16>
    %75 = vector.shape_cast %74 : vector<1x128x128xbf16> to vector<128x128xbf16>
    %c1_30 = arith.constant 1 : index
    %c0_31 = arith.constant 0 : index
    %c0_32 = arith.constant 0 : index
    %76 = vector.load %arg13[%c1_30, %c0_31, %c0_32] : memref<4x128x128xbf16, #tpu.memory_space<vmem>>, vector<1x128x128xbf16>
    %77 = vector.shape_cast %76 : vector<1x128x128xbf16> to vector<128x128xbf16>
    %c2_33 = arith.constant 2 : index
    %c0_34 = arith.constant 0 : index
    %c0_35 = arith.constant 0 : index
    %78 = vector.load %arg13[%c2_33, %c0_34, %c0_35] : memref<4x128x128xbf16, #tpu.memory_space<vmem>>, vector<1x128x128xbf16>
    %79 = vector.shape_cast %78 : vector<1x128x128xbf16> to vector<128x128xbf16>
    %c3_36 = arith.constant 3 : index
    %c0_37 = arith.constant 0 : index
    %c0_38 = arith.constant 0 : index
    %80 = vector.load %arg13[%c3_36, %c0_37, %c0_38] : memref<4x128x128xbf16, #tpu.memory_space<vmem>>, vector<1x128x128xbf16>
    %81 = vector.shape_cast %80 : vector<1x128x128xbf16> to vector<128x128xbf16>
    %c0_39 = arith.constant 0 : index
    %c0_40 = arith.constant 0 : index
    %82 = vector.load %arg6[%c0_39, %c0_40] : memref<4x128xf32, #tpu.memory_space<vmem>>, vector<4x128xf32>
    %83 = vector.extract_strided_slice %82 {offsets = [0, 0], sizes = [1, 128], strides = [1, 1]} : vector<4x128xf32> to vector<1x128xf32>
    %84 = vector.extract_strided_slice %82 {offsets = [1, 0], sizes = [1, 128], strides = [1, 1]} : vector<4x128xf32> to vector<1x128xf32>
    %85 = vector.extract_strided_slice %82 {offsets = [2, 0], sizes = [1, 128], strides = [1, 1]} : vector<4x128xf32> to vector<1x128xf32>
    %86 = vector.extract_strided_slice %82 {offsets = [3, 0], sizes = [1, 128], strides = [1, 1]} : vector<4x128xf32> to vector<1x128xf32>
    %cst_41 = arith.constant dense<0.000000e+00> : vector<16x128xf32>
    %87 = tpu.matmul %73, %75, %cst_41 {dimension_numbers = #tpu.dot_dimension_numbers<[1], [0], [0], [1], [0, 0, 1, 1], [], []>} : vector<16x128xbf16>, vector<128x128xbf16>, vector<16x128xf32> -> vector<16x128xf32>
    %88 = vector.broadcast %83 : vector<1x128xf32> to vector<16x128xf32>
    %89 = arith.addf %87, %88 : vector<16x128xf32>
    %cst_42 = arith.constant dense<0.000000e+00> : vector<16x128xf32>
    %90 = tpu.matmul %73, %77, %cst_42 {dimension_numbers = #tpu.dot_dimension_numbers<[1], [0], [0], [1], [0, 0, 1, 1], [], []>} : vector<16x128xbf16>, vector<128x128xbf16>, vector<16x128xf32> -> vector<16x128xf32>
    %91 = vector.broadcast %84 : vector<1x128xf32> to vector<16x128xf32>
    %92 = arith.addf %90, %91 : vector<16x128xf32>
    %cst_43 = arith.constant dense<0.000000e+00> : vector<16x128xf32>
    %93 = tpu.matmul %73, %79, %cst_43 {dimension_numbers = #tpu.dot_dimension_numbers<[1], [0], [0], [1], [0, 0, 1, 1], [], []>} : vector<16x128xbf16>, vector<128x128xbf16>, vector<16x128xf32> -> vector<16x128xf32>
    %94 = vector.broadcast %85 : vector<1x128xf32> to vector<16x128xf32>
    %95 = arith.addf %93, %94 : vector<16x128xf32>
    %cst_44 = arith.constant 0.176776692 : f32
    %96 = vector.broadcast %cst_44 : f32 to vector<16x128xf32>
    %97 = arith.mulf %89, %96 : vector<16x128xf32>
    %98 = vector.shape_cast %97 : vector<16x128xf32> to vector<16x4x32xf32>
    %99 = tpu.transpose %98, [1, 0, 2] : vector<16x4x32xf32> -> vector<4x16x32xf32>
    %100 = arith.truncf %99 : vector<4x16x32xf32> to vector<4x16x32xbf16>
    %101 = vector.shape_cast %92 : vector<16x128xf32> to vector<16x4x32xf32>
    %102 = tpu.transpose %101, [1, 0, 2] : vector<16x4x32xf32> -> vector<4x16x32xf32>
    %103 = arith.truncf %102 : vector<4x16x32xf32> to vector<4x16x32xbf16>
    %104 = vector.shape_cast %95 : vector<16x128xf32> to vector<16x4x32xf32>
    %105 = tpu.transpose %104, [1, 0, 2] : vector<16x4x32xf32> -> vector<4x16x32xf32>
    %106 = arith.truncf %105 : vector<4x16x32xf32> to vector<4x16x32xbf16>
    "tpu.trace_start"() <{level = 10 : i32, message = "hqe,hke->hqk"}> : () -> ()
    %cst_45 = arith.constant dense<0.000000e+00> : vector<4x16x16xf32>
    %107 = tpu.matmul %100, %103, %cst_45 {dimension_numbers = #tpu.dot_dimension_numbers<[2], [2], [1], [1], [0, 0, 0, 1, 1, 1], [0], [0]>} : vector<4x16x32xbf16>, vector<4x16x32xbf16>, vector<4x16x16xf32> -> vector<4x16x16xf32>
    "tpu.trace_stop"() : () -> ()
    %108 = vector.shape_cast %11 : vector<16x16xf32> to vector<1x16x16xf32>
    %109 = vector.broadcast %108 : vector<1x16x16xf32> to vector<4x16x16xf32>
    %110 = arith.addf %107, %109 : vector<4x16x16xf32>
    %cst_46 = arith.constant dense<0xFF800000> : vector<4x16xf32>
    %111 = vector.multi_reduction <maximumf>, %110, %cst_46 [2] : vector<4x16x16xf32> to vector<4x16xf32>
    %112 = vector.shape_cast %111 : vector<4x16xf32> to vector<4x16x1xf32>
    %113 = vector.broadcast %112 : vector<4x16x1xf32> to vector<4x16x16xf32>
    %114 = arith.subf %110, %113 : vector<4x16x16xf32>
    %115 = math.exp %114 : vector<4x16x16xf32>
    %cst_47 = arith.constant dense<0.000000e+00> : vector<4x16xf32>
    %116 = vector.multi_reduction <add>, %115, %cst_47 [2] : vector<4x16x16xf32> to vector<4x16xf32>
    %117 = vector.shape_cast %116 : vector<4x16xf32> to vector<4x16x1xf32>
    %118 = tpu.reciprocal %117 {approx = true} : vector<4x16x1xf32> -> vector<4x16x1xf32>
    %119 = vector.broadcast %118 : vector<4x16x1xf32> to vector<4x16x16xf32>
    %120 = arith.mulf %115, %119 : vector<4x16x16xf32>
    %121 = arith.truncf %120 : vector<4x16x16xf32> to vector<4x16x16xbf16>
    "tpu.trace_start"() <{level = 10 : i32, message = "hqk,hke->hqe"}> : () -> ()
    %cst_48 = arith.constant dense<0.000000e+00> : vector<4x16x32xf32>
    %122 = tpu.matmul %121, %106, %cst_48 {dimension_numbers = #tpu.dot_dimension_numbers<[2], [1], [1], [2], [0, 0, 0, 1, 1, 2], [0], [0]>} : vector<4x16x16xbf16>, vector<4x16x32xbf16>, vector<4x16x32xf32> -> vector<4x16x32xf32>
    "tpu.trace_stop"() : () -> ()
    %123 = tpu.transpose %122, [1, 0, 2] : vector<4x16x32xf32> -> vector<16x4x32xf32>
    %124 = vector.shape_cast %123 : vector<16x4x32xf32> to vector<16x128xf32>
    %125 = arith.truncf %124 : vector<16x128xf32> to vector<16x128xbf16>
    %cst_49 = arith.constant dense<0.000000e+00> : vector<16x128xf32>
    %126 = tpu.matmul %125, %81, %cst_49 {dimension_numbers = #tpu.dot_dimension_numbers<[1], [0], [0], [1], [0, 0, 1, 1], [], []>} : vector<16x128xbf16>, vector<128x128xbf16>, vector<16x128xf32> -> vector<16x128xf32>
    %127 = vector.broadcast %86 : vector<1x128xf32> to vector<16x128xf32>
    %128 = arith.addf %126, %127 : vector<16x128xf32>
    %129 = arith.addf %72, %128 : vector<16x128xf32>
    %c0_50 = arith.constant 0 : index
    %c0_51 = arith.constant 0 : index
    %c0_52 = arith.constant 0 : index
    %130 = vector.load %arg14[%c0_50, %c0_51, %c0_52] : memref<2x128x128xbf16, #tpu.memory_space<vmem>>, vector<1x128x128xbf16>
    %131 = vector.shape_cast %130 : vector<1x128x128xbf16> to vector<128x128xbf16>
    %c0_53 = arith.constant 0 : index
    %c0_54 = arith.constant 0 : index
    %132 = vector.load %arg8[%c0_53, %c0_54] : memref<2x128xf32, #tpu.memory_space<vmem>>, vector<1x128xf32>
    %c0_55 = arith.constant 0 : index
    %c0_56 = arith.constant 0 : index
    %133 = vector.load %arg9[%c0_55, %c0_56] : memref<2x128xf32, #tpu.memory_space<vmem>>, vector<1x128xf32>
    %c0_57 = arith.constant 0 : index
    %c0_58 = arith.constant 0 : index
    %134 = vector.load %arg10[%c0_57, %c0_58] : memref<2x128xf32, #tpu.memory_space<vmem>>, vector<1x128xf32>
    %135 = arith.truncf %129 : vector<16x128xf32> to vector<16x128xbf16>
    %cst_59 = arith.constant dense<0.000000e+00> : vector<16x128xf32>
    %136 = tpu.matmul %135, %131, %cst_59 {dimension_numbers = #tpu.dot_dimension_numbers<[1], [0], [0], [1], [0, 0, 1, 1], [], []>} : vector<16x128xbf16>, vector<128x128xbf16>, vector<16x128xf32> -> vector<16x128xf32>
    %137 = vector.broadcast %132 : vector<1x128xf32> to vector<16x128xf32>
    %138 = arith.addf %136, %137 : vector<16x128xf32>
    %cst_60 = arith.constant dense<0.000000e+00> : vector<16xf32>
    %139 = vector.multi_reduction <add>, %138, %cst_60 [1] : vector<16x128xf32> to vector<16xf32>
    %140 = vector.shape_cast %139 : vector<16xf32> to vector<16x1xf32>
    %cst_61 = arith.constant 1.280000e+02 : f32
    %141 = vector.broadcast %cst_61 : f32 to vector<16x1xf32>
    %142 = arith.divf %140, %141 : vector<16x1xf32>
    %143 = arith.mulf %138, %138 : vector<16x128xf32>
    %cst_62 = arith.constant dense<0.000000e+00> : vector<16xf32>
    %144 = vector.multi_reduction <add>, %143, %cst_62 [1] : vector<16x128xf32> to vector<16xf32>
    %145 = vector.shape_cast %144 : vector<16xf32> to vector<16x1xf32>
    %cst_63 = arith.constant 1.280000e+02 : f32
    %146 = vector.broadcast %cst_63 : f32 to vector<16x1xf32>
    %147 = arith.divf %145, %146 : vector<16x1xf32>
    %148 = arith.mulf %142, %142 : vector<16x1xf32>
    %149 = arith.subf %147, %148 : vector<16x1xf32>
    %150 = vector.broadcast %142 : vector<16x1xf32> to vector<16x128xf32>
    %151 = arith.subf %138, %150 : vector<16x128xf32>
    %cst_64 = arith.constant 9.99999974E-6 : f32
    %152 = vector.broadcast %cst_64 : f32 to vector<16x1xf32>
    %153 = arith.addf %149, %152 : vector<16x1xf32>
    %154 = math.rsqrt %153 : vector<16x1xf32>
    %155 = vector.broadcast %154 : vector<16x1xf32> to vector<16x128xf32>
    %156 = arith.mulf %151, %155 : vector<16x128xf32>
    %157 = vector.broadcast %133 : vector<1x128xf32> to vector<16x128xf32>
    %158 = arith.mulf %156, %157 : vector<16x128xf32>
    %159 = vector.broadcast %134 : vector<1x128xf32> to vector<16x128xf32>
    %160 = arith.addf %158, %159 : vector<16x128xf32>
    %161 = arith.addf %129, %160 : vector<16x128xf32>
    %c1_65 = arith.constant 1 : index
    %c0_66 = arith.constant 0 : index
    %c0_67 = arith.constant 0 : index
    %162 = vector.load %arg14[%c1_65, %c0_66, %c0_67] : memref<2x128x128xbf16, #tpu.memory_space<vmem>>, vector<1x128x128xbf16>
    %163 = vector.shape_cast %162 : vector<1x128x128xbf16> to vector<128x128xbf16>
    %c1_68 = arith.constant 1 : index
    %c0_69 = arith.constant 0 : index
    %164 = vector.load %arg8[%c1_68, %c0_69] : memref<2x128xf32, #tpu.memory_space<vmem>>, vector<1x128xf32>
    %c1_70 = arith.constant 1 : index
    %c0_71 = arith.constant 0 : index
    %165 = vector.load %arg9[%c1_70, %c0_71] : memref<2x128xf32, #tpu.memory_space<vmem>>, vector<1x128xf32>
    %c1_72 = arith.constant 1 : index
    %c0_73 = arith.constant 0 : index
    %166 = vector.load %arg10[%c1_72, %c0_73] : memref<2x128xf32, #tpu.memory_space<vmem>>, vector<1x128xf32>
    %167 = arith.truncf %161 : vector<16x128xf32> to vector<16x128xbf16>
    %cst_74 = arith.constant dense<0.000000e+00> : vector<16x128xf32>
    %168 = tpu.matmul %167, %163, %cst_74 {dimension_numbers = #tpu.dot_dimension_numbers<[1], [0], [0], [1], [0, 0, 1, 1], [], []>} : vector<16x128xbf16>, vector<128x128xbf16>, vector<16x128xf32> -> vector<16x128xf32>
    %169 = vector.broadcast %164 : vector<1x128xf32> to vector<16x128xf32>
    %170 = arith.addf %168, %169 : vector<16x128xf32>
    %cst_75 = arith.constant dense<0.000000e+00> : vector<16xf32>
    %171 = vector.multi_reduction <add>, %170, %cst_75 [1] : vector<16x128xf32> to vector<16xf32>
    %172 = vector.shape_cast %171 : vector<16xf32> to vector<16x1xf32>
    %cst_76 = arith.constant 1.280000e+02 : f32
    %173 = vector.broadcast %cst_76 : f32 to vector<16x1xf32>
    %174 = arith.divf %172, %173 : vector<16x1xf32>
    %175 = arith.mulf %170, %170 : vector<16x128xf32>
    %cst_77 = arith.constant dense<0.000000e+00> : vector<16xf32>
    %176 = vector.multi_reduction <add>, %175, %cst_77 [1] : vector<16x128xf32> to vector<16xf32>
    %177 = vector.shape_cast %176 : vector<16xf32> to vector<16x1xf32>
    %cst_78 = arith.constant 1.280000e+02 : f32
    %178 = vector.broadcast %cst_78 : f32 to vector<16x1xf32>
    %179 = arith.divf %177, %178 : vector<16x1xf32>
    %180 = arith.mulf %174, %174 : vector<16x1xf32>
    %181 = arith.subf %179, %180 : vector<16x1xf32>
    %182 = vector.broadcast %174 : vector<16x1xf32> to vector<16x128xf32>
    %183 = arith.subf %170, %182 : vector<16x128xf32>
    %cst_79 = arith.constant 9.99999974E-6 : f32
    %184 = vector.broadcast %cst_79 : f32 to vector<16x1xf32>
    %185 = arith.addf %181, %184 : vector<16x1xf32>
    %186 = math.rsqrt %185 : vector<16x1xf32>
    %187 = vector.broadcast %186 : vector<16x1xf32> to vector<16x128xf32>
    %188 = arith.mulf %183, %187 : vector<16x128xf32>
    %189 = vector.broadcast %165 : vector<1x128xf32> to vector<16x128xf32>
    %190 = arith.mulf %188, %189 : vector<16x128xf32>
    %191 = vector.broadcast %166 : vector<1x128xf32> to vector<16x128xf32>
    %192 = arith.addf %190, %191 : vector<16x128xf32>
    %193 = arith.addf %161, %192 : vector<16x128xf32>
    %c0_80 = arith.constant 0 : index
    %c0_81 = arith.constant 0 : index
    %c0_82 = arith.constant 0 : index
    %194 = vector.load %arg11[%c0_80, %c0_81, %c0_82] : memref<1x16x128xf32, #tpu.memory_space<vmem>>, vector<1x16x128xf32>
    %195 = vector.shape_cast %194 : vector<1x16x128xf32> to vector<16x128xf32>
    %196 = vector.shape_cast %193 : vector<16x128xf32> to vector<1x16x128xf32>
    tpu.vector_store %arg11[%c0_80, %c0_81, %c0_82], %196 {strides = array<i32>} : memref<1x16x128xf32, #tpu.memory_space<vmem>>, vector<1x16x128xf32>,
    return
  }
  func.func @transform_0(%arg0: i32) -> (i32, i32, i32) {
    %c0_i32 = arith.constant 0 : i32
    %c0_i32_0 = arith.constant 0 : i32
    %c0_i32_1 = arith.constant 0 : i32
    return %arg0, %c0_i32, %c0_i32_0 : i32, i32, i32
  }
  func.func @transform_1(%arg0: i32) -> (i32, i32, i32) {
    %c0_i32 = arith.constant 0 : i32
    %c0_i32_0 = arith.constant 0 : i32
    %c0_i32_1 = arith.constant 0 : i32
    return %arg0, %c0_i32, %c0_i32_0 : i32, i32, i32
  }
  func.func @transform_3(%arg0: i32) -> (i32, i32) {
    %c0_i32 = arith.constant 0 : i32
    %c0_i32_0 = arith.constant 0 : i32
    %c0_i32_1 = arith.constant 0 : i32
    return %c0_i32, %c0_i32_0 : i32, i32
  }
  func.func @transform_5(%arg0: i32) -> (i32, i32) {
    %c0_i32 = arith.constant 0 : i32
    %c0_i32_0 = arith.constant 0 : i32
    %c0_i32_1 = arith.constant 0 : i32
    return %c0_i32, %c0_i32_0 : i32, i32
  }
  func.func @transform_7(%arg0: i32) -> (i32, i32) {
    %c0_i32 = arith.constant 0 : i32
    %c0_i32_0 = arith.constant 0 : i32
    %c0_i32_1 = arith.constant 0 : i32
    return %c0_i32, %c0_i32_0 : i32, i32
  }
  func.func @transform_8(%arg0: i32) -> (i32, i32) {
    %c0_i32 = arith.constant 0 : i32
    %c0_i32_0 = arith.constant 0 : i32
    %c0_i32_1 = arith.constant 0 : i32
    return %c0_i32, %c0_i32_0 : i32, i32
  }
  func.func @transform_9(%arg0: i32) -> (i32, i32) {
    %c0_i32 = arith.constant 0 : i32
    %c0_i32_0 = arith.constant 0 : i32
    %c0_i32_1 = arith.constant 0 : i32
    return %c0_i32, %c0_i32_0 : i32, i32
  }
  func.func @transform_10(%arg0: i32) -> (i32, i32, i32) {
    %c0_i32 = arith.constant 0 : i32
    %c0_i32_0 = arith.constant 0 : i32
    %c0_i32_1 = arith.constant 0 : i32
    return %arg0, %c0_i32, %c0_i32_0 : i32, i32, i32
  }
}

</mosaic_0001>

<bundles_post_ra>
// kernel: tpu_custom_call.1
= control target key start
LH: loop header
LB: loop body
LE: loop exit
PB: predicated region body
PF: predicated region fallthrough
CT: control target
= control target key end

     0   :  { %s7250_s0 = inlined_call_operand.hbm [shape: bf16[2,16,128], index: 0, kind: input, shape index: {}]   ;;  %s7251_s1 = inlined_call_operand.hbm [shape: bf16[2,16,128], index: 1, kind: input, shape index: {}]   ;;  %s7252_s2 = inlined_call_operand.hbm [shape: bf16[4,128,128], index: 2, kind: input, shape index: {}]   ;;  %s7253_s3 = inlined_call_operand.vmem [shape: f32[4,128], index: 3, kind: input, shape index: {}]   ;;  %s7254_s4 = inlined_call_operand.hbm [shape: bf16[4,128,128], index: 4, kind: input, shape index: {}]   ;;  %s7255_s5 = inlined_call_operand.vmem [shape: f32[4,128], index: 5, kind: input, shape index: {}]   ;;  %s7256_s6 = inlined_call_operand.hbm [shape: bf16[2,128,128], index: 6, kind: input, shape index: {}]   ;;  %s7257_s7 = inlined_call_operand.vmem [shape: f32[2,128], index: 7, kind: input, shape index: {}]   ;;  %s7258_s8 = inlined_call_operand.vmem [shape: f32[2,128], index: 8, kind: input, shape index: {}]   ;;  %s7259_s9 = inlined_call_operand.vmem [shape: f32[2,128], index: 9, kind: input, shape index: {}]   ;;  %s7260_s10 = inlined_call_operand.hbm [shape: f32[2,16,128], index: 10, kind: output, shape index: {}]  }
   0x1   :  { %7271 = sst [smem:[#allocation30_spill]] %s7250_s0 }
   0x2   :  { %15 = vsyncpa [#allocation7], 0 }
   0x3   :  { %17 = vsyncpa [#allocation7 + $0x1], 0 }
   0x4   :  { %18 = vsyncpa [#allocation10], 0 }
   0x5   :  { %20 = vsyncpa [#allocation10 + $0x1], 0 }
   0x6   :  { %21 = vsyncpa [#allocation8], 0 }
   0x7   :  { %23 = vsyncpa [#allocation8 + $0x1], 0  ;;  %s6168_s13 = smov 0   ;;  %s6170_s14 = smov 0  }
   0x8   :  { %s6172_s15 = smov 0   ;;  %s6174_s16 = smov 0  }
   0x9 LB: > { %7272 = sst [smem:[#allocation26_spill]] %s6090_s15  ;;  %s6189_s17 = sadd.s32 4294967295, %s6094_s16   ;;  %s6094_s16 = sphi %s6174_s16, %s7304_s16   ;;  %s6090_s15 = sphi %s6172_s15, %s7306_s15   ;;  %s6086_s14 = sphi %s6170_s14, %s7308_s14   ;;  %s6082_s13 = sphi %s6168_s13, %s7307_s13  }
   0xa   : > { %s5044_s18 = sadd.s32 4294967294, %s6094_s16   ;;  %s6193_s19 = sadd.s32 1, %s6094_s16  }
   0xb   : > { %7273 = sst [smem:[#allocation27_spill]] %s6193_s19  ;;  %s36_s20 = sadd.s32 1, %s6090_s15 }
   0xc   : > { %s33_s21 = ssub.s32 %s6094_s16, %s6193_s19  ;;  %p43_p0 = scmp.ne.s32.totalorder %s6090_s15, %s6086_s14 }
   0xd   : > { %p34_p1 = scmp.eq.s32.totalorder %s33_s21, 0  ;;  %p44_p2 = scmp.eq.s32.totalorder %s6094_s16, 0 }
   0xe   : > { %p49_p3 = scmp.ne.s32.totalorder %s6086_s14, %s6082_s13  ;;  %p7264_p4 = scmp.eq.s32.totalorder %s6189_s17, 0 }
   0xf   : > { %s6205_s22 = scalar_select %p34_p1, %s6090_s15, %s36_s20  }
  0x10   : > { %p6207_p5 = por %p44_p2, %p43_p0  ;;  %p6213_p6 = por %p7264_p4, %p49_p3 }
  0x11   : > { %7274 = sst [smem:[#allocation28_spill]] %s6205_s22  ;;  %p204_p7 = scmp.eq.s32.totalorder %s6189_s17, 1 }
  0x12   : > { %s7276_s24 = scalar_select %p6213_p6, 1, 0 }
  0x13   : > { %p210_p8 = scmp.eq.s32.totalorder %s5044_s18, 1  ;;  %p5650_p10 = scmp.lt.s32.totalorder %s6094_s16, 2 }
  0x14   : > { %p6220_p11 = por %p204_p7, %p43_p0  ;;  %s6229_s27 = sand.u32 1, %s6090_s15  }
  0x15   : > { %p6224_p12 = por %p210_p8, %p49_p3  ;;  %s7263_s28 = sshll.u32 %s6094_s16, 7 }
  0x16   : > { %s7277_s25 = scalar_select %p6220_p11, 1, 0 }
  0x17   : > { %s7278_s26 = scalar_select %p6224_p12, 1, 0 }
  0x18   : > { %s7262_s29 = sshll.u32 %s6229_s27, 3  ;;  %s7280_s0 = sld [smem:[#allocation30_spill]] }
  0x19   : > { %7279 = sst [smem:[#allocation29_spill]] %s7278_s26  ;;  %s249_s18 = scalar_lea.vmem [#allocation6], %s7262_s29 }
  0x1a   : > { %s256_s20 = sshll.u32 %s249_s18, 4  ;;  %p6244_p13 = pnand %p5650_p10, %p6207_p5  ;;  %s6248_s20 = int_to_ptr.vmem [resolvable:$true] %s256_s20 }
  0x1c   : > { %p5888_p1 = pneg %p6244_p13 }
  0x1e   : > { %s6238_s12 = scalar_lea.hbm %s7280_s0, %s7263_s28  ;;  %s5891_s23 = scalar_lea.hbm %s7280_s0, 256 }
  0x1f   : > { %s5886_s15 = scalar_lea.hbm %s6238_s12, 128  ;;  %p5892_p5 = scmp.lt.s32.totalorder %s6238_s12, %s7280_s0 }
  0x20   : > { %p5887_p0 = scmp.ne.s32.totalorder %s6238_s12, %s5886_s15  ;;  %p5893_p7 = scmp.lt.s32.totalorder %s5891_s23, %s5886_s15 }
  0x22   : > { %p5889_p2 = pnand %p5888_p1, %p5887_p0  ;;  %p5894_p8 = por %p5893_p7, %p5892_p5 }
  0x24   : > { %p5890_p3 = pneg %p5889_p2 }
  0x26   : > { %p5895_p10 = pnand %p5894_p8, %p5890_p3 }
  0x28   : > { %5898 = shalt.err (!%p5895_p10)
}
  0x29   : > { %s5899_s28 = scalar_lea.vmem %s6248_s20, 128  ;;  %s6096_s30 = smov [#allocation6]  }
  0x2a   : > { %p5900_p9 = scmp.ne.s32.totalorder %s6248_s20, %s5899_s28  ;;  %s5904_s11 = sshll.u32 %s6096_s30, 4  ;;  %s5905_s11 = int_to_ptr.vmem [resolvable:$false] %s5904_s11 }
  0x2b   : > { %s5906_s22 = scalar_lea.vmem %s5905_s11, 256  ;;  %p5907_p4 = scmp.lt.s32.totalorder %s6248_s20, %s5905_s11 }
  0x2c   : > { %p5902_p0 = pnand %p5900_p9, %p5888_p1  ;;  %p5908_p12 = scmp.lt.s32.totalorder %s5906_s22, %s5899_s28 }
  0x2e   : > { %p5903_p2 = pneg %p5902_p0  ;;  %p5909_p11 = por %p5908_p12, %p5907_p4 }
  0x30   : > { %p5910_p5 = pnand %p5909_p11, %p5903_p2 }
  0x32   : > { %5913 = shalt.err (!%p5910_p5)
}
  0x33   : > { %s7269_s15 = smov 64   ;;  %s6098_s29 = smov 4  }
  0x34   : > { %s7282_s22 = scalar_lea.sflag [#allocation7], %s6229_s27  ;;  %p5053_p4 = scmp.ge.s32.totalorder %s6094_s16, 1 }
  0x35   : > { %5642 = dma.hbm_to_vmem [thread:$0]  (!%p6244_p13), %s6238_s12, 128, %s6248_s20, %s7282_s22, %s7269_s15, %s7269_s15, %s6098_s29  }
  0x36   : > { %p285_p9 = scmp.lt.s32.totalorder %s6094_s16, 3  ;;  %s7284_s23 = sshll.u32 %s6094_s16, 7 }
  0x37   : > { %s6291_s11 = scalar_lea.hbm %s7251_s1, %s7284_s23  ;;  %s7285_s0 = sshll.u32 %s6229_s27, 3 }
  0x38   : > { %p6282_p11 = pnand %p5053_p4, %p285_p9  ;;  %s270_s19 = scalar_lea.vmem [#allocation9], %s7285_s0 }
  0x39   : > { %s277_s26 = sshll.u32 %s270_s19, 4  ;;  %s267_s12 = scalar_lea.sflag [#allocation10], %s6229_s27  ;;  %s6295_s26 = int_to_ptr.vmem [resolvable:$true] %s277_s26 }
  0x3a   : > { %s5914_s20 = scalar_lea.hbm %s6291_s11, 128  ;;  %s5919_s23 = scalar_lea.hbm %s7251_s1, 256 }
  0x3b   : > { %p5915_p12 = scmp.ne.s32.totalorder %s6291_s11, %s5914_s20  ;;  %p5920_p8 = scmp.lt.s32.totalorder %s6291_s11, %s7251_s1 }
  0x3c   : > { %p5921_p10 = scmp.lt.s32.totalorder %s5919_s23, %s5914_s20 }
  0x3d   : > { %p5917_p3 = pnand %p5915_p12, %p5888_p1 }
  0x3e   : > { %p5922_p0 = por %p5921_p10, %p5920_p8 }
  0x3f   : > { %p5918_p7 = pneg %p5917_p3 }
  0x41   : > { %p5923_p2 = pnand %p5922_p0, %p5918_p7 }
  0x43   : > { %5926 = shalt.err (!%p5923_p2)
}
  0x44   : > { %s5927_s0 = scalar_lea.vmem %s6295_s26, 128  ;;  %s6099_s19 = smov [#allocation9]  }
  0x45   : > { %p5928_p5 = scmp.ne.s32.totalorder %s6295_s26, %s5927_s0  ;;  %s5932_s27 = sshll.u32 %s6099_s19, 4  ;;  %s5933_s27 = int_to_ptr.vmem [resolvable:$false] %s5932_s27 }
  0x46   : > { %s5934_s15 = scalar_lea.vmem %s5933_s27, 256  ;;  %p5935_p12 = scmp.lt.s32.totalorder %s6295_s26, %s5933_s27 }
  0x47   : > { %p5930_p4 = pnand %p5928_p5, %p5888_p1  ;;  %p5936_p3 = scmp.lt.s32.totalorder %s5934_s15, %s5927_s0 }
  0x49   : > { %p5931_p9 = pneg %p5930_p4  ;;  %p5937_p6 = por %p5936_p3, %p5935_p12 }
  0x4b   : > { %p5938_p8 = pnand %p5937_p6, %p5931_p9 }
  0x4d   : > { %5941 = shalt.err (!%p5938_p8)
}
  0x4e   : > { %s7286_s20 = smov 64   ;;  %289 = sbr.rel (%p6282_p11) target bundleno = 3840 (0xf00), region = 48 }
  0x4f   : > { %5645 = dma.hbm_to_vmem [thread:$0]  (!%p6244_p13), %s6291_s11, 128, %s6295_s26, %s267_s12, %s7286_s20, %s7286_s20, %s6098_s29  }
  0x50   : > { %s6326_s22 = sand.u32 (!%p6282_p11), 1, %s6086_s14   ;;  %p7287_p6 = scmp.ne.s32.totalorder (!%p6282_p11), %s7276_s24, 0 }
  0x51   : > { %s5054_s23 = sshll.u32 (!%p6282_p11), %s6326_s22, 3  ;;  %s292_s18 = scalar_lea.sflag (!%p6282_p11), [#allocation7], %s6326_s22 }
  0x52   : > { %s6330_s30 = scalar_lea.vmem (!%p6282_p11), [#allocation6], %s5054_s23 }
  0x53   : > { %6057 = dma.done.wait (%p7287_p6), %s292_s18, 128  }
  0x54   : > { %6059 = vsyncadd (%p7287_p6), %s292_s18, 4294967168  ;;  %s301_s26 = scalar_lea.sflag [#allocation10], %s6326_s22  ;;  %s6337_s21 = scalar_lea.vmem [#allocation9], %s5054_s23 }
  0x55   : > { %6061 = dma.done.wait (%p7287_p6), %s301_s26, 128  }
  0x56   : > { %6063 = vsyncadd (%p7287_p6), %s301_s26, 4294967168  ;;  %s5056_s29 = sshll.u32 %s6326_s22, 4  ;;  %s6100_s28 = smov [#allocation2]  }
  0x57   : > { %s352_s11 = sshll.u32 %s6100_s28, 4  ;;  %s6101_s12 = smov [#allocation3]   ;;  %s353_s11 = int_to_ptr.vmem [resolvable:$true] %s352_s11 }
  0x58   : > { %s364_s0 = sshll.u32 %s6101_s12, 4  ;;  %s5952_s19 = scalar_lea.vmem %s353_s11, 4096  ;;  %s365_s0 = int_to_ptr.vmem [resolvable:$true] %s364_s0 }
  0x59   : > { %p5953_p13 = scmp.ne.s32.totalorder %s353_s11, %s5952_s19  ;;  %p7288_p1 = scmp.eq.s32.totalorder %s6189_s17, 0 }
  0x5a   : > { %p5959_p10 = scmp.lt.s32.totalorder %s353_s11, %s353_s11  ;;  %p5960_p0 = scmp.lt.s32.totalorder %s5952_s19, %s5952_s19 }
  0x5b   : > { %p5954_p11 = pnand %p5953_p13, %p7288_p1 }
  0x5c   : > { %p5961_p2 = por %p5960_p0, %p5959_p10 }
  0x5d   : > { %p5955_p7 = pneg %p5954_p11 }
  0x5f   : > { %p5962_p5 = pnand %p5961_p2, %p5955_p7 }
  0x61   : > { %5965 = shalt.err (!%p5962_p5)  }
  0x62   : > { %p7289_p4 = pmov %p7288_p1  ;;  %s5976_s15 = scalar_lea.vmem %s365_s0, 4096 }
  0x63   : > { %p5977_p9 = scmp.ne.s32.totalorder %s365_s0, %s5976_s15  ;;  %p7290_p12 = pmov %p7288_p1 }
  0x64   : > { %5631 = dma.hbm_to_vmem [thread:$0]  (%p7289_p4), %s7252_s2, 4096, %s353_s11, [#allocation5] }
  0x65   : > { %p5978_p3 = pnand %p5977_p9, %p7290_p12  ;;  %p5983_p6 = scmp.lt.s32.totalorder %s365_s0, %s365_s0 }
  0x66   : > { %p5984_p13 = scmp.lt.s32.totalorder %s5976_s15, %s5976_s15 }
  0x67   : > { %p5979_p8 = pneg %p5978_p3 }
  0x68   : > { %p5985_p1 = por %p5984_p13, %p5983_p6 }
  0x6a   : > { %p5986_p11 = pnand %p5985_p1, %p5979_p8 }
  0x6c   : > { %5989 = shalt.err (!%p5986_p11)  }
  0x6d   : > { %p7291_p7 = pmov %p7289_p4  ;;  %s6102_s18 = smov [#allocation4]  }
  0x6e   : > { %s376_s26 = sshll.u32 %s6102_s18, 4  ;;  %p7292_p0 = pmov %p7289_p4  ;;  %s377_s26 = int_to_ptr.vmem [resolvable:$true] %s376_s26 }
  0x6f   : > { %5632 = dma.hbm_to_vmem [thread:$0]  (%p7291_p7), %s7254_s4, 4096, %s365_s0, [#allocation5 + $0x1] }
  0x70   : > { %s6000_s28 = scalar_lea.vmem %s377_s26, 2048  ;;  %p6007_p4 = scmp.lt.s32.totalorder %s377_s26, %s377_s26 }
  0x71   : > { %p6001_p10 = scmp.ne.s32.totalorder %s377_s26, %s6000_s28  ;;  %p6008_p9 = scmp.lt.s32.totalorder %s6000_s28, %s6000_s28 }
  0x73   : > { %p6002_p2 = pnand %p6001_p10, %p7292_p0  ;;  %p6009_p12 = por %p6008_p9, %p6007_p4 }
  0x75   : > { %p6003_p5 = pneg %p6002_p2 }
  0x77   : > { %p6010_p3 = pnand %p6009_p12, %p6003_p5 }
  0x79   : > { %6013 = shalt.err (!%p6010_p3)  }
  0x7a   : > { %p7293_p8 = pmov %p7292_p0  ;;  %s6367_s0 = scalar_lea.vmem [#allocation11], %s5056_s29 }
  0x7b   : > { %p7294_p6 = pmov %p7292_p0 }
  0x7c   : > { %5633 = dma.hbm_to_vmem [thread:$0]  (%p7293_p8), %s7256_s6, 2048, %s377_s26, [#allocation5 + $0x2] }
  0x7d   : > { %6065 = dma.done.wait (%p7294_p6), [#allocation5], 4096  ;;  %p7295_p13 = pmov %p7292_p0 }
  0x7e   : > { %p7296_p1 = pmov %p7292_p0 }
  0x7f   : > { %6067 = vsyncadd (%p7295_p13), [#allocation5], 4294963200 }
  0x80   : > { %6069 = dma.done.wait (%p7296_p1), [#allocation5 + $0x1], 4096  ;;  %p7297_p11 = pmov %p7292_p0 }
  0x81   : > { %p7298_p7 = pmov %p7292_p0 }
  0x82   : > { %6071 = vsyncadd (%p7297_p11), [#allocation5 + $0x1], 4294963200 }
  0x83   : > { %6073 = dma.done.wait (%p7298_p7), [#allocation5 + $0x2], 2048  ;;  %p7299_p10 = pmov %p7292_p0 }
  0x84   : > { %v6103_v0 = vmov 0.0   ;;  %vm6104_vm0 = vmmov 0   ;;  %v5729_v1 = vld [vmem:[#allocation2 + $0x38] sm:$0xff]   ;;  %v5731_v3 = vld [vmem:[#allocation2 + $0x30] sm:$0xff]   ;;  %v5733_v5 = vld [vmem:[#allocation2 + $0x28] sm:$0xff]   ;;  %v396_v25 = vlaneseq  ;;  %s6105_s24 = smov 64  }
  0x85   : > { %6075 = vsyncadd (%p7299_p10), [#allocation5 + $0x2], 4294965248  ;;  %5330 = vmatprep.subr.bf16.mxu0 %v6103_v0  ;;  %5350 = vmatprep.subr.bf16.mxu1 %v6103_v0  ;;  %v5730_v2 = vld [vmem:[#allocation2 + $0x78] sm:$0xff]   ;;  %v5732_v4 = vld [vmem:[#allocation2 + $0x70] sm:$0xff]   ;;  %s6106_s27 = smov 96   ;;  %s6107_s15 = smov 32  }
  0x86   : > { %5346 = vmatprep.mubr.msk.bf16.mxu0 %vm6104_vm0, %v6103_v0  ;;  %5366 = vmatprep.mubr.msk.bf16.mxu1 %vm6104_vm0, %v6103_v0  ;;  %v5734_v6 = vld [vmem:[#allocation2 + $0x68] sm:$0xff]   ;;  %v5735_v7 = vld [vmem:[#allocation2 + $0x20] sm:$0xff]   ;;  %v5737_v9 = vld [vmem:[#allocation2 + $0x18] sm:$0xff]   ;;  %v6416_v27 = vshrl.u32 %v396_v25, 7  ;;  %v6108_v47 = vmov 1983009808  }
  0x87   : > { %5331 = vmatpush3.bf16.msra.mxu0 %v5729_v1  ;;  %5351 = vmatpush3.bf16.msra.mxu1 %v5730_v2  ;;  %v5736_v8 = vld [vmem:[#allocation2 + $0x60] sm:$0xff]   ;;  %v5738_v10 = vld [vmem:[#allocation2 + $0x58] sm:$0xff]   ;;  %v5739_v11 = vld [vmem:[#allocation2 + $0x10] sm:$0xff]   ;;  %v783_v48 = vunpack.c.l.s4 %v6108_v47  ;;  %v6109_v49 = vmov 1934713408   ;;  %vm1648_vm1 = vcmask 261120  }
  0x88   : > { %5332 = vmatprep.subr.bf16.mxu0 %v6103_v0  ;;  %5352 = vmatprep.subr.bf16.mxu1 %v6103_v0  ;;  %v5740_v12 = vld [vmem:[#allocation2 + $0x50] sm:$0xff]   ;;  %v5741_v13 = vld [vmem:[#allocation2 + $0x8] sm:$0xff]   ;;  %v5743_v15 = vld [vmem:[#allocation2] sm:$0xff]   ;;  %v574_v28 = vsub.s32 1, %v6416_v27  ;;  %v475_v30 = vsub.s32 0, %v6416_v27  ;;  %v815_v50 = vunpack.c.l.s4 %v6109_v49  ;;  %vm1837_vm4 = vcmask 130048  }
  0x89   : > { %v5742_v14 = vld [vmem:[#allocation2 + $0x48] sm:$0xff]   ;;  %v5744_v17 = vld [vmem:[#allocation2 + $0x40] sm:$0xff]   ;;  %v5746_v18 = vld [vmem:[#allocation2 + $0xb8] sm:$0xff]   ;;  %v784_v51 = vunpack.c.0.s8 %v783_v48  ;;  %vm2404_vm5 = vcmask 523264   ;;  %vm2407_vm6 = vcmask 785408   ;;  %s5203_s18 = sshll.u32 %s6189_s17, 8 }
  0x8a   : > { %v392_v16 = vld [vmem:[%s6330_s30] sm:$0xff]   ;;  %v5747_v19 = vld [vmem:[#allocation2 + $0xb0] sm:$0xff]   ;;  %v5750_v22 = vld [vmem:[#allocation2 + $0x98] sm:$0xff]   ;;  %v816_v54 = vunpack.c.0.s8 %v815_v50  ;;  %s4928_s26 = sshll.u32 %s6367_s0, 4  ;;  %s7204_s12 = scalar_lea.hbm %s7260_s10, %s5203_s18  ;;  %s7206_s26 = int_to_ptr.vmem [resolvable:$true] %s4928_s26 }
  0x8b   : > { %5333 = vmatpush3.bf16.msra.mxu0 %v5731_v3  ;;  %5353 = vmatpush3.bf16.msra.mxu1 %v5732_v4  ;;  %v5748_v20 = vld [vmem:[#allocation2 + $0xa8] sm:$0xff]   ;;  %v5749_v21 = vld [vmem:[#allocation2 + $0xa0] sm:$0xff]   ;;  %v5751_v23 = vld [vmem:[#allocation2 + $0x90] sm:$0xff]   ;;  %v6457_v55 = vsub.s32 %v784_v51, %v6416_v27  ;;  %s4915_s29 = scalar_lea.sflag [#allocation8], %s6326_s22  ;;  %s6014_s19 = scalar_lea.vmem %s7206_s26, 256 }
  0x8c   : > { %5334 = vmatprep.subr.bf16.mxu0 %v6103_v0  ;;  %5354 = vmatprep.subr.bf16.mxu1 %v6103_v0  ;;  %v5752_v24 = vld [vmem:[#allocation2 + $0x88] sm:$0xff]   ;;  %v5753_v26 = vld [vmem:[#allocation2 + $0x80] sm:$0xff]   ;;  %v6460_v62 = vsub.s32 %v816_v54, %v6416_v27  ;;  %p6015_p0 = scmp.ne.s32.totalorder %s7206_s26, %s6014_s19  ;;  %p7300_p2 = scmp.ne.s32.totalorder %s7277_s25, 0 }
  0x8d   : > { %v6423_v29 = vld [vmem:[%s7253_s3] sm:$0xf]  ;;  %s6110_s17 = smov [#allocation11]  }
  0x8e   : > { %v575_v31 = vrot.slane %v6423_v29, %v574_v28  ;;  %v476_v32 = vrot.slane %v6423_v29, %v475_v30  ;;  %p6016_p5 = pnand %p6015_p0, %p7300_p2 }
  0x8f   : > { %5335 = vmatpush3.bf16.msra.mxu0 %v5733_v5  ;;  %5355 = vmatpush3.bf16.msra.mxu1 %v5734_v6 }
  0x90   : > { %5336 = vmatprep.subr.bf16.mxu0 %v6103_v0  ;;  %5356 = vmatprep.subr.bf16.mxu1 %v6103_v0  ;;  %p6017_p4 = pneg %p6016_p5 }
  0x93   : > { %5337 = vmatpush3.bf16.msra.mxu0 %v5735_v7  ;;  %5357 = vmatpush3.bf16.msra.mxu1 %v5736_v8 }
  0x94   : > { %5338 = vmatprep.subr.bf16.mxu0 %v6103_v0  ;;  %5358 = vmatprep.subr.bf16.mxu1 %v6103_v0 }
  0x97   : > { %5339 = vmatpush3.bf16.msra.mxu0 %v5737_v9  ;;  %5359 = vmatpush3.bf16.msra.mxu1 %v5738_v10 }
  0x98   : > { %5340 = vmatprep.subr.bf16.mxu0 %v6103_v0  ;;  %5360 = vmatprep.subr.bf16.mxu1 %v6103_v0 }
  0x9b   : > { %5341 = vmatpush3.bf16.msra.mxu0 %v5739_v11  ;;  %5361 = vmatpush3.bf16.msra.mxu1 %v5740_v12 }
  0x9c   : > { %5342 = vmatprep.subr.bf16.mxu0 %v6103_v0  ;;  %5362 = vmatprep.subr.bf16.mxu1 %v6103_v0 }
  0x9f   : > { %5343 = vmatpush3.bf16.msra.mxu0 %v5741_v13  ;;  %5363 = vmatpush3.bf16.msra.mxu1 %v5742_v14 }
  0xa0   : > { %5344 = vmatprep.subr.bf16.mxu0 %v6103_v0  ;;  %5364 = vmatprep.subr.bf16.mxu1 %v6103_v0 }
  0xa3   : > { %5345 = vmatpush3.bf16.msra.mxu0 %v5743_v15  ;;  %5365 = vmatpush3.bf16.msra.mxu1 %v5744_v17 }
  0xa4   : > { %5370 = vmatprep.subr.bf16.mxu0 %v6103_v0  ;;  %5390 = vmatprep.subr.bf16.mxu1 %v6103_v0 }
  0xa6   : > { %5347 = vmatmul.mubr.bf16.vlgmr.msra.gmra.mxu0 %v392_v16  ;;  %5367 = vmatmul.mubr.bf16.vlgmr.msra.gmra.mxu1 %v392_v16 }
  0xa7   : > { %5386 = vmatprep.mubr.msk.bf16.mxu0 %vm6104_vm0, %v6103_v0  ;;  %5392 = vmatprep.mubr.msk.bf16.mxu1 %vm6104_vm0, %v6103_v0 }
  0xa8   : > { %5371 = vmatpush3.bf16.msra.mxu0 %v5746_v18 }
  0xa9   : > { %5372 = vmatprep.subr.bf16.mxu0 %v6103_v0 }
  0xac   : > { %5373 = vmatpush3.bf16.msra.mxu0 %v5747_v19 }
  0xad   : > { %5374 = vmatprep.subr.bf16.mxu0 %v6103_v0 }
  0xb0   : > { %5375 = vmatpush3.bf16.msra.mxu0 %v5748_v20 }
  0xb1   : > { %5376 = vmatprep.subr.bf16.mxu0 %v6103_v0 }
  0xb4   : > { %5377 = vmatpush3.bf16.msra.mxu0 %v5749_v21 }
  0xb5   : > { %5378 = vmatprep.subr.bf16.mxu0 %v6103_v0 }
  0xb8   : > { %5379 = vmatpush3.bf16.msra.mxu0 %v5750_v22 }
  0xb9   : > { %5380 = vmatprep.subr.bf16.mxu0 %v6103_v0 }
  0xbc   : > { %5381 = vmatpush3.bf16.msra.mxu0 %v5751_v23 }
  0xbd   : > { %5382 = vmatprep.subr.bf16.mxu0 %v6103_v0 }
  0xc0   : > { %5383 = vmatpush3.bf16.msra.mxu0 %v5752_v24 }
  0xc1   : > { %5384 = vmatprep.subr.bf16.mxu0 %v6103_v0 }
  0xc4   : > { %5385 = vmatpush3.bf16.msra.mxu0 %v5753_v26 }
  0xc5   : > { %5438 = vmatprep.subr.bf16.mxu0 %v6103_v0 }
  0xc7   : > { %5387 = vmatmul.mubr.bf16.vlgmr.msra.gmra.mxu0 %v392_v16 }
  0xc8   : > { %5454 = vmatprep.mubr.msk.bf16.mxu0 %vm6104_vm0, %v6103_v0 }
 0x166   : > { %v565_v33 = vpop.f32.mrf.mxu0  ;;  %v658_v34 = vpop.f32.mrf.mxu1 }
 0x167   : > { %v659_v35 = vadd.f32 %v658_v34, %v575_v31  ;;  %v566_v38 = vadd.f32 %v565_v33, %v476_v32 }
 0x168   : > { %v5348_v36 = vpop.f32.mrf.mxu0  ;;  %v5368_v37 = vpop.f32.mrf.mxu1 }
 0x169   : > { %1064 = vrot.lane.b32.xlu1 %v659_v35, %s6105_s24  ;;  %1058 = vrot.lane.b32.xlu0 %v659_v35, %s6106_s27  ;;  %v6436_v44 = vmul.f32 0.17677669, %v566_v38 }
 0x16a   : > { %v568_v39 = vpop.f32.mrf.mxu0  ;;  %v661_v40 = vpop.f32.mrf.mxu1 }
 0x16b   : > { %v662_v41 = vadd.f32 %v661_v40, %v575_v31  ;;  %v569_v45 = vadd.f32 %v568_v39, %v476_v32 }
 0x16c   : > { %v5349_v42 = vpop.f32.mrf.mxu0  ;;  %v5369_v43 = vpop.f32.mrf.mxu1 }
 0x16d   : > { %1070 = vrot.lane.b32.xlu0 %v659_v35, %s6107_s15  ;;  %1066 = vrot.lane.b32.xlu1 %v662_v41, %s6105_s24  ;;  %v6443_v46 = vmul.f32 0.17677669, %v569_v45 }
 0x171   : > { %1072 = vrot.lane.b32.xlu1 %v662_v41, %s6107_s15  ;;  %762 = vrot.lane.b32.xlu0 %v6436_v44, %s6106_s27 }
 0x175   : > { %1060 = vrot.lane.b32.xlu0 %v662_v41, %s6106_s27  ;;  %764 = vrot.lane.b32.xlu1 %v6443_v46, %s6106_s27 }
 0x179   : > { %768 = vrot.lane.b32.xlu0 %v6436_v44, %s6105_s24  ;;  %770 = vrot.lane.b32.xlu1 %v6443_v46, %s6105_s24 }
 0x17d   : > { %774 = vrot.lane.b32.xlu0 %v6436_v44, %s6107_s15  ;;  %776 = vrot.lane.b32.xlu1 %v6443_v46, %s6107_s15 }
 0x1db   : > { %v1065_v52 = vpop.permute.xlu1 %1064  ;;  %v1059_v53 = vpop.permute.xlu0 %1058 }
 0x1dc   : > { %v1076_v56 = vcombine.low %v659_v35, %v1065_v52  ;;  %v1077_v57 = vcombine.high %v659_v35, %v1065_v52 }
 0x1de   : > { %v1084_v63 = vrot.slane %v1076_v56, %v6457_v55  ;;  %v1091_v1 = vrot.slane %v1077_v57, %v6457_v55 }
 0x1df   : > { %v1071_v58 = vpop.permute.xlu0 %1070  ;;  %v1067_v59 = vpop.permute.xlu1 %1066 }
 0x1e0   : > { %v1092_v60 = vcombine.low %v1059_v53, %v1071_v58  ;;  %v1093_v61 = vcombine.high %v1059_v53, %v1071_v58  ;;  %v1144_v14 = vcombine.low %v662_v41, %v1067_v59  ;;  %v1145_v15 = vcombine.high %v662_v41, %v1067_v59 }
 0x1e2   : > { %v1100_v2 = vrot.slane %v1092_v60, %v6457_v55  ;;  %v1107_v3 = vrot.slane %v1093_v61, %v6457_v55  ;;  %v1152_v24 = vrot.slane %v1144_v14, %v6457_v55  ;;  %v1159_v26 = vrot.slane %v1145_v15, %v6457_v55 }
 0x1e3   : > { %v1073_v4 = vpop.permute.xlu1 %1072  ;;  %v763_v5 = vpop.permute.xlu0 %762 }
 0x1e4   : > { %v1108_v6 = vcombine.low %v1084_v63, %v1100_v2  ;;  %v1109_v7 = vcombine.high %v1084_v63, %v1100_v2  ;;  %v1124_v8 = vcombine.low %v1091_v1, %v1107_v3  ;;  %v1125_v9 = vcombine.high %v1091_v1, %v1107_v3 }
 0x1e6   : > { %v1116_v10 = vrot.slane %v1108_v6, %v6460_v62  ;;  %v1123_v11 = vrot.slane %v1109_v7, %v6460_v62  ;;  %v1132_v12 = vrot.slane %v1124_v8, %v6460_v62  ;;  %v1139_v13 = vrot.slane %v1125_v9, %v6460_v62 }
 0x1e7   : > { %v1061_v16 = vpop.permute.xlu0 %1060  ;;  %v765_v17 = vpop.permute.xlu1 %764 }
 0x1e8   : > { %v1160_v18 = vcombine.low %v1061_v16, %v1073_v4  ;;  %v1161_v19 = vcombine.high %v1061_v16, %v1073_v4  ;;  %v1212_v20 = vcombine.low %v1116_v10, %v1123_v11  ;;  %v5087_v21 = vcombine.high %v1116_v10, %v1123_v11 }
 0x1e9   : > { %v1228_v22 = vcombine.low %v1132_v12, %v1139_v13  ;;  %v5088_v23 = vcombine.high %v1132_v12, %v1139_v13 }
 0x1ea   : > { %v1168_v31 = vrot.slane %v1160_v18, %v6457_v55  ;;  %v1175_v32 = vrot.slane %v1161_v19, %v6457_v55  ;;  %v6479_v43 = vrot.slane %v1212_v20, %v6457_v55  ;;  %v6482_v45 = vrot.slane %v5087_v21, %v6457_v55 }
 0x1eb   : > { %v769_v33 = vpop.permute.xlu0 %768  ;;  %v771_v34 = vpop.permute.xlu1 %770  ;;  %v6485_v47 = vrot.slane %v1228_v22, %v6457_v55  ;;  %v6488_v48 = vrot.slane %v5088_v23, %v6457_v55 }
 0x1ec   : > { %v780_v35 = vcombine.low %v6436_v44, %v769_v33  ;;  %v781_v36 = vcombine.high %v6436_v44, %v769_v33  ;;  %v848_v37 = vcombine.low %v6443_v46, %v771_v34  ;;  %v849_v38 = vcombine.high %v6443_v46, %v771_v34 }
 0x1ed   : > { %v1176_v39 = vcombine.low %v1152_v24, %v1168_v31  ;;  %v1177_v40 = vcombine.high %v1152_v24, %v1168_v31  ;;  %v1192_v41 = vcombine.low %v1159_v26, %v1175_v32  ;;  %v1193_v42 = vcombine.high %v1159_v26, %v1175_v32 }
 0x1ee   : > { %v788_v58 = vrot.slane %v780_v35, %v6457_v55  ;;  %v795_v59 = vrot.slane %v781_v36, %v6457_v55  ;;  %v856_v60 = vrot.slane %v848_v37, %v6457_v55  ;;  %v863_v61 = vrot.slane %v849_v38, %v6457_v55 }
 0x1ef   : > { %v1184_v44 = vrot.slane %v1176_v39, %v6460_v62  ;;  %v1191_v46 = vrot.slane %v1177_v40, %v6460_v62  ;;  %v1200_v49 = vrot.slane %v1192_v41, %v6460_v62  ;;  %v1207_v50 = vrot.slane %v1193_v42, %v6460_v62  ;;  %v775_v51 = vpop.permute.xlu0 %774  ;;  %v777_v52 = vpop.permute.xlu1 %776 }
 0x1f0   : > { %v796_v53 = vcombine.low %v763_v5, %v775_v51  ;;  %v797_v54 = vcombine.high %v763_v5, %v775_v51  ;;  %v864_v56 = vcombine.low %v765_v17, %v777_v52  ;;  %v865_v57 = vcombine.high %v765_v17, %v777_v52 }
 0x1f1   : > { %v1280_v4 = vcombine.low %v1184_v44, %v1191_v46  ;;  %v5089_v5 = vcombine.high %v1184_v44, %v1191_v46  ;;  %v1296_v6 = vcombine.low %v1200_v49, %v1207_v50  ;;  %v5090_v7 = vcombine.high %v1200_v49, %v1207_v50 }
 0x1f2   : > { %v804_v63 = vrot.slane %v796_v53, %v6457_v55  ;;  %v811_v1 = vrot.slane %v797_v54, %v6457_v55  ;;  %v872_v2 = vrot.slane %v864_v56, %v6457_v55  ;;  %v879_v3 = vrot.slane %v865_v57, %v6457_v55 }
 0x1f3   : > { %v1287_v49 = vrot.slane %v1280_v4, %v6457_v55  ;;  %v1295_v50 = vrot.slane %v5089_v5, %v6457_v55  ;;  %v1303_v51 = vrot.slane %v1296_v6, %v6457_v55  ;;  %v1311_v52 = vrot.slane %v5090_v7, %v6457_v55 }
 0x1f4   : > { %v812_v8 = vcombine.low %v788_v58, %v804_v63  ;;  %v813_v9 = vcombine.high %v788_v58, %v804_v63  ;;  %v828_v10 = vcombine.low %v795_v59, %v811_v1  ;;  %v829_v11 = vcombine.high %v795_v59, %v811_v1 }
 0x1f5   : > { %v880_v12 = vcombine.low %v856_v60, %v872_v2  ;;  %v881_v13 = vcombine.high %v856_v60, %v872_v2  ;;  %v896_v14 = vcombine.low %v863_v61, %v879_v3  ;;  %v897_v15 = vcombine.high %v863_v61, %v879_v3 }
 0x1f6   : > { %v820_v16 = vrot.slane %v812_v8, %v6460_v62  ;;  %v827_v17 = vrot.slane %v813_v9, %v6460_v62  ;;  %v836_v18 = vrot.slane %v828_v10, %v6460_v62  ;;  %v843_v19 = vrot.slane %v829_v11, %v6460_v62 }
 0x1f7   : > { %v888_v20 = vrot.slane %v880_v12, %v6460_v62  ;;  %v895_v21 = vrot.slane %v881_v13, %v6460_v62  ;;  %v904_v22 = vrot.slane %v896_v14, %v6460_v62  ;;  %v911_v23 = vrot.slane %v897_v15, %v6460_v62 }
 0x1f8   : > { %v916_v24 = vcombine.low %v820_v16, %v827_v17  ;;  %v5083_v26 = vcombine.high %v820_v16, %v827_v17  ;;  %v932_v31 = vcombine.low %v836_v18, %v843_v19  ;;  %v5084_v32 = vcombine.high %v836_v18, %v843_v19 }
 0x1f9   : > { %v984_v33 = vcombine.low %v888_v20, %v895_v21  ;;  %v5085_v34 = vcombine.high %v888_v20, %v895_v21  ;;  %v1000_v35 = vcombine.low %v904_v22, %v911_v23  ;;  %v5086_v36 = vcombine.high %v904_v22, %v911_v23 }
 0x1fa   : > { %v6511_v37 = vrot.slane %v916_v24, %v6457_v55  ;;  %v6514_v38 = vrot.slane %v5083_v26, %v6457_v55  ;;  %v6517_v39 = vrot.slane %v932_v31, %v6457_v55  ;;  %v947_v40 = vrot.slane %v5084_v32, %v6457_v55 }
 0x1fb   : > { %v991_v41 = vrot.slane %v984_v33, %v6457_v55  ;;  %v999_v42 = vrot.slane %v5085_v34, %v6457_v55  ;;  %v1007_v44 = vrot.slane %v1000_v35, %v6457_v55  ;;  %v1015_v46 = vrot.slane %v5086_v36, %v6457_v55 }
 0x1fc   : > { %v948_v53 = vcombine.low %v6511_v37, %v6514_v38  ;;  %v964_v54 = vcombine.low %v6517_v39, %v947_v40  ;;  %v1244_v58 = vcombine.low %v6479_v43, %v6482_v45  ;;  %v1260_v59 = vcombine.low %v6485_v47, %v6488_v48 }
 0x1fd   : > { %v1016_v56 = vcombine.low %v991_v41, %v999_v42  ;;  %v1032_v57 = vcombine.low %v1007_v44, %v1015_v46  ;;  %v1312_v60 = vcombine.low %v1287_v49, %v1295_v50  ;;  %v1328_v61 = vcombine.low %v1303_v51, %v1311_v52 }
 0x1fe   : > { %v1252_v63 = vrot.slane %v1244_v58, %v6460_v62  ;;  %v1268_v1 = vrot.slane %v1260_v59, %v6460_v62  ;;  %v956_v4 = vrot.slane %v948_v53, %v6460_v62  ;;  %v972_v5 = vrot.slane %v964_v54, %v6460_v62 }
 0x1ff   : > { %v1320_v2 = vrot.slane %v1312_v60, %v6460_v62  ;;  %v1336_v3 = vrot.slane %v1328_v61, %v6460_v62  ;;  %v1024_v6 = vrot.slane %v1016_v56, %v6460_v62  ;;  %v1040_v7 = vrot.slane %v1032_v57, %v6460_v62  ;;  %v751_v56 = vpop.f32.mrf.mxu0 }
 0x200   : > { %v1276_v8 = vcombine.low %v1252_v63, %v1268_v1  ;;  %v980_v11 = vcombine.low %v956_v4, %v972_v5  ;;  %v1313_v15 = vcombine.high %v1287_v49, %v1295_v50  ;;  %v1329_v16 = vcombine.high %v1303_v51, %v1311_v52 }
 0x201   : > { %v1344_v9 = vcombine.low %v1320_v2, %v1336_v3  ;;  %v1048_v12 = vcombine.low %v1024_v6, %v1040_v7  ;;  %v1345_v14 = vcombine.high %v1320_v2, %v1336_v3  ;;  %v1277_v17 = vcombine.high %v1252_v63, %v1268_v1  ;;  %v5388_v59 = vpop.f32.mrf.mxu0 }
 0x202   : > { %v1245_v18 = vcombine.high %v6479_v43, %v6482_v45  ;;  %v1261_v19 = vcombine.high %v6485_v47, %v6488_v48  ;;  %v1327_v22 = vrot.slane %v1313_v15, %v6460_v62  ;;  %v1343_v23 = vrot.slane %v1329_v16, %v6460_v62 }
 0x203   : > { %v1348_v10 = vpack.c.bf16 %v1344_v9, %v1276_v8  ;;  %v1052_v20 = vpack.c.bf16 %v1048_v12, %v980_v11  ;;  %v1349_v21 = vpack.c.bf16 %v1345_v14, %v1277_v17  ;;  %v949_v43 = vcombine.high %v6511_v37, %v6514_v38 }
 0x204   : > { %v1259_v24 = vrot.slane %v1245_v18, %v6460_v62  ;;  %v1275_v26 = vrot.slane %v1261_v19, %v6460_v62  ;;  %v1346_v32 = vcombine.low %v1327_v22, %v1343_v23  ;;  %v965_v45 = vcombine.high %v6517_v39, %v947_v40 }
 0x205   : > { %v1653_v13 = vsel %vm1648_vm1, %v1348_v10, 0  ;;  %v1700_v31 = vsel %vm1648_vm1, %v1349_v21, 0  ;;  %v1017_v47 = vcombine.high %v991_v41, %v999_v42  ;;  %v1033_v48 = vcombine.high %v1007_v44, %v1015_v46 }
 0x206   : > { %5391 = vmatpush3.bf16.xpose.msra.mxu1 %v1653_v13  ;;  %v981_v33 = vcombine.high %v956_v4, %v972_v5  ;;  %v1049_v34 = vcombine.high %v1024_v6, %v1040_v7  ;;  %v1278_v35 = vcombine.low %v1259_v24, %v1275_v26  ;;  %v963_v49 = vrot.slane %v949_v43, %v6460_v62 }
 0x207   : > { %5396 = vmatprep.subr.bf16.mxu1 %v6103_v0  ;;  %v979_v50 = vrot.slane %v965_v45, %v6460_v62  ;;  %v1031_v37 = vrot.slane %v1017_v47, %v6460_v62  ;;  %v1047_v38 = vrot.slane %v1033_v48, %v6460_v62  ;;  %v1347_v41 = vcombine.high %v1327_v22, %v1343_v23 }
 0x208   : > { %v1350_v36 = vpack.c.bf16 %v1346_v32, %v1278_v35  ;;  %v1053_v39 = vpack.c.bf16 %v1049_v34, %v981_v33  ;;  %v667_v42 = vsub.s32 2, %v6416_v27  ;;  %v1279_v51 = vcombine.high %v1259_v24, %v1275_v26 }
 0x209   : > { %v982_v44 = vcombine.low %v963_v49, %v979_v50  ;;  %v1050_v46 = vcombine.low %v1031_v37, %v1047_v38  ;;  %v983_v60 = vcombine.high %v963_v49, %v979_v50  ;;  %v1051_v61 = vcombine.high %v1031_v37, %v1047_v38 }
 0x20a   : > { %v1747_v40 = vsel %vm1648_vm1, %v1350_v36, 0  ;;  %v1351_v52 = vpack.c.bf16 %v1347_v41, %v1279_v51  ;;  %v668_v53 = vrot.slane %v6423_v29, %v667_v42  ;;  %v754_v29 = vpop.f32.mrf.mxu0  ;;  %v400_v3 = vand.u32 127, %v396_v25 }
 0x20b   : > { %v1054_v54 = vpack.c.bf16 %v1050_v46, %v982_v44  ;;  %v1055_v2 = vpack.c.bf16 %v1051_v61, %v983_v60  ;;  %v398_v4 = vadd.s32 8, %v6416_v27 }
 0x20c   : > { %v1794_v57 = vsel %vm1648_vm1, %v1351_v52, 0  ;;  %v6576_v58 = vadd.f32 %v751_v56, %v668_v53  ;;  %v6583_v63 = vadd.f32 %v754_v29, %v668_v53  ;;  %v5389_v1 = vpop.f32.mrf.mxu0  ;;  %vm401_vm2 = vcmp.gt.s32.totalorder %v400_v3, %v6416_v27 }
 0x20d   : > { %5393 = vmatmul.mubr.msk.bf16.vlgmr.msra.gmra.mxu1 %vm1648_vm1, %v1052_v20  ;;  %v6592_v5 = vsel %vm401_vm2, -inf, %v6103_v0  ;;  %vm402_vm3 = vcmp.gt.s32.totalorder %v400_v3, %v398_v4 }
 0x20e   : > { %5397 = vmatpush3.bf16.xpose.msra.mxu1 %v1700_v31  ;;  %5398 = vmatprep.mubr.msk.bf16.mxu1 %vm6104_vm0, %v6103_v0  ;;  %v6596_v9 = vsel %vm402_vm3, -inf, %v6103_v0 }
 0x20f   : > { %5402 = vmatprep.subr.bf16.mxu1 %v6103_v0  ;;  %1354 = vrot.lane.b32.xlu1 %v6576_v58, %s6106_s27 }
 0x215   : > { %5399 = vmatmul.mubr.msk.bf16.vlgmr.msra.gmra.mxu1 %vm1648_vm1, %v1053_v39 }
 0x216   : > { %5403 = vmatpush3.bf16.xpose.msra.mxu1 %v1747_v40  ;;  %5404 = vmatprep.mubr.msk.bf16.mxu1 %vm6104_vm0, %v6103_v0 }
 0x217   : > { %5408 = vmatprep.subr.bf16.mxu1 %v6103_v0 }
 0x21d   : > { %5405 = vmatmul.mubr.msk.bf16.vlgmr.msra.gmra.mxu1 %vm1648_vm1, %v1054_v54 }
 0x21e   : > { %5409 = vmatpush3.bf16.xpose.msra.mxu1 %v1794_v57  ;;  %5410 = vmatprep.mubr.msk.bf16.mxu1 %vm6104_vm0, %v6103_v0 }
 0x21f   : > { %5414 = vmatprep.subr.bf16.mxu1 %v6103_v0 }
 0x225   : > { %5411 = vmatmul.mubr.msk.bf16.vlgmr.msra.gmra.mxu1 %vm1648_vm1, %v1055_v2 }
 0x226   : > { %5416 = vmatprep.mubr.msk.bf16.mxu1 %vm6104_vm0, %v6103_v0 }
 0x281   : > { %v6619_v37 = vpop.permute.xlu1 %1354 }
 0x2cd   : > { %v1689_v6 = vpop.f32.mrf.mxu1 }
 0x2ce   : > { %v1690_v7 = vadd.f32 %v1689_v6, %v6592_v5 }
 0x2cf   : > { %v5394_v8 = vpop.f32.mrf.mxu1 }
 0x2d0   : > { %v1838_v10 = vsel %vm1837_vm4, %v1690_v7, -inf }
 0x2d1   : > { %1839 = vmax.xlane.f32.xlu0 %v1838_v10  ;;  %v1692_v25 = vpop.f32.mrf.mxu1 }
 0x2d2   : > { %v1693_v11 = vadd.f32 %v1692_v25, %v6596_v9 }
 0x2d3   : > { %v5395_v12 = vpop.f32.mrf.mxu1 }
 0x2d4   : > { %v1841_v13 = vsel %vm1837_vm4, %v1693_v11, -inf }
 0x2d5   : > { %v1736_v14 = vpop.f32.mrf.mxu1  ;;  %1842 = vmax.xlane.f32.xlu1 %v1841_v13 }
 0x2d6   : > { %v1737_v15 = vadd.f32 %v1736_v14, %v6592_v5 }
 0x2d7   : > { %v5400_v16 = vpop.f32.mrf.mxu1 }
 0x2d8   : > { %v1844_v17 = vsel %vm1837_vm4, %v1737_v15, -inf }
 0x2d9   : > { %1845 = vmax.xlane.f32.xlu0 %v1844_v17  ;;  %v1739_v18 = vpop.f32.mrf.mxu1 }
 0x2da   : > { %v1740_v19 = vadd.f32 %v1739_v18, %v6596_v9 }
 0x2db   : > { %v5401_v20 = vpop.f32.mrf.mxu1 }
 0x2dc   : > { %v1847_v21 = vsel %vm1837_vm4, %v1740_v19, -inf }
 0x2dd   : > { %1848 = vmax.xlane.f32.xlu0 %v1847_v21  ;;  %v1783_v22 = vpop.f32.mrf.mxu1 }
 0x2de   : > { %v1784_v23 = vadd.f32 %v1783_v22, %v6592_v5 }
 0x2df   : > { %v5406_v24 = vpop.f32.mrf.mxu1 }
 0x2e0   : > { %v1850_v26 = vsel %vm1837_vm4, %v1784_v23, -inf }
 0x2e1   : > { %v1786_v31 = vpop.f32.mrf.mxu1  ;;  %1851 = vmax.xlane.f32.xlu1 %v1850_v26 }
 0x2e2   : > { %v1787_v32 = vadd.f32 %v1786_v31, %v6596_v9 }
 0x2e3   : > { %v5407_v43 = vpop.f32.mrf.mxu1 }
 0x2e4   : > { %v1853_v45 = vsel %vm1837_vm4, %v1787_v32, -inf }
 0x2e5   : > { %1854 = vmax.xlane.f32.xlu0 %v1853_v45  ;;  %v1830_v47 = vpop.f32.mrf.mxu1 }
 0x2e6   : > { %v1831_v48 = vadd.f32 %v1830_v47, %v6592_v5 }
 0x2e7   : > { %v5412_v33 = vpop.f32.mrf.mxu1 }
 0x2e8   : > { %v1856_v34 = vsel %vm1837_vm4, %v1831_v48, -inf }
 0x2e9   : > { %v1833_v35 = vpop.f32.mrf.mxu1  ;;  %1857 = vmax.xlane.f32.xlu1 %v1856_v34 }
 0x2ea   : > { %v1834_v36 = vadd.f32 %v1833_v35, %v6596_v9 }
 0x2eb   : > { %v5413_v49 = vpop.f32.mrf.mxu1 }
 0x2ec   : > { %v1859_v50 = vsel %vm1837_vm4, %v1834_v36, -inf }
 0x2ed   : > { %1860 = vmax.xlane.f32.xlu0 %v1859_v50 }
 0x2fa   : > { %1360 = vrot.lane.b32.xlu1 %v6576_v58, %s6105_s24 }
 0x2fe   : > { %1362 = vrot.lane.b32.xlu1 %v6583_v63, %s6105_s24 }
 0x303   : > { %1356 = vrot.lane.b32.xlu0 %v6583_v63, %s6106_s27 }
 0x35a   : > { %v1840_v38 = vpop.xlane.xlu0 %1839 }
 0x35b   : > { %v1862_v39 = vsub.f32 %v1690_v7, %v1840_v38 }
 0x35d   : > { %v1870_v40 = vmul.f32 1.442695, %v1862_v39 }
 0x35e   : > { %v1843_v41 = vpop.xlane.xlu1 %1842 }
 0x35f   : > { %5811 = vpow2.f32 %v1870_v40  ;;  %v1863_v44 = vsub.f32 %v1693_v11, %v1843_v41 }
 0x361   : > { %v1872_v46 = vmul.f32 1.442695, %v1863_v44 }
 0x362   : > { %v1846_v56 = vpop.xlane.xlu0 %1845 }
 0x363   : > { %5813 = vpow2.f32 %v1872_v46  ;;  %v1864_v29 = vsub.f32 %v1737_v15, %v1846_v56 }
 0x365   : > { %v1874_v3 = vmul.f32 1.442695, %v1864_v29 }
 0x366   : > { %v1849_v57 = vpop.xlane.xlu0 %1848 }
 0x367   : > { %v1865_v60 = vsub.f32 %v1740_v19, %v1849_v57 }
 0x369   : > { %v1876_v1 = vmul.f32 1.442695, %v1865_v60 }
 0x36a   : > { %v1852_v59 = vpop.xlane.xlu1 %1851 }
 0x36b   : > { %5815 = vpow2.f32 %v1876_v1  ;;  %v1866_v4 = vsub.f32 %v1784_v23, %v1852_v59 }
 0x36c   : > { %v6621_v51 = vpop.eup %5811  ;;  %5817 = vpow2.f32 %v1874_v3 }
 0x36d   : > { %v1886_v52 = vsel %vm1837_vm4, %v6621_v51, 0.0  ;;  %v1878_v8 = vmul.f32 1.442695, %v1866_v4 }
 0x36e   : > { %1887 = vadd.xlane.f32.xlu1 %v1886_v52  ;;  %v1855_v7 = vpop.xlane.xlu0 %1854 }
 0x36f   : > { %v1867_v10 = vsub.f32 %v1787_v32, %v1855_v7 }
 0x370   : > { %v6625_v53 = vpop.eup %5813 }
 0x371   : > { %v1889_v54 = vsel %vm1837_vm4, %v6625_v53, 0.0  ;;  %v1880_v11 = vmul.f32 1.442695, %v1867_v10 }
 0x372   : > { %1890 = vadd.xlane.f32.xlu0 %v1889_v54  ;;  %v1858_v61 = vpop.xlane.xlu1 %1857 }
 0x373   : > { %v1868_v2 = vsub.f32 %v1831_v48, %v1858_v61 }
 0x375   : > { %v1882_v6 = vmul.f32 1.442695, %v1868_v2 }
 0x376   : > { %v1861_v25 = vpop.xlane.xlu0 %1860  ;;  %v1361_v31 = vpop.permute.xlu1 %1360 }
 0x377   : > { %5819 = vpow2.f32 %v1882_v6  ;;  %v1869_v12 = vsub.f32 %v1834_v36, %v1861_v25  ;;  %v1372_v49 = vcombine.low %v6576_v58, %v1361_v31  ;;  %v1373_v41 = vcombine.high %v6576_v58, %v1361_v31 }
 0x378   : > { %5821 = vpow2.f32 %v1878_v8  ;;  %v6633_v14 = vpop.eup %5815 }
 0x379   : > { %5823 = vpow2.f32 %v1880_v11  ;;  %v1884_v13 = vmul.f32 1.442695, %v1869_v12  ;;  %v6635_v15 = vpop.eup %5817  ;;  %v1895_v16 = vsel %vm1837_vm4, %v6633_v14, 0.0  ;;  %v1380_v56 = vrot.slane %v1372_v49, %v6457_v55 }
 0x37a   : > { %v1892_v19 = vsel %vm1837_vm4, %v6635_v15, 0.0  ;;  %v1363_v32 = vpop.permute.xlu1 %1362  ;;  %v1357_v43 = vpop.permute.xlu0 %1356  ;;  %v1387_v1 = vrot.slane %v1373_v41, %v6457_v55 }
 0x37b   : > { %5825 = vpow2.f32 %v1884_v13  ;;  %v1440_v47 = vcombine.low %v6583_v63, %v1363_v32  ;;  %v1441_v48 = vcombine.high %v6583_v63, %v1363_v32 }
 0x37d   : > { %v1448_v50 = vrot.slane %v1440_v47, %v6457_v55  ;;  %v1455_v38 = vrot.slane %v1441_v48, %v6457_v55 }
 0x37f   : > { %1368 = vrot.lane.b32.xlu1 %v6583_v63, %s6107_s15 }
 0x384   : > { %v6639_v17 = vpop.eup %5819 }
 0x385   : > { %v1904_v18 = vsel %vm1837_vm4, %v6639_v17, 0.0  ;;  %v6645_v20 = vpop.eup %5821 }
 0x386   : > { %v1898_v21 = vsel %vm1837_vm4, %v6645_v20, 0.0  ;;  %v6649_v22 = vpop.eup %5823 }
 0x387   : > { %v1901_v23 = vsel %vm1837_vm4, %v6649_v22, 0.0 }
 0x388   : > { %1366 = vrot.lane.b32.xlu0 %v6576_v58, %s6107_s15  ;;  %v6653_v24 = vpop.eup %5825 }
 0x389   : > { %v1907_v26 = vsel %vm1837_vm4, %v6653_v24, 0.0 }
 0x3a3   : > { %1896 = vadd.xlane.f32.xlu1 %v1895_v16 }
 0x3a7   : > { %1905 = vadd.xlane.f32.xlu1 %v1904_v18  ;;  %1893 = vadd.xlane.f32.xlu0 %v1892_v19 }
 0x3ab   : > { %1899 = vadd.xlane.f32.xlu0 %v1898_v21 }
 0x3af   : > { %1902 = vadd.xlane.f32.xlu0 %v1901_v23 }
 0x3b3   : > { %1908 = vadd.xlane.f32.xlu0 %v1907_v26 }
 0x3f7   : > { %v1888_v45 = vpop.xlane.xlu1 %1887 }
 0x3fb   : > { %v1369_v33 = vpop.permute.xlu1 %1368  ;;  %v1891_v34 = vpop.xlane.xlu0 %1890 }
 0x3fc   : > { %v1456_v35 = vcombine.low %v1357_v43, %v1369_v33  ;;  %v1457_v36 = vcombine.high %v1357_v43, %v1369_v33  ;;  %5827 = vrcp.f32 %v1891_v34 }
 0x3fd   : > { %5829 = vrcp.f32 %v1888_v45 }
 0x3fe   : > { %v1464_v39 = vrot.slane %v1456_v35, %v6457_v55  ;;  %v1471_v40 = vrot.slane %v1457_v36, %v6457_v55 }
 0x3ff   : > { %v1367_v44 = vpop.permute.xlu0 %1366 }
 0x400   : > { %v1472_v46 = vcombine.low %v1448_v50, %v1464_v39  ;;  %v1473_v52 = vcombine.high %v1448_v50, %v1464_v39  ;;  %v1488_v63 = vcombine.low %v1455_v38, %v1471_v40  ;;  %v1489_v54 = vcombine.high %v1455_v38, %v1471_v40 }
 0x401   : > { %v1388_v57 = vcombine.low %v6619_v37, %v1367_v44  ;;  %v1389_v59 = vcombine.high %v6619_v37, %v1367_v44 }
 0x402   : > { %v1480_v60 = vrot.slane %v1472_v46, %v6460_v62  ;;  %v1487_v61 = vrot.slane %v1473_v52, %v6460_v62  ;;  %v1496_v29 = vrot.slane %v1488_v63, %v6460_v62  ;;  %v1503_v58 = vrot.slane %v1489_v54, %v6460_v62 }
 0x403   : > { %v1396_v2 = vrot.slane %v1388_v57, %v6457_v55  ;;  %v1403_v3 = vrot.slane %v1389_v59, %v6457_v55 }
 0x404   : > { %v1576_v4 = vcombine.low %v1480_v60, %v1487_v61  ;;  %v5093_v6 = vcombine.high %v1480_v60, %v1487_v61  ;;  %v1592_v7 = vcombine.low %v1496_v29, %v1503_v58  ;;  %v5094_v8 = vcombine.high %v1496_v29, %v1503_v58 }
 0x405   : > { %v1404_v37 = vcombine.low %v1380_v56, %v1396_v2  ;;  %v1405_v10 = vcombine.high %v1380_v56, %v1396_v2  ;;  %v1420_v25 = vcombine.low %v1387_v1, %v1403_v3  ;;  %v1421_v11 = vcombine.high %v1387_v1, %v1403_v3 }
 0x406   : > { %v1583_v12 = vrot.slane %v1576_v4, %v6457_v55  ;;  %v1591_v13 = vrot.slane %v5093_v6, %v6457_v55  ;;  %v1599_v16 = vrot.slane %v1592_v7, %v6457_v55  ;;  %v1607_v18 = vrot.slane %v5094_v8, %v6457_v55 }
 0x407   : > { %v1412_v19 = vrot.slane %v1404_v37, %v6460_v62  ;;  %v1419_v21 = vrot.slane %v1405_v10, %v6460_v62  ;;  %v1428_v23 = vrot.slane %v1420_v25, %v6460_v62  ;;  %v1435_v26 = vrot.slane %v1421_v11, %v6460_v62 }
 0x408   : > { %v1608_v31 = vcombine.low %v1583_v12, %v1591_v13  ;;  %v1624_v32 = vcombine.low %v1599_v16, %v1607_v18  ;;  %v1609_v4 = vcombine.high %v1583_v12, %v1591_v13  ;;  %v1625_v6 = vcombine.high %v1599_v16, %v1607_v18 }
 0x409   : > { %v1508_v43 = vcombine.low %v1412_v19, %v1419_v21  ;;  %v5091_v45 = vcombine.high %v1412_v19, %v1419_v21  ;;  %v1524_v47 = vcombine.low %v1428_v23, %v1435_v26  ;;  %v5092_v48 = vcombine.high %v1428_v23, %v1435_v26  ;;  %v5828_v40 = vpop.eup %5827 }
 0x40a   : > { %v1616_v38 = vrot.slane %v1608_v31, %v6460_v62  ;;  %v1632_v39 = vrot.slane %v1624_v32, %v6460_v62  ;;  %v5830_v46 = vpop.eup %5829  ;;  %v1919_v54 = vmul.f32 %v5828_v40, %v6625_v53  ;;  %v1623_v11 = vrot.slane %v1609_v4, %v6460_v62 }
 0x40b   : > { %v1515_v33 = vrot.slane %v1508_v43, %v6457_v55  ;;  %v1523_v34 = vrot.slane %v5091_v45, %v6457_v55  ;;  %v1531_v35 = vrot.slane %v1524_v47, %v6457_v55  ;;  %v1539_v36 = vrot.slane %v5092_v48, %v6457_v55 }
 0x40c   : > { %v1640_v63 = vcombine.low %v1616_v38, %v1632_v39  ;;  %v1918_v59 = vmul.f32 %v5830_v46, %v6621_v51  ;;  %v1641_v60 = vcombine.high %v1616_v38, %v1632_v39  ;;  %v1639_v19 = vrot.slane %v1625_v6, %v6460_v62  ;;  %v5759_v38 = vld [vmem:[#allocation2 + $0xd0] sm:$0xff]  }
 0x40d   : > { %v1540_v49 = vcombine.low %v1515_v33, %v1523_v34  ;;  %v1556_v50 = vcombine.low %v1531_v35, %v1539_v36  ;;  %v1541_v51 = vcombine.high %v1515_v33, %v1523_v34  ;;  %v1557_v2 = vcombine.high %v1531_v35, %v1539_v36 }
 0x40e   : > { %v1926_v61 = vpack.c.bf16 %v1919_v54, %v1918_v59  ;;  %v1642_v13 = vcombine.low %v1623_v11, %v1639_v19 }
 0x40f   : > { %v1548_v41 = vrot.slane %v1540_v49, %v6460_v62  ;;  %v1564_v44 = vrot.slane %v1556_v50, %v6460_v62  ;;  %v1555_v7 = vrot.slane %v1541_v51, %v6460_v62  ;;  %v1571_v8 = vrot.slane %v1557_v2, %v6460_v62  ;;  %v5755_v49 = vld [vmem:[#allocation2 + $0xf0] sm:$0xff]   ;;  %v5756_v50 = vld [vmem:[#allocation2 + $0xe8] sm:$0xff]  }
 0x411   : > { %v1572_v52 = vcombine.low %v1548_v41, %v1564_v44  ;;  %v1573_v57 = vcombine.high %v1548_v41, %v1564_v44  ;;  %v1574_v23 = vcombine.low %v1555_v7, %v1571_v8 }
 0x413   : > { %v1644_v56 = vpack.c.bf16 %v1640_v63, %v1572_v52  ;;  %v1645_v29 = vpack.c.bf16 %v1641_v60, %v1573_v57  ;;  %v1646_v18 = vpack.c.bf16 %v1642_v13, %v1574_v23 }
 0x415   : > { %5415 = vmatpush3.bf16.msra.mxu1 %v1644_v56 }
 0x416   : > { %5420 = vmatprep.subr.bf16.mxu1 %v6103_v0 }
 0x418   : > { %5417 = vmatmul.mubr.msk.bf16.vlgmr.msra.gmra.mxu1 %vm1837_vm4, %v1926_v61 }
 0x419   : > { %5421 = vmatpush3.bf16.msra.mxu1 %v1645_v29  ;;  %5422 = vmatprep.mubr.msk.bf16.mxu1 %vm6104_vm0, %v6103_v0 }
 0x41a   : > { %5426 = vmatprep.subr.bf16.mxu1 %v6103_v0 }
 0x42c   : > { %v1897_v58 = vpop.xlane.xlu1 %1896 }
 0x42d   : > { %5831 = vrcp.f32 %v1897_v58 }
 0x430   : > { %v1894_v53 = vpop.xlane.xlu0 %1893  ;;  %v1906_v25 = vpop.xlane.xlu1 %1905 }
 0x431   : > { %5833 = vrcp.f32 %v1894_v53 }
 0x434   : > { %v1900_v1 = vpop.xlane.xlu0 %1899 }
 0x435   : > { %5835 = vrcp.f32 %v1900_v1 }
 0x438   : > { %v1903_v3 = vpop.xlane.xlu0 %1902 }
 0x439   : > { %5837 = vrcp.f32 %v1903_v3 }
 0x43a   : > { %v5832_v10 = vpop.eup %5831 }
 0x43b   : > { %v1921_v12 = vmul.f32 %v5832_v10, %v6633_v14  ;;  %v1643_v14 = vcombine.high %v1623_v11, %v1639_v19 }
 0x43c   : > { %v1909_v37 = vpop.xlane.xlu0 %1908 }
 0x43d   : > { %5839 = vrcp.f32 %v1909_v37 }
 0x43e   : > { %v5834_v21 = vpop.eup %5833  ;;  %5841 = vrcp.f32 %v1906_v25 }
 0x43f   : > { %v1920_v26 = vmul.f32 %v5834_v21, %v6635_v15  ;;  %v1575_v15 = vcombine.high %v1555_v7, %v1571_v8 }
 0x441   : > { %v1927_v16 = vpack.c.bf16 %v1921_v12, %v1920_v26  ;;  %v1647_v33 = vpack.c.bf16 %v1643_v14, %v1575_v15 }
 0x442   : > { %v5836_v31 = vpop.eup %5835 }
 0x443   : > { %5423 = vmatmul.mubr.msk.bf16.vlgmr.msra.gmra.mxu1 %vm1837_vm4, %v1927_v16  ;;  %v1922_v43 = vmul.f32 %v5836_v31, %v6645_v20 }
 0x444   : > { %5427 = vmatpush3.bf16.msra.mxu1 %v1646_v18  ;;  %5428 = vmatprep.mubr.msk.bf16.mxu1 %vm6104_vm0, %v6103_v0 }
 0x445   : > { %5432 = vmatprep.subr.bf16.mxu1 %v6103_v0 }
 0x446   : > { %v5838_v32 = vpop.eup %5837 }
 0x447   : > { %v1923_v45 = vmul.f32 %v5838_v32, %v6649_v22  ;;  %v5754_v22 = vld [vmem:[#allocation2 + $0xf8] sm:$0xff]  }
 0x448   : > { %5439 = vmatpush3.bf16.msra.mxu0 %v5754_v22 }
 0x449   : > { %v1928_v47 = vpack.c.bf16 %v1923_v45, %v1922_v43  ;;  %5440 = vmatprep.subr.bf16.mxu0 %v6103_v0 }
 0x44a   : > { %v5840_v48 = vpop.eup %5839 }
 0x44b   : > { %5429 = vmatmul.mubr.msk.bf16.vlgmr.msra.gmra.mxu1 %vm1837_vm4, %v1928_v47  ;;  %v5842_v34 = vpop.eup %5841  ;;  %v1925_v35 = vmul.f32 %v5840_v48, %v6653_v24  ;;  %v5757_v24 = vld [vmem:[#allocation2 + $0xe0] sm:$0xff]  }
 0x44c   : > { %5433 = vmatpush3.bf16.msra.mxu1 %v1647_v33  ;;  %5434 = vmatprep.mubr.msk.bf16.mxu1 %vm6104_vm0, %v6103_v0  ;;  %v1924_v20 = vmul.f32 %v5842_v34, %v6639_v17  ;;  %v5758_v17 = vld [vmem:[#allocation2 + $0xd8] sm:$0xff]  }
 0x44d   : > { %5458 = vmatprep.subr.bf16.mxu1 %v6103_v0  ;;  %5441 = vmatpush3.bf16.msra.mxu0 %v5755_v49 }
 0x44e   : > { %v1929_v36 = vpack.c.bf16 %v1925_v35, %v1924_v20  ;;  %5442 = vmatprep.subr.bf16.mxu0 %v6103_v0 }
 0x451   : > { %5443 = vmatpush3.bf16.msra.mxu0 %v5756_v50 }
 0x452   : > { %5444 = vmatprep.subr.bf16.mxu0 %v6103_v0 }
 0x453   : > { %5435 = vmatmul.mubr.msk.bf16.vlgmr.msra.gmra.mxu1 %vm1837_vm4, %v1929_v36 }
 0x454   : > { %5474 = vmatprep.mubr.msk.bf16.mxu1 %vm6104_vm0, %v6103_v0 }
 0x455   : > { %5445 = vmatpush3.bf16.msra.mxu0 %v5757_v24 }
 0x456   : > { %5446 = vmatprep.subr.bf16.mxu0 %v6103_v0 }
 0x459   : > { %5447 = vmatpush3.bf16.msra.mxu0 %v5758_v17 }
 0x45a   : > { %5448 = vmatprep.subr.bf16.mxu0 %v6103_v0 }
 0x45d   : > { %5449 = vmatpush3.bf16.msra.mxu0 %v5759_v38 }
 0x45e   : > { %5450 = vmatprep.subr.bf16.mxu0 %v6103_v0 }
 0x4d8   : > { %v1967_v39 = vpop.f32.mrf.mxu1 }
 0x4da   : > { %v5418_v40 = vpop.f32.mrf.mxu1 }
 0x4dc   : > { %v1970_v41 = vpop.f32.mrf.mxu1 }
 0x4de   : > { %v5419_v44 = vpop.f32.mrf.mxu1 }
 0x503   : > { %v2011_v46 = vpop.f32.mrf.mxu1 }
 0x505   : > { %v5424_v52 = vpop.f32.mrf.mxu1 }
 0x507   : > { %v2014_v63 = vpop.f32.mrf.mxu1 }
 0x509   : > { %v5425_v54 = vpop.f32.mrf.mxu1 }
 0x50b   : > { %v2055_v56 = vpop.f32.mrf.mxu1 }
 0x50c   : > { %v2106_v61 = vcombine.low %v1967_v39, %v2055_v56  ;;  %v2107_v29 = vcombine.high %v1967_v39, %v2055_v56 }
 0x50d   : > { %v5430_v57 = vpop.f32.mrf.mxu1 }
 0x50e   : > { %v2114_v2 = vrot.slane %v2106_v61, %v6457_v55  ;;  %v2121_v3 = vrot.slane %v2107_v29, %v6457_v55 }
 0x50f   : > { %v2058_v59 = vpop.f32.mrf.mxu1 }
 0x510   : > { %v2174_v7 = vcombine.low %v1970_v41, %v2058_v59  ;;  %v2175_v8 = vcombine.high %v1970_v41, %v2058_v59 }
 0x511   : > { %v5431_v60 = vpop.f32.mrf.mxu1 }
 0x512   : > { %v2182_v31 = vrot.slane %v2174_v7, %v6457_v55  ;;  %v2189_v32 = vrot.slane %v2175_v8, %v6457_v55  ;;  %v5760_v60 = vld [vmem:[#allocation2 + $0xc8] sm:$0xff]  }
 0x513   : > { %v2099_v58 = vpop.f32.mrf.mxu1  ;;  %5451 = vmatpush3.bf16.msra.mxu0 %v5760_v60  ;;  %v5774_v60 = vld [vmem:[#allocation3 + $0x8] sm:$0xff]  }
 0x514   : > { %v2122_v53 = vcombine.low %v2011_v46, %v2099_v58  ;;  %v2123_v1 = vcombine.high %v2011_v46, %v2099_v58  ;;  %5452 = vmatprep.subr.bf16.mxu0 %v6103_v0 }
 0x515   : > { %v5436_v51 = vpop.f32.mrf.mxu1 }
 0x516   : > { %v2130_v4 = vrot.slane %v2122_v53, %v6457_v55  ;;  %v2137_v6 = vrot.slane %v2123_v1, %v6457_v55 }
 0x517   : > { %v2102_v37 = vpop.f32.mrf.mxu1 }
 0x518   : > { %v2138_v10 = vcombine.low %v2114_v2, %v2130_v4  ;;  %v2139_v25 = vcombine.high %v2114_v2, %v2130_v4  ;;  %v2154_v11 = vcombine.low %v2121_v3, %v2137_v6  ;;  %v2155_v19 = vcombine.high %v2121_v3, %v2137_v6 }
 0x519   : > { %v2190_v21 = vcombine.low %v2014_v63, %v2102_v37  ;;  %v2191_v23 = vcombine.high %v2014_v63, %v2102_v37  ;;  %v5437_v26 = vpop.f32.mrf.mxu1 }
 0x51a   : > { %v2146_v12 = vrot.slane %v2138_v10, %v6460_v62  ;;  %v2153_v13 = vrot.slane %v2139_v25, %v6460_v62  ;;  %v2162_v16 = vrot.slane %v2154_v11, %v6460_v62  ;;  %v2169_v18 = vrot.slane %v2155_v19, %v6460_v62  ;;  %v5761_v11 = vld [vmem:[#allocation2 + $0xc0] sm:$0xff]  }
 0x51b   : > { %v2198_v43 = vrot.slane %v2190_v21, %v6457_v55  ;;  %v2205_v45 = vrot.slane %v2191_v23, %v6457_v55  ;;  %5453 = vmatpush3.bf16.msra.mxu0 %v5761_v11 }
 0x51c   : > { %v2242_v15 = vcombine.low %v2146_v12, %v2153_v13  ;;  %v5103_v47 = vcombine.high %v2146_v12, %v2153_v13  ;;  %v2258_v14 = vcombine.low %v2162_v16, %v2169_v18  ;;  %v5104_v48 = vcombine.high %v2162_v16, %v2169_v18  ;;  %v5762_v13 = vld [vmem:[#allocation3 + $0x38] sm:$0xff]   ;;  %5478 = vmatprep.subr.bf16.mxu0 %v6103_v0 }
 0x51d   : > { %v2206_v33 = vcombine.low %v2182_v31, %v2198_v43  ;;  %v2207_v34 = vcombine.high %v2182_v31, %v2198_v43  ;;  %v2222_v35 = vcombine.low %v2189_v32, %v2205_v45  ;;  %v2223_v20 = vcombine.high %v2189_v32, %v2205_v45  ;;  %5459 = vmatpush3.bf16.msra.mxu1 %v5762_v13  ;;  %v5764_v32 = vld [vmem:[#allocation3 + $0x30] sm:$0xff]  }
 0x51e   : > { %v2249_v36 = vrot.slane %v2242_v15, %v6457_v55  ;;  %v2257_v22 = vrot.slane %v5103_v47, %v6457_v55  ;;  %v2265_v49 = vrot.slane %v2258_v14, %v6457_v55  ;;  %v2273_v50 = vrot.slane %v5104_v48, %v6457_v55  ;;  %5460 = vmatprep.subr.bf16.mxu1 %v6103_v0  ;;  %v5766_v15 = vld [vmem:[#allocation3 + $0x28] sm:$0xff]   ;;  %v5768_v47 = vld [vmem:[#allocation3 + $0x20] sm:$0xff]   ;;  %v5770_v14 = vld [vmem:[#allocation3 + $0x18] sm:$0xff]  }
 0x51f   : > { %v2214_v24 = vrot.slane %v2206_v33, %v6460_v62  ;;  %v2221_v17 = vrot.slane %v2207_v34, %v6460_v62  ;;  %v2230_v38 = vrot.slane %v2222_v35, %v6460_v62  ;;  %v2237_v39 = vrot.slane %v2223_v20, %v6460_v62 }
 0x520   : > { %v2275_v40 = vcombine.high %v2249_v36, %v2257_v22  ;;  %v2291_v41 = vcombine.high %v2265_v49, %v2273_v50  ;;  %v2274_v44 = vcombine.low %v2249_v36, %v2257_v22  ;;  %v2290_v46 = vcombine.low %v2265_v49, %v2273_v50 }
 0x521   : > { %v2310_v52 = vcombine.low %v2214_v24, %v2221_v17  ;;  %v5105_v63 = vcombine.high %v2214_v24, %v2221_v17  ;;  %v2326_v54 = vcombine.low %v2230_v38, %v2237_v39  ;;  %v5106_v56 = vcombine.high %v2230_v38, %v2237_v39  ;;  %5461 = vmatpush3.bf16.msra.mxu1 %v5764_v32  ;;  %v5780_v32 = vld [vmem:[#allocation3 + $0xa8] sm:$0xff]  }
 0x522   : > { %v2282_v57 = vrot.slane %v2274_v44, %v6460_v62  ;;  %v2298_v59 = vrot.slane %v2290_v46, %v6460_v62  ;;  %v2289_v1 = vrot.slane %v2275_v40, %v6460_v62  ;;  %v2305_v51 = vrot.slane %v2291_v41, %v6460_v62  ;;  %5462 = vmatprep.subr.bf16.mxu1 %v6103_v0  ;;  %v5763_v44 = vld [vmem:[#allocation3 + $0x78] sm:$0xff]  }
 0x523   : > { %v2317_v61 = vrot.slane %v2310_v52, %v6457_v55  ;;  %v2325_v29 = vrot.slane %v5105_v63, %v6457_v55  ;;  %v2333_v58 = vrot.slane %v2326_v54, %v6457_v55  ;;  %v2341_v53 = vrot.slane %v5106_v56, %v6457_v55  ;;  %v5765_v52 = vld [vmem:[#allocation3 + $0x70] sm:$0xff]   ;;  %v5767_v63 = vld [vmem:[#allocation3 + $0x68] sm:$0xff]   ;;  %v5769_v54 = vld [vmem:[#allocation3 + $0x60] sm:$0xff]  }
 0x524   : > { %v2306_v2 = vcombine.low %v2282_v57, %v2298_v59  ;;  %v2308_v19 = vcombine.low %v2289_v1, %v2305_v51  ;;  %v2307_v23 = vcombine.high %v2282_v57, %v2298_v59  ;;  %v2309_v43 = vcombine.high %v2289_v1, %v2305_v51  ;;  %v5771_v56 = vld [vmem:[#allocation3 + $0x58] sm:$0xff]   ;;  %v5772_v57 = vld [vmem:[#allocation3 + $0x10] sm:$0xff]   ;;  %v5883_v1 = vld [vmem:[%s7253_s3] sm:$0xf] }
 0x525   : > { %v2343_v3 = vcombine.high %v2317_v61, %v2325_v29  ;;  %v2359_v4 = vcombine.high %v2333_v58, %v2341_v53  ;;  %v2342_v6 = vcombine.low %v2317_v61, %v2325_v29  ;;  %v2358_v7 = vcombine.low %v2333_v58, %v2341_v53  ;;  %5463 = vmatpush3.bf16.msra.mxu1 %v5766_v15  ;;  %v5773_v59 = vld [vmem:[#allocation3 + $0x50] sm:$0xff]   ;;  %v5775_v61 = vld [vmem:[#allocation3 + $0x48] sm:$0xff]   ;;  %v5776_v29 = vld [vmem:[#allocation3] sm:$0xff]  }
 0x526   : > { %5464 = vmatprep.subr.bf16.mxu1 %v6103_v0  ;;  %v5777_v58 = vld [vmem:[#allocation3 + $0x40] sm:$0xff]   ;;  %v2413_v53 = vsub.s32 3, %v6416_v27  ;;  %v5783_v15 = vld [vmem:[#allocation3 + $0x90] sm:$0xff]  }
 0x527   : > { %v2357_v8 = vrot.slane %v2343_v3, %v6460_v62  ;;  %v2373_v37 = vrot.slane %v2359_v4, %v6460_v62  ;;  %v2350_v10 = vrot.slane %v2342_v6, %v6460_v62  ;;  %v2366_v25 = vrot.slane %v2358_v7, %v6460_v62  ;;  %v5884_v3 = vld [vmem:[%s6330_s30] sm:$0xff]   ;;  %v5205_v7 = vld [vmem:[%s6337_s21] sm:$0xff]  }
 0x528   : > { %v2414_v51 = vrot.slane %v5883_v1, %v2413_v53  ;;  %v394_v4 = vunpack.c.l.bf16 %v5884_v3  ;;  %v5206_v11 = vunpack.c.l.bf16 %v5205_v7  ;;  %v5171_v27 = vld [vmem:[%s7257_s7] ss:$0 sm:$0xff] }
 0x529   : > { %v2376_v21 = vcombine.low %v2357_v8, %v2373_v37  ;;  %v2375_v26 = vcombine.high %v2350_v10, %v2366_v25  ;;  %v2374_v12 = vcombine.low %v2350_v10, %v2366_v25  ;;  %v2377_v31 = vcombine.high %v2357_v8, %v2373_v37  ;;  %5465 = vmatpush3.bf16.msra.mxu1 %v5768_v47  ;;  %v5784_v47 = vld [vmem:[#allocation3 + $0x88] sm:$0xff]  }
 0x52a   : > { %5466 = vmatprep.subr.bf16.mxu1 %v6103_v0  ;;  %v395_v37 = vunpack.c.h.bf16 %v5884_v3 }
 0x52b   : > { %v5704_v16 = vpack.i.bf16 %v2376_v21, %v2308_v19  ;;  %v5699_v18 = vpack.i.bf16 %v2375_v26, %v2307_v23  ;;  %v5709_v45 = vpack.i.bf16 %v2377_v31, %v2309_v43  ;;  %v5207_v21 = vunpack.c.h.bf16 %v5205_v7  ;;  %v5779_v31 = vld [vmem:[#allocation3 + $0xb0] sm:$0xff]   ;;  %v5781_v43 = vld [vmem:[#allocation3 + $0xa0] sm:$0xff]  }
 0x52d   : > { %5705 = vrot.lane.b32.xlu0 %v5704_v16, %s6105_s24  ;;  %5700 = vrot.lane.b32.xlu1 %v5699_v18, %s6107_s15  ;;  %v5778_v16 = vld [vmem:[#allocation3 + $0xb8] sm:$0xff]  }
 0x52e   : > { %5467 = vmatpush3.bf16.msra.mxu1 %v5770_v14  ;;  %v5785_v14 = vld [vmem:[#allocation3 + $0x80] sm:$0xff]  }
 0x52f   : > { %5468 = vmatprep.subr.bf16.mxu1 %v6103_v0 }
 0x531   : > { %5710 = vrot.lane.b32.xlu1 %v5709_v45, %s6106_s27  ;;  %v5782_v45 = vld [vmem:[#allocation3 + $0x98] sm:$0xff]  }
 0x532   : > { %5469 = vmatpush3.bf16.msra.mxu1 %v5772_v57 }
 0x533   : > { %5470 = vmatprep.subr.bf16.mxu1 %v6103_v0 }
 0x536   : > { %5471 = vmatpush3.bf16.msra.mxu1 %v5774_v60 }
 0x537   : > { %5472 = vmatprep.subr.bf16.mxu1 %v6103_v0 }
 0x53a   : > { %5473 = vmatpush3.bf16.msra.mxu1 %v5776_v29 }
 0x53b   : > { %5498 = vmatprep.subr.bf16.mxu1 %v6103_v0 }
 0x59f   : > { %v5706_v48 = vpop.permute.xlu0 %5705  ;;  %v5701_v33 = vpop.permute.xlu1 %5700 }
 0x5a0   : > { %v5703_v34 = vunpack.i.h.bf16 %v5701_v33  ;;  %v5702_v35 = vunpack.i.l.bf16 %v5701_v33  ;;  %v5708_v20 = vunpack.i.h.bf16 %v5706_v48  ;;  %v5707_v36 = vunpack.i.l.bf16 %v5706_v48  ;;  %v6817_v48 = vld [vmem:[%s7255_s5] sm:$0xf] }
 0x5a1   : > { %v2677_v33 = vrot.slane %v6817_v48, %v574_v28 }
 0x5a2   : > { %v2402_v22 = vsel %vm1648_vm1, %v2306_v2, %v5702_v35  ;;  %v2403_v49 = vsel %vm1648_vm1, %v2374_v12, %v5703_v34 }
 0x5a3   : > { %v5711_v50 = vpop.permute.xlu1 %5710  ;;  %v2405_v38 = vsel %vm2404_vm5, %v2402_v22, %v5707_v36  ;;  %v2406_v39 = vsel %vm2404_vm5, %v2403_v49, %v5708_v20 }
 0x5a4   : > { %v5713_v24 = vunpack.i.h.bf16 %v5711_v50  ;;  %v5712_v17 = vunpack.i.l.bf16 %v5711_v50 }
 0x5a6   : > { %v2408_v40 = vsel %vm2407_vm6, %v2405_v38, %v5712_v17  ;;  %v2409_v41 = vsel %vm2407_vm6, %v2406_v39, %v5713_v24  ;;  %v2584_v24 = vrot.slane %v6817_v48, %v475_v30 }
 0x5a7   : > { %v2410_v46 = vpack.c.bf16 %v2409_v41, %v2408_v40 }
 0x5a9   : > { %5455 = vmatmul.mubr.bf16.vlgmr.msra.gmra.mxu0 %v2410_v46 }
 0x5aa   : > { %5479 = vmatpush3.bf16.msra.mxu0 %v5763_v44  ;;  %5494 = vmatprep.mubr.msk.bf16.mxu0 %vm6104_vm0, %v6103_v0 }
 0x5ab   : > { %5480 = vmatprep.subr.bf16.mxu0 %v6103_v0 }
 0x5ae   : > { %5481 = vmatpush3.bf16.msra.mxu0 %v5765_v52 }
 0x5af   : > { %5482 = vmatprep.subr.bf16.mxu0 %v6103_v0 }
 0x5b2   : > { %5483 = vmatpush3.bf16.msra.mxu0 %v5767_v63 }
 0x5b3   : > { %5484 = vmatprep.subr.bf16.mxu0 %v6103_v0 }
 0x5b6   : > { %5485 = vmatpush3.bf16.msra.mxu0 %v5769_v54 }
 0x5b7   : > { %5486 = vmatprep.subr.bf16.mxu0 %v6103_v0 }
 0x5ba   : > { %5487 = vmatpush3.bf16.msra.mxu0 %v5771_v56 }
 0x5bb   : > { %5488 = vmatprep.subr.bf16.mxu0 %v6103_v0 }
 0x5be   : > { %5489 = vmatpush3.bf16.msra.mxu0 %v5773_v59 }
 0x5bf   : > { %5490 = vmatprep.subr.bf16.mxu0 %v6103_v0 }
 0x5c2   : > { %5491 = vmatpush3.bf16.msra.mxu0 %v5775_v61 }
 0x5c3   : > { %5492 = vmatprep.subr.bf16.mxu0 %v6103_v0 }
 0x5c6   : > { %5493 = vmatpush3.bf16.msra.mxu0 %v5777_v58 }
 0x5c7   : > { %5518 = vmatprep.subr.bf16.mxu0 %v6103_v0 }
 0x669   : > { %v2497_v2 = vpop.f32.mrf.mxu0 }
 0x66a   : > { %v2498_v6 = vadd.f32 %v2497_v2, %v2414_v51 }
 0x66b   : > { %v5456_v8 = vpop.f32.mrf.mxu0 }
 0x66c   : > { %v2504_v25 = vadd.f32 %v2498_v6, %v394_v4 }
 0x66d   : > { %v2500_v10 = vpop.f32.mrf.mxu0 }
 0x66e   : > { %v2501_v19 = vadd.f32 %v2500_v10, %v2414_v51  ;;  %v6794_v12 = vadd.f32 %v5206_v11, %v2504_v25 }
 0x66f   : > { %v5457_v23 = vpop.f32.mrf.mxu0 }
 0x670   : > { %v2505_v26 = vadd.f32 %v2501_v19, %v395_v37 }
 0x672   : > { %v6796_v13 = vadd.f32 %v5207_v21, %v2505_v26 }
 0x674   : > { %v2512_v18 = vpack.c.bf16 %v6796_v13, %v6794_v12 }
 0x676   : > { %5475 = vmatmul.mubr.bf16.vlgmr.msra.gmra.mxu1 %v2512_v18  ;;  %5495 = vmatmul.mubr.bf16.vlgmr.msra.gmra.mxu0 %v2512_v18 }
 0x677   : > { %5499 = vmatpush3.bf16.msra.mxu1 %v5778_v16  ;;  %5514 = vmatprep.mubr.msk.bf16.mxu1 %vm6104_vm0, %v6103_v0 }
 0x678   : > { %5500 = vmatprep.subr.bf16.mxu1 %v6103_v0  ;;  %5520 = vmatprep.mubr.msk.bf16.mxu0 %vm6104_vm0, %v6103_v0 }
 0x67b   : > { %5501 = vmatpush3.bf16.msra.mxu1 %v5779_v31 }
 0x67c   : > { %5502 = vmatprep.subr.bf16.mxu1 %v6103_v0 }
 0x67f   : > { %5503 = vmatpush3.bf16.msra.mxu1 %v5780_v32 }
 0x680   : > { %5504 = vmatprep.subr.bf16.mxu1 %v6103_v0 }
 0x683   : > { %5505 = vmatpush3.bf16.msra.mxu1 %v5781_v43 }
 0x684   : > { %5506 = vmatprep.subr.bf16.mxu1 %v6103_v0 }
 0x687   : > { %5507 = vmatpush3.bf16.msra.mxu1 %v5782_v45 }
 0x688   : > { %5508 = vmatprep.subr.bf16.mxu1 %v6103_v0 }
 0x68b   : > { %5509 = vmatpush3.bf16.msra.mxu1 %v5783_v15 }
 0x68c   : > { %5510 = vmatprep.subr.bf16.mxu1 %v6103_v0 }
 0x68f   : > { %5511 = vmatpush3.bf16.msra.mxu1 %v5784_v47 }
 0x690   : > { %5512 = vmatprep.subr.bf16.mxu1 %v6103_v0 }
 0x693   : > { %5513 = vmatpush3.bf16.msra.mxu1 %v5785_v14 }
 0x694   : > { %5524 = vmatprep.subr.bf16.mxu1 %v6103_v0 }
 0x696   : > { %5515 = vmatmul.mubr.bf16.vlgmr.msra.gmra.mxu1 %v2512_v18 }
 0x697   : > { %5526 = vmatprep.mubr.msk.bf16.mxu1 %vm6104_vm0, %v6103_v0 }
 0x736   : > { %v2667_v34 = vpop.f32.mrf.mxu1  ;;  %v2760_v35 = vpop.f32.mrf.mxu0 }
 0x737   : > { %v2761_v20 = vadd.f32 %v2760_v35, %v2677_v33  ;;  %v2668_v28 = vadd.f32 %v2667_v34, %v2584_v24 }
 0x738   : > { %v5476_v36 = vpop.f32.mrf.mxu1  ;;  %v5496_v22 = vpop.f32.mrf.mxu0 }
 0x739   : > { %3160 = vrot.lane.b32.xlu1 %v2761_v20, %s6106_s27  ;;  %v6830_v40 = vmul.f32 0.17677669, %v2668_v28 }
 0x73a   : > { %v2670_v49 = vpop.f32.mrf.mxu1  ;;  %v2763_v50 = vpop.f32.mrf.mxu0 }
 0x73b   : > { %v2764_v17 = vadd.f32 %v2763_v50, %v2677_v33  ;;  %v2671_v41 = vadd.f32 %v2670_v49, %v2584_v24 }
 0x73c   : > { %v5477_v38 = vpop.f32.mrf.mxu1  ;;  %v5497_v39 = vpop.f32.mrf.mxu0 }
 0x73d   : > { %3166 = vrot.lane.b32.xlu1 %v2761_v20, %s6105_s24  ;;  %3162 = vrot.lane.b32.xlu0 %v2764_v17, %s6106_s27  ;;  %v6835_v30 = vmul.f32 0.17677669, %v2671_v41 }
 0x741   : > { %3172 = vrot.lane.b32.xlu1 %v2761_v20, %s6107_s15  ;;  %3168 = vrot.lane.b32.xlu0 %v2764_v17, %s6105_s24 }
 0x745   : > { %3174 = vrot.lane.b32.xlu0 %v2764_v17, %s6107_s15  ;;  %2864 = vrot.lane.b32.xlu1 %v6830_v40, %s6106_s27 }
 0x749   : > { %2870 = vrot.lane.b32.xlu1 %v6830_v40, %s6105_s24  ;;  %2866 = vrot.lane.b32.xlu0 %v6835_v30, %s6106_s27 }
 0x74d   : > { %2876 = vrot.lane.b32.xlu1 %v6830_v40, %s6107_s15  ;;  %2872 = vrot.lane.b32.xlu0 %v6835_v30, %s6105_s24 }
 0x751   : > { %2878 = vrot.lane.b32.xlu0 %v6835_v30, %s6107_s15 }
 0x756   : > { %v6847_v44 = vpop.f32.mrf.mxu1 }
 0x758   : > { %v5516_v46 = vpop.f32.mrf.mxu1 }
 0x75a   : > { %v6849_v52 = vpop.f32.mrf.mxu1 }
 0x75c   : > { %v5517_v63 = vpop.f32.mrf.mxu1 }
 0x7ab   : > { %v3161_v54 = vpop.permute.xlu1 %3160 }
 0x7af   : > { %v3167_v56 = vpop.permute.xlu1 %3166  ;;  %v3163_v57 = vpop.permute.xlu0 %3162 }
 0x7b0   : > { %v3178_v59 = vcombine.low %v2761_v20, %v3167_v56  ;;  %v3179_v60 = vcombine.high %v2761_v20, %v3167_v56 }
 0x7b2   : > { %v3186_v51 = vrot.slane %v3178_v59, %v6457_v55  ;;  %v3193_v2 = vrot.slane %v3179_v60, %v6457_v55 }
 0x7b3   : > { %v3173_v61 = vpop.permute.xlu1 %3172  ;;  %v3169_v29 = vpop.permute.xlu0 %3168 }
 0x7b4   : > { %v3194_v58 = vcombine.low %v3161_v54, %v3173_v61  ;;  %v3195_v1 = vcombine.high %v3161_v54, %v3173_v61  ;;  %v3246_v6 = vcombine.low %v2764_v17, %v3169_v29  ;;  %v3247_v7 = vcombine.high %v2764_v17, %v3169_v29 }
 0x7b6   : > { %v3202_v3 = vrot.slane %v3194_v58, %v6457_v55  ;;  %v3209_v4 = vrot.slane %v3195_v1, %v6457_v55  ;;  %v3254_v32 = vrot.slane %v3246_v6, %v6457_v55  ;;  %v3261_v43 = vrot.slane %v3247_v7, %v6457_v55 }
 0x7b7   : > { %v3175_v8 = vpop.permute.xlu0 %3174  ;;  %v2865_v37 = vpop.permute.xlu1 %2864 }
 0x7b8   : > { %v3210_v10 = vcombine.low %v3186_v51, %v3202_v3  ;;  %v3211_v25 = vcombine.high %v3186_v51, %v3202_v3  ;;  %v3226_v11 = vcombine.low %v3193_v2, %v3209_v4  ;;  %v3227_v19 = vcombine.high %v3193_v2, %v3209_v4 }
 0x7b9   : > { %v3262_v21 = vcombine.low %v3163_v57, %v3175_v8  ;;  %v3263_v23 = vcombine.high %v3163_v57, %v3175_v8 }
 0x7ba   : > { %v3218_v26 = vrot.slane %v3210_v10, %v6460_v62  ;;  %v3225_v16 = vrot.slane %v3211_v25, %v6460_v62  ;;  %v3234_v18 = vrot.slane %v3226_v11, %v6460_v62  ;;  %v3241_v31 = vrot.slane %v3227_v19, %v6460_v62 }
 0x7bb   : > { %v3270_v45 = vrot.slane %v3262_v21, %v6457_v55  ;;  %v3277_v15 = vrot.slane %v3263_v23, %v6457_v55  ;;  %v2871_v47 = vpop.permute.xlu1 %2870  ;;  %v2867_v14 = vpop.permute.xlu0 %2866 }
 0x7bc   : > { %v3314_v33 = vcombine.low %v3218_v26, %v3225_v16  ;;  %v5143_v34 = vcombine.high %v3218_v26, %v3225_v16  ;;  %v3330_v35 = vcombine.low %v3234_v18, %v3241_v31  ;;  %v5144_v20 = vcombine.high %v3234_v18, %v3241_v31 }
 0x7bd   : > { %v3278_v36 = vcombine.low %v3254_v32, %v3270_v45  ;;  %v3279_v22 = vcombine.high %v3254_v32, %v3270_v45  ;;  %v3294_v49 = vcombine.low %v3261_v43, %v3277_v15  ;;  %v3295_v50 = vcombine.high %v3261_v43, %v3277_v15 }
 0x7be   : > { %v2882_v46 = vcombine.low %v6830_v40, %v2871_v47  ;;  %v2883_v63 = vcombine.high %v6830_v40, %v2871_v47  ;;  %v6870_v57 = vrot.slane %v3314_v33, %v6457_v55  ;;  %v6873_v59 = vrot.slane %v5143_v34, %v6457_v55 }
 0x7bf   : > { %v3286_v24 = vrot.slane %v3278_v36, %v6460_v62  ;;  %v3293_v17 = vrot.slane %v3279_v22, %v6460_v62  ;;  %v3302_v38 = vrot.slane %v3294_v49, %v6460_v62  ;;  %v3309_v39 = vrot.slane %v3295_v50, %v6460_v62  ;;  %v2877_v28 = vpop.permute.xlu1 %2876  ;;  %v2873_v41 = vpop.permute.xlu0 %2872 }
 0x7c0   : > { %v2898_v54 = vcombine.low %v2865_v37, %v2877_v28  ;;  %v2899_v56 = vcombine.high %v2865_v37, %v2877_v28  ;;  %v6876_v60 = vrot.slane %v3330_v35, %v6457_v55  ;;  %v6879_v61 = vrot.slane %v5144_v20, %v6457_v55 }
 0x7c1   : > { %v2890_v29 = vrot.slane %v2882_v46, %v6457_v55  ;;  %v2897_v58 = vrot.slane %v2883_v63, %v6457_v55  ;;  %v3382_v51 = vcombine.low %v3286_v24, %v3293_v17  ;;  %v5145_v2 = vcombine.high %v3286_v24, %v3293_v17 }
 0x7c2   : > { %v2906_v40 = vrot.slane %v2898_v54, %v6457_v55  ;;  %v2913_v1 = vrot.slane %v2899_v56, %v6457_v55  ;;  %v3398_v3 = vcombine.low %v3302_v38, %v3309_v39  ;;  %v5146_v4 = vcombine.high %v3302_v38, %v3309_v39 }
 0x7c3   : > { %v2879_v6 = vpop.permute.xlu0 %2878  ;;  %v2950_v25 = vcombine.low %v6835_v30, %v2873_v41  ;;  %v2951_v11 = vcombine.high %v6835_v30, %v2873_v41  ;;  %v3389_v36 = vrot.slane %v3382_v51, %v6457_v55  ;;  %v3397_v22 = vrot.slane %v5145_v2, %v6457_v55 }
 0x7c4   : > { %v2914_v7 = vcombine.low %v2890_v29, %v2906_v40  ;;  %v2915_v8 = vcombine.high %v2890_v29, %v2906_v40  ;;  %v2930_v37 = vcombine.low %v2897_v58, %v2913_v1  ;;  %v2931_v10 = vcombine.high %v2897_v58, %v2913_v1 }
 0x7c5   : > { %v2966_v19 = vcombine.low %v2867_v14, %v2879_v6  ;;  %v2967_v21 = vcombine.high %v2867_v14, %v2879_v6  ;;  %v2958_v31 = vrot.slane %v2950_v25, %v6457_v55  ;;  %v2965_v32 = vrot.slane %v2951_v11, %v6457_v55 }
 0x7c6   : > { %v2922_v23 = vrot.slane %v2914_v7, %v6460_v62  ;;  %v2929_v26 = vrot.slane %v2915_v8, %v6460_v62  ;;  %v2938_v16 = vrot.slane %v2930_v37, %v6460_v62  ;;  %v2945_v18 = vrot.slane %v2931_v10, %v6460_v62 }
 0x7c7   : > { %v2974_v43 = vrot.slane %v2966_v19, %v6457_v55  ;;  %v2981_v45 = vrot.slane %v2967_v21, %v6457_v55  ;;  %v3405_v49 = vrot.slane %v3398_v3, %v6457_v55  ;;  %v3413_v50 = vrot.slane %v5146_v4, %v6457_v55 }
 0x7c8   : > { %v3018_v15 = vcombine.low %v2922_v23, %v2929_v26  ;;  %v5139_v30 = vcombine.high %v2922_v23, %v2929_v26  ;;  %v3034_v47 = vcombine.low %v2938_v16, %v2945_v18  ;;  %v5140_v14 = vcombine.high %v2938_v16, %v2945_v18 }
 0x7c9   : > { %v2982_v33 = vcombine.low %v2958_v31, %v2974_v43  ;;  %v2983_v34 = vcombine.high %v2958_v31, %v2974_v43  ;;  %v2998_v35 = vcombine.low %v2965_v32, %v2981_v45  ;;  %v2999_v20 = vcombine.high %v2965_v32, %v2981_v45 }
 0x7ca   : > { %v6904_v28 = vrot.slane %v3018_v15, %v6457_v55  ;;  %v6907_v41 = vrot.slane %v5139_v30, %v6457_v55  ;;  %v6910_v46 = vrot.slane %v3034_v47, %v6457_v55  ;;  %v6913_v63 = vrot.slane %v5140_v14, %v6457_v55 }
 0x7cb   : > { %v2990_v24 = vrot.slane %v2982_v33, %v6460_v62  ;;  %v2997_v17 = vrot.slane %v2983_v34, %v6460_v62  ;;  %v3006_v38 = vrot.slane %v2998_v35, %v6460_v62  ;;  %v3013_v39 = vrot.slane %v2999_v20, %v6460_v62 }
 0x7cc   : > { %v3346_v3 = vcombine.low %v6870_v57, %v6873_v59  ;;  %v3362_v4 = vcombine.low %v6876_v60, %v6879_v61  ;;  %v3414_v6 = vcombine.low %v3389_v36, %v3397_v22  ;;  %v3430_v7 = vcombine.low %v3405_v49, %v3413_v50 }
 0x7cd   : > { %v3086_v54 = vcombine.low %v2990_v24, %v2997_v17  ;;  %v5141_v56 = vcombine.high %v2990_v24, %v2997_v17  ;;  %v3102_v29 = vcombine.low %v3006_v38, %v3013_v39  ;;  %v5142_v58 = vcombine.high %v3006_v38, %v3013_v39 }
 0x7ce   : > { %v3050_v8 = vcombine.low %v6904_v28, %v6907_v41  ;;  %v3066_v37 = vcombine.low %v6910_v46, %v6913_v63  ;;  %v3354_v11 = vrot.slane %v3346_v3, %v6460_v62  ;;  %v3370_v19 = vrot.slane %v3362_v4, %v6460_v62 }
 0x7cf   : > { %v3093_v40 = vrot.slane %v3086_v54, %v6457_v55  ;;  %v3101_v1 = vrot.slane %v5141_v56, %v6457_v55  ;;  %v3109_v51 = vrot.slane %v3102_v29, %v6457_v55  ;;  %v3117_v2 = vrot.slane %v5142_v58, %v6457_v55 }
 0x7d0   : > { %v3422_v21 = vrot.slane %v3414_v6, %v6460_v62  ;;  %v3438_v23 = vrot.slane %v3430_v7, %v6460_v62  ;;  %v3378_v18 = vcombine.low %v3354_v11, %v3370_v19  ;;  %v3379_v32 = vcombine.high %v3354_v11, %v3370_v19 }
 0x7d1   : > { %v3118_v10 = vcombine.low %v3093_v40, %v3101_v1  ;;  %v3134_v25 = vcombine.low %v3109_v51, %v3117_v2  ;;  %v3058_v45 = vrot.slane %v3050_v8, %v6460_v62  ;;  %v3074_v15 = vrot.slane %v3066_v37, %v6460_v62 }
 0x7d2   : > { %v3446_v31 = vcombine.low %v3422_v21, %v3438_v23  ;;  %v3447_v43 = vcombine.high %v3422_v21, %v3438_v23  ;;  %v3347_v14 = vcombine.high %v6870_v57, %v6873_v59  ;;  %v3363_v33 = vcombine.high %v6876_v60, %v6879_v61 }
 0x7d3   : > { %v3126_v26 = vrot.slane %v3118_v10, %v6460_v62  ;;  %v3142_v16 = vrot.slane %v3134_v25, %v6460_v62  ;;  %v3415_v20 = vcombine.high %v3389_v36, %v3397_v22  ;;  %v3431_v24 = vcombine.high %v3405_v49, %v3413_v50 }
 0x7d4   : > { %v3450_v30 = vpack.c.bf16 %v3446_v31, %v3378_v18  ;;  %v3451_v47 = vpack.c.bf16 %v3447_v43, %v3379_v32  ;;  %v3361_v39 = vrot.slane %v3347_v14, %v6460_v62  ;;  %v3377_v54 = vrot.slane %v3363_v33, %v6460_v62 }
 0x7d5   : > { %v3150_v34 = vcombine.low %v3126_v26, %v3142_v16  ;;  %v3151_v35 = vcombine.high %v3126_v26, %v3142_v16  ;;  %v3119_v56 = vcombine.high %v3093_v40, %v3101_v1  ;;  %v3429_v57 = vrot.slane %v3415_v20, %v6460_v62 }
 0x7d6   : > { %v3754_v17 = vsel %vm1648_vm1, %v3450_v30, 0  ;;  %v3801_v38 = vsel %vm1648_vm1, %v3451_v47, 0  ;;  %v3445_v59 = vrot.slane %v3431_v24, %v6460_v62  ;;  %v3135_v60 = vcombine.high %v3109_v51, %v3117_v2 }
 0x7d7   : > { %5519 = vmatpush3.bf16.xpose.msra.mxu0 %v3754_v17  ;;  %5525 = vmatpush3.bf16.xpose.msra.mxu1 %v3801_v38  ;;  %v3082_v61 = vcombine.low %v3058_v45, %v3074_v15  ;;  %v3083_v36 = vcombine.high %v3058_v45, %v3074_v15  ;;  %v3380_v22 = vcombine.low %v3361_v39, %v3377_v54 }
 0x7d8   : > { %5530 = vmatprep.subr.bf16.mxu0 %v6103_v0  ;;  %5536 = vmatprep.subr.bf16.mxu1 %v6103_v0  ;;  %v3448_v49 = vcombine.low %v3429_v57, %v3445_v59  ;;  %v3381_v50 = vcombine.high %v3361_v39, %v3377_v54  ;;  %v3449_v29 = vcombine.high %v3429_v57, %v3445_v59 }
 0x7d9   : > { %v3051_v58 = vcombine.high %v6904_v28, %v6907_v41  ;;  %v3067_v40 = vcombine.high %v6910_v46, %v6913_v63  ;;  %v3154_v1 = vpack.c.bf16 %v3150_v34, %v3082_v61  ;;  %v3155_v3 = vpack.c.bf16 %v3151_v35, %v3083_v36 }
 0x7da   : > { %v3452_v4 = vpack.c.bf16 %v3448_v49, %v3380_v22  ;;  %v3453_v51 = vpack.c.bf16 %v3449_v29, %v3381_v50  ;;  %v3133_v2 = vrot.slane %v3119_v56, %v6460_v62  ;;  %v3149_v6 = vrot.slane %v3135_v60, %v6460_v62 }
 0x7db   : > { %v3065_v7 = vrot.slane %v3051_v58, %v6460_v62  ;;  %v3081_v8 = vrot.slane %v3067_v40, %v6460_v62 }
 0x7dc   : > { %v3848_v28 = vsel %vm1648_vm1, %v3452_v4, 0  ;;  %v3895_v41 = vsel %vm1648_vm1, %v3453_v51, 0  ;;  %v3152_v46 = vcombine.low %v3133_v2, %v3149_v6  ;;  %v3153_v63 = vcombine.high %v3133_v2, %v3149_v6 }
 0x7dd   : > { %v3084_v37 = vcombine.low %v3065_v7, %v3081_v8  ;;  %v3085_v10 = vcombine.high %v3065_v7, %v3081_v8 }
 0x7de   : > { %5521 = vmatmul.mubr.msk.bf16.vlgmr.msra.gmra.mxu0 %vm1648_vm1, %v3154_v1  ;;  %5527 = vmatmul.mubr.msk.bf16.vlgmr.msra.gmra.mxu1 %vm1648_vm1, %v3155_v3 }
 0x7df   : > { %5531 = vmatpush3.bf16.xpose.msra.mxu0 %v3848_v28  ;;  %5537 = vmatpush3.bf16.xpose.msra.mxu1 %v3895_v41  ;;  %v3156_v25 = vpack.c.bf16 %v3152_v46, %v3084_v37  ;;  %v3157_v11 = vpack.c.bf16 %v3153_v63, %v3085_v10 }
 0x7e0   : > { %5532 = vmatprep.mubr.msk.bf16.mxu0 %vm6104_vm0, %v6103_v0  ;;  %5538 = vmatprep.mubr.msk.bf16.mxu1 %vm6104_vm0, %v6103_v0 }
 0x7e1   : > { %5542 = vmatprep.subr.bf16.mxu0 %v6103_v0  ;;  %5548 = vmatprep.subr.bf16.mxu1 %v6103_v0 }
 0x7e6   : > { %5533 = vmatmul.mubr.msk.bf16.vlgmr.msra.gmra.mxu0 %vm1648_vm1, %v3156_v25  ;;  %5539 = vmatmul.mubr.msk.bf16.vlgmr.msra.gmra.mxu1 %vm1648_vm1, %v3157_v11 }
 0x7e7   : > { %5544 = vmatprep.mubr.msk.bf16.mxu0 %vm6104_vm0, %v6103_v0  ;;  %5550 = vmatprep.mubr.msk.bf16.mxu1 %vm6104_vm0, %v6103_v0 }
 0x89e   : > { %v3790_v19 = vpop.f32.mrf.mxu0  ;;  %v3837_v21 = vpop.f32.mrf.mxu1 }
 0x89f   : > { %v3791_v23 = vadd.f32 %v3790_v19, %v6592_v5  ;;  %v3838_v26 = vadd.f32 %v3837_v21, %v6592_v5 }
 0x8a0   : > { %v5522_v16 = vpop.f32.mrf.mxu0  ;;  %v5528_v18 = vpop.f32.mrf.mxu1 }
 0x8a1   : > { %v3938_v31 = vsel %vm1837_vm4, %v3791_v23, -inf  ;;  %v3944_v32 = vsel %vm1837_vm4, %v3838_v26, -inf }
 0x8a2   : > { %3939 = vmax.xlane.f32.xlu1 %v3938_v31  ;;  %v3793_v43 = vpop.f32.mrf.mxu0  ;;  %3945 = vmax.xlane.f32.xlu0 %v3944_v32  ;;  %v3840_v45 = vpop.f32.mrf.mxu1 }
 0x8a3   : > { %v3794_v15 = vadd.f32 %v3793_v43, %v6596_v9  ;;  %v3841_v30 = vadd.f32 %v3840_v45, %v6596_v9 }
 0x8a4   : > { %v5523_v47 = vpop.f32.mrf.mxu0  ;;  %v5529_v14 = vpop.f32.mrf.mxu1 }
 0x8a5   : > { %v3941_v33 = vsel %vm1837_vm4, %v3794_v15, -inf  ;;  %v3947_v34 = vsel %vm1837_vm4, %v3841_v30, -inf }
 0x8a6   : > { %v3884_v35 = vpop.f32.mrf.mxu0  ;;  %3942 = vmax.xlane.f32.xlu0 %v3941_v33  ;;  %3948 = vmax.xlane.f32.xlu1 %v3947_v34  ;;  %v3931_v20 = vpop.f32.mrf.mxu1 }
 0x8a7   : > { %v3885_v24 = vadd.f32 %v3884_v35, %v6592_v5  ;;  %v3932_v39 = vadd.f32 %v3931_v20, %v6592_v5  ;;  %v2770_v5 = vrot.slane %v6817_v48, %v667_v42 }
 0x8a8   : > { %v5534_v17 = vpop.f32.mrf.mxu0  ;;  %v5540_v38 = vpop.f32.mrf.mxu1 }
 0x8a9   : > { %v3950_v54 = vsel %vm1837_vm4, %v3885_v24, -inf  ;;  %v3956_v49 = vsel %vm1837_vm4, %v3932_v39, -inf  ;;  %v6991_v29 = vadd.f32 %v6849_v52, %v2770_v5  ;;  %v6994_v58 = vadd.f32 %v6847_v44, %v2770_v5 }
 0x8aa   : > { %v3887_v56 = vpop.f32.mrf.mxu0  ;;  %3951 = vmax.xlane.f32.xlu0 %v3950_v54  ;;  %v3934_v57 = vpop.f32.mrf.mxu1 }
 0x8ab   : > { %v3888_v59 = vadd.f32 %v3887_v56, %v6596_v9  ;;  %v3935_v36 = vadd.f32 %v3934_v57, %v6596_v9 }
 0x8ac   : > { %v5535_v60 = vpop.f32.mrf.mxu0  ;;  %v5541_v61 = vpop.f32.mrf.mxu1 }
 0x8ad   : > { %v3953_v22 = vsel %vm1837_vm4, %v3888_v59, -inf  ;;  %v3959_v50 = vsel %vm1837_vm4, %v3935_v36, -inf }
 0x8ae   : > { %3954 = vmax.xlane.f32.xlu1 %v3953_v22  ;;  %3957 = vmax.xlane.f32.xlu0 %v3956_v49 }
 0x8b2   : > { %3960 = vmax.xlane.f32.xlu1 %v3959_v50 }
 0x8c3   : > { %3458 = vrot.lane.b32.xlu1 %v6991_v29, %s6106_s27 }
 0x8c4   : > { %3456 = vrot.lane.b32.xlu0 %v6994_v58, %s6106_s27 }
 0x8c7   : > { %3462 = vrot.lane.b32.xlu1 %v6994_v58, %s6105_s24 }
 0x8c8   : > { %3464 = vrot.lane.b32.xlu0 %v6991_v29, %s6105_s24 }
 0x8cb   : > { %3468 = vrot.lane.b32.xlu1 %v6994_v58, %s6107_s15 }
 0x8cc   : > { %3470 = vrot.lane.b32.xlu0 %v6991_v29, %s6107_s15 }
 0x92b   : > { %v3940_v42 = vpop.xlane.xlu1 %3939  ;;  %v3946_v9 = vpop.xlane.xlu0 %3945 }
 0x92c   : > { %v3962_v48 = vsub.f32 %v3791_v23, %v3940_v42  ;;  %v3964_v44 = vsub.f32 %v3838_v26, %v3946_v9 }
 0x92e   : > { %v3970_v52 = vmul.f32 1.442695, %v3962_v48  ;;  %v3974_v40 = vmul.f32 1.442695, %v3964_v44 }
 0x92f   : > { %v3943_v1 = vpop.xlane.xlu0 %3942  ;;  %v3949_v3 = vpop.xlane.xlu1 %3948 }
 0x930   : > { %5843 = vpow2.f32 %v3970_v52  ;;  %v3963_v4 = vsub.f32 %v3794_v15, %v3943_v1  ;;  %v3965_v51 = vsub.f32 %v3841_v30, %v3949_v3 }
 0x931   : > { %5845 = vpow2.f32 %v3974_v40 }
 0x932   : > { %v3972_v2 = vmul.f32 1.442695, %v3963_v4  ;;  %v3976_v6 = vmul.f32 1.442695, %v3965_v51 }
 0x933   : > { %v3952_v7 = vpop.xlane.xlu0 %3951 }
 0x934   : > { %5847 = vpow2.f32 %v3972_v2  ;;  %v3966_v8 = vsub.f32 %v3885_v24, %v3952_v7 }
 0x935   : > { %5849 = vpow2.f32 %v3976_v6 }
 0x936   : > { %v3978_v28 = vmul.f32 1.442695, %v3966_v8 }
 0x937   : > { %v3955_v41 = vpop.xlane.xlu1 %3954  ;;  %v3958_v46 = vpop.xlane.xlu0 %3957 }
 0x938   : > { %v3967_v63 = vsub.f32 %v3888_v59, %v3955_v41  ;;  %v3968_v37 = vsub.f32 %v3932_v39, %v3958_v46  ;;  %5851 = vpow2.f32 %v3978_v28 }
 0x93a   : > { %v3980_v10 = vmul.f32 1.442695, %v3967_v63  ;;  %v3982_v25 = vmul.f32 1.442695, %v3968_v37 }
 0x93b   : > { %v3457_v11 = vpop.permute.xlu0 %3456  ;;  %v3961_v19 = vpop.xlane.xlu1 %3960 }
 0x93c   : > { %5853 = vpow2.f32 %v3980_v10  ;;  %v3969_v21 = vsub.f32 %v3935_v36, %v3961_v19 }
 0x93d   : > { %v7008_v23 = vpop.eup %5843  ;;  %5855 = vpow2.f32 %v3982_v25 }
 0x93e   : > { %v3984_v26 = vmul.f32 1.442695, %v3969_v21  ;;  %v3986_v16 = vsel %vm1837_vm4, %v7008_v23, 0.0  ;;  %v7012_v18 = vpop.eup %5845 }
 0x93f   : > { %3987 = vadd.xlane.f32.xlu0 %v3986_v16  ;;  %v3465_v31 = vpop.permute.xlu0 %3464  ;;  %v3459_v32 = vpop.permute.xlu1 %3458  ;;  %v3992_v30 = vsel %vm1837_vm4, %v7012_v18, 0.0 }
 0x940   : > { %5857 = vpow2.f32 %v3984_v26  ;;  %v3542_v45 = vcombine.low %v6991_v29, %v3465_v31  ;;  %v3543_v15 = vcombine.high %v6991_v29, %v3465_v31 }
 0x941   : > { %v7014_v43 = vpop.eup %5847 }
 0x942   : > { %v3989_v47 = vsel %vm1837_vm4, %v7014_v43, 0.0  ;;  %v7022_v14 = vpop.eup %5849  ;;  %v3550_v17 = vrot.slane %v3542_v45, %v6457_v55  ;;  %v3557_v54 = vrot.slane %v3543_v15, %v6457_v55 }
 0x943   : > { %3993 = vadd.xlane.f32.xlu0 %v3992_v30  ;;  %v3471_v33 = vpop.permute.xlu0 %3470  ;;  %3990 = vadd.xlane.f32.xlu1 %v3989_v47  ;;  %v3463_v34 = vpop.permute.xlu1 %3462  ;;  %v3995_v59 = vsel %vm1837_vm4, %v7022_v14, 0.0 }
 0x944   : > { %v3558_v35 = vcombine.low %v3459_v32, %v3471_v33  ;;  %v3559_v20 = vcombine.high %v3459_v32, %v3471_v33  ;;  %v3474_v24 = vcombine.low %v6994_v58, %v3463_v34  ;;  %v3475_v38 = vcombine.high %v6994_v58, %v3463_v34 }
 0x945   : > { %v7027_v39 = vpop.eup %5851 }
 0x946   : > { %v3566_v56 = vrot.slane %v3558_v35, %v6457_v55  ;;  %v3573_v57 = vrot.slane %v3559_v20, %v6457_v55  ;;  %v3482_v60 = vrot.slane %v3474_v24, %v6457_v55  ;;  %v3489_v29 = vrot.slane %v3475_v38, %v6457_v55 }
 0x947   : > { %3996 = vadd.xlane.f32.xlu1 %v3995_v59  ;;  %v3469_v61 = vpop.permute.xlu1 %3468  ;;  %v3998_v9 = vsel %vm1837_vm4, %v7027_v39, 0.0 }
 0x948   : > { %v3574_v36 = vcombine.low %v3550_v17, %v3566_v56  ;;  %v3575_v22 = vcombine.high %v3550_v17, %v3566_v56  ;;  %v3590_v49 = vcombine.low %v3557_v54, %v3573_v57  ;;  %v3591_v50 = vcombine.high %v3557_v54, %v3573_v57 }
 0x949   : > { %v7035_v5 = vpop.eup %5853  ;;  %v3490_v58 = vcombine.low %v3457_v11, %v3469_v61  ;;  %v3491_v42 = vcombine.high %v3457_v11, %v3469_v61 }
 0x94a   : > { %v7040_v48 = vpop.eup %5855  ;;  %v3582_v44 = vrot.slane %v3574_v36, %v6460_v62  ;;  %v3589_v52 = vrot.slane %v3575_v22, %v6460_v62  ;;  %v3598_v40 = vrot.slane %v3590_v49, %v6460_v62  ;;  %v3605_v1 = vrot.slane %v3591_v50, %v6460_v62 }
 0x94b   : > { %v3498_v3 = vrot.slane %v3490_v58, %v6457_v55  ;;  %v3505_v4 = vrot.slane %v3491_v42, %v6457_v55  ;;  %v4001_v51 = vsel %vm1837_vm4, %v7035_v5, 0.0  ;;  %3999 = vadd.xlane.f32.xlu1 %v3998_v9  ;;  %v4004_v2 = vsel %vm1837_vm4, %v7040_v48, 0.0 }
 0x94c   : > { %v3678_v6 = vcombine.low %v3582_v44, %v3589_v52  ;;  %v5149_v7 = vcombine.high %v3582_v44, %v3589_v52  ;;  %v3694_v8 = vcombine.low %v3598_v40, %v3605_v1  ;;  %v5150_v28 = vcombine.high %v3598_v40, %v3605_v1  ;;  %4002 = vadd.xlane.f32.xlu0 %v4001_v51 }
 0x94d   : > { %v7052_v41 = vpop.eup %5857  ;;  %v3506_v46 = vcombine.low %v3482_v60, %v3498_v3  ;;  %v3507_v63 = vcombine.high %v3482_v60, %v3498_v3  ;;  %v3522_v37 = vcombine.low %v3489_v29, %v3505_v4  ;;  %v3523_v10 = vcombine.high %v3489_v29, %v3505_v4 }
 0x94e   : > { %v3685_v25 = vrot.slane %v3678_v6, %v6457_v55  ;;  %v3693_v11 = vrot.slane %v5149_v7, %v6457_v55  ;;  %v3701_v19 = vrot.slane %v3694_v8, %v6457_v55  ;;  %v3709_v21 = vrot.slane %v5150_v28, %v6457_v55 }
 0x94f   : > { %v3514_v26 = vrot.slane %v3506_v46, %v6460_v62  ;;  %v3521_v16 = vrot.slane %v3507_v63, %v6460_v62  ;;  %v3530_v31 = vrot.slane %v3522_v37, %v6460_v62  ;;  %v3537_v32 = vrot.slane %v3523_v10, %v6460_v62 }
 0x950   : > { %4005 = vadd.xlane.f32.xlu0 %v4004_v2  ;;  %v4007_v45 = vsel %vm1837_vm4, %v7052_v41, 0.0  ;;  %v3710_v15 = vcombine.low %v3685_v25, %v3693_v11  ;;  %v3726_v30 = vcombine.low %v3701_v19, %v3709_v21  ;;  %v3711_v47 = vcombine.high %v3685_v25, %v3693_v11 }
 0x951   : > { %v3610_v33 = vcombine.low %v3514_v26, %v3521_v16  ;;  %v5147_v34 = vcombine.high %v3514_v26, %v3521_v16  ;;  %v3626_v35 = vcombine.low %v3530_v31, %v3537_v32  ;;  %v5148_v20 = vcombine.high %v3530_v31, %v3537_v32  ;;  %4008 = vadd.xlane.f32.xlu1 %v4007_v45 }
 0x952   : > { %v3725_v24 = vrot.slane %v3711_v47, %v6460_v62  ;;  %v3727_v17 = vcombine.high %v3701_v19, %v3709_v21  ;;  %v3718_v59 = vrot.slane %v3710_v15, %v6460_v62  ;;  %v3734_v60 = vrot.slane %v3726_v30, %v6460_v62 }
 0x953   : > { %v3617_v38 = vrot.slane %v3610_v33, %v6457_v55  ;;  %v3625_v54 = vrot.slane %v5147_v34, %v6457_v55  ;;  %v3633_v56 = vrot.slane %v3626_v35, %v6457_v55  ;;  %v3641_v57 = vrot.slane %v5148_v20, %v6457_v55 }
 0x954   : > { %v3741_v61 = vrot.slane %v3727_v17, %v6460_v62  ;;  %v3742_v40 = vcombine.low %v3718_v59, %v3734_v60  ;;  %v3743_v1 = vcombine.high %v3718_v59, %v3734_v60 }
 0x955   : > { %v3642_v36 = vcombine.low %v3617_v38, %v3625_v54  ;;  %v3658_v22 = vcombine.low %v3633_v56, %v3641_v57  ;;  %v3643_v49 = vcombine.high %v3617_v38, %v3625_v54  ;;  %v3659_v50 = vcombine.high %v3633_v56, %v3641_v57  ;;  %v5787_v54 = vld [vmem:[#allocation3 + $0xf0] sm:$0xff]   ;;  %v5788_v56 = vld [vmem:[#allocation3 + $0xe8] sm:$0xff]  }
 0x956   : > { %v3744_v29 = vcombine.low %v3725_v24, %v3741_v61  ;;  %v3745_v58 = vcombine.high %v3725_v24, %v3741_v61  ;;  %v5791_v57 = vld [vmem:[#allocation3 + $0xd0] sm:$0xff]  }
 0x957   : > { %v3650_v42 = vrot.slane %v3642_v36, %v6460_v62  ;;  %v3666_v9 = vrot.slane %v3658_v22, %v6460_v62  ;;  %v3657_v44 = vrot.slane %v3643_v49, %v6460_v62  ;;  %v3673_v52 = vrot.slane %v3659_v50, %v6460_v62 }
 0x959   : > { %v3674_v3 = vcombine.low %v3650_v42, %v3666_v9  ;;  %v3675_v4 = vcombine.high %v3650_v42, %v3666_v9  ;;  %v3676_v51 = vcombine.low %v3657_v44, %v3673_v52  ;;  %v3677_v2 = vcombine.high %v3657_v44, %v3673_v52 }
 0x95b   : > { %v3746_v6 = vpack.c.bf16 %v3742_v40, %v3674_v3  ;;  %v3747_v7 = vpack.c.bf16 %v3743_v1, %v3675_v4  ;;  %v3748_v8 = vpack.c.bf16 %v3744_v29, %v3676_v51  ;;  %v3749_v28 = vpack.c.bf16 %v3745_v58, %v3677_v2 }
 0x95d   : > { %5543 = vmatpush3.bf16.msra.mxu0 %v3746_v6  ;;  %5549 = vmatpush3.bf16.msra.mxu1 %v3747_v7 }
 0x95e   : > { %5554 = vmatprep.subr.bf16.mxu0 %v6103_v0  ;;  %5560 = vmatprep.subr.bf16.mxu1 %v6103_v0 }
 0x9c8   : > { %v3988_v46 = vpop.xlane.xlu0 %3987 }
 0x9c9   : > { %5859 = vrcp.f32 %v3988_v46 }
 0x9cc   : > { %v3994_v63 = vpop.xlane.xlu0 %3993  ;;  %v3991_v37 = vpop.xlane.xlu1 %3990 }
 0x9cd   : > { %5861 = vrcp.f32 %v3991_v37 }
 0x9ce   : > { %5863 = vrcp.f32 %v3994_v63 }
 0x9d0   : > { %v3997_v10 = vpop.xlane.xlu1 %3996 }
 0x9d1   : > { %5865 = vrcp.f32 %v3997_v10 }
 0x9d4   : > { %v4000_v25 = vpop.xlane.xlu1 %3999 }
 0x9d5   : > { %v4003_v11 = vpop.xlane.xlu0 %4002  ;;  %5867 = vrcp.f32 %v4000_v25 }
 0x9d6   : > { %5869 = vrcp.f32 %v4003_v11  ;;  %v5860_v19 = vpop.eup %5859 }
 0x9d7   : > { %v4018_v32 = vmul.f32 %v5860_v19, %v7008_v23 }
 0x9d9   : > { %v4006_v21 = vpop.xlane.xlu0 %4005 }
 0x9da   : > { %5871 = vrcp.f32 %v4006_v21  ;;  %v4009_v26 = vpop.xlane.xlu1 %4008  ;;  %v5862_v16 = vpop.eup %5861 }
 0x9db   : > { %5873 = vrcp.f32 %v4009_v26  ;;  %v5864_v31 = vpop.eup %5863  ;;  %v4019_v45 = vmul.f32 %v5862_v16, %v7014_v43 }
 0x9dc   : > { %v4020_v47 = vmul.f32 %v5864_v31, %v7012_v18 }
 0x9dd   : > { %v4026_v30 = vpack.c.bf16 %v4019_v45, %v4018_v32 }
 0x9de   : > { %v5866_v15 = vpop.eup %5865 }
 0x9df   : > { %v4021_v33 = vmul.f32 %v5866_v15, %v7022_v14  ;;  %5545 = vmatmul.mubr.msk.bf16.vlgmr.msra.gmra.mxu0 %vm1837_vm4, %v4026_v30 }
 0x9e0   : > { %5555 = vmatpush3.bf16.msra.mxu0 %v3748_v8  ;;  %5556 = vmatprep.mubr.msk.bf16.mxu0 %vm6104_vm0, %v6103_v0 }
 0x9e1   : > { %v4027_v34 = vpack.c.bf16 %v4021_v33, %v4020_v47  ;;  %5566 = vmatprep.subr.bf16.mxu0 %v6103_v0 }
 0x9e2   : > { %v5868_v35 = vpop.eup %5867 }
 0x9e3   : > { %v5870_v20 = vpop.eup %5869  ;;  %5551 = vmatmul.mubr.msk.bf16.vlgmr.msra.gmra.mxu1 %vm1837_vm4, %v4027_v34  ;;  %v4022_v23 = vmul.f32 %v5868_v35, %v7027_v39 }
 0x9e4   : > { %5561 = vmatpush3.bf16.msra.mxu1 %v3749_v28  ;;  %v4023_v18 = vmul.f32 %v5870_v20, %v7035_v5  ;;  %5562 = vmatprep.mubr.msk.bf16.mxu1 %vm6104_vm0, %v6103_v0  ;;  %v5786_v5 = vld [vmem:[#allocation3 + $0xf8] sm:$0xff]  }
 0x9e5   : > { %5586 = vmatprep.subr.bf16.mxu1 %v6103_v0 }
 0x9e6   : > { %v4028_v43 = vpack.c.bf16 %v4023_v18, %v4022_v23 }
 0x9e7   : > { %v5872_v14 = vpop.eup %5871 }
 0x9e8   : > { %v5874_v24 = vpop.eup %5873  ;;  %5557 = vmatmul.mubr.msk.bf16.vlgmr.msra.gmra.mxu0 %vm1837_vm4, %v4028_v43  ;;  %v4024_v17 = vmul.f32 %v5872_v14, %v7040_v48  ;;  %v5789_v48 = vld [vmem:[#allocation3 + $0xe0] sm:$0xff]  }
 0x9e9   : > { %v4025_v38 = vmul.f32 %v5874_v24, %v7052_v41  ;;  %5582 = vmatprep.mubr.msk.bf16.mxu0 %vm6104_vm0, %v6103_v0  ;;  %5567 = vmatpush3.bf16.msra.mxu0 %v5786_v5  ;;  %v5790_v41 = vld [vmem:[#allocation3 + $0xd8] sm:$0xff]  }
 0x9ea   : > { %5568 = vmatprep.subr.bf16.mxu0 %v6103_v0 }
 0x9eb   : > { %v4029_v39 = vpack.c.bf16 %v4025_v38, %v4024_v17 }
 0x9ed   : > { %5563 = vmatmul.mubr.msk.bf16.vlgmr.msra.gmra.mxu1 %vm1837_vm4, %v4029_v39  ;;  %5569 = vmatpush3.bf16.msra.mxu0 %v5787_v54 }
 0x9ee   : > { %5602 = vmatprep.mubr.msk.bf16.mxu1 %vm6104_vm0, %v6103_v0  ;;  %5570 = vmatprep.subr.bf16.mxu0 %v6103_v0 }
 0x9f1   : > { %5571 = vmatpush3.bf16.msra.mxu0 %v5788_v56 }
 0x9f2   : > { %5572 = vmatprep.subr.bf16.mxu0 %v6103_v0 }
 0x9f5   : > { %5573 = vmatpush3.bf16.msra.mxu0 %v5789_v48 }
 0x9f6   : > { %5574 = vmatprep.subr.bf16.mxu0 %v6103_v0 }
 0x9f9   : > { %5575 = vmatpush3.bf16.msra.mxu0 %v5790_v41 }
 0x9fa   : > { %5576 = vmatprep.subr.bf16.mxu0 %v6103_v0 }
 0x9fd   : > { %5577 = vmatpush3.bf16.msra.mxu0 %v5791_v57 }
 0x9fe   : > { %5578 = vmatprep.subr.bf16.mxu0 %v6103_v0 }
 0xa9f   : > { %v4067_v59 = vpop.f32.mrf.mxu0 }
 0xaa1   : > { %v5546_v60 = vpop.f32.mrf.mxu0 }
 0xaa3   : > { %v4111_v61 = vpop.f32.mrf.mxu1  ;;  %v4070_v36 = vpop.f32.mrf.mxu0 }
 0xaa5   : > { %v5552_v22 = vpop.f32.mrf.mxu1  ;;  %v5547_v49 = vpop.f32.mrf.mxu0 }
 0xaa7   : > { %v4114_v50 = vpop.f32.mrf.mxu1 }
 0xaa8   : > { %v4155_v29 = vpop.f32.mrf.mxu0 }
 0xaa9   : > { %v5553_v58 = vpop.f32.mrf.mxu1  ;;  %v4206_v9 = vcombine.low %v4067_v59, %v4155_v29  ;;  %v4207_v44 = vcombine.high %v4067_v59, %v4155_v29 }
 0xaaa   : > { %v5558_v42 = vpop.f32.mrf.mxu0 }
 0xaab   : > { %v4214_v2 = vrot.slane %v4206_v9, %v6457_v55  ;;  %v4221_v6 = vrot.slane %v4207_v44, %v6457_v55  ;;  %v5792_v42 = vld [vmem:[#allocation3 + $0xc8] sm:$0xff]  }
 0xaac   : > { %v4158_v52 = vpop.f32.mrf.mxu0  ;;  %5579 = vmatpush3.bf16.msra.mxu0 %v5792_v42 }
 0xaad   : > { %v4199_v40 = vpop.f32.mrf.mxu1  ;;  %v4274_v28 = vcombine.low %v4070_v36, %v4158_v52  ;;  %v4275_v46 = vcombine.high %v4070_v36, %v4158_v52  ;;  %5580 = vmatprep.subr.bf16.mxu0 %v6103_v0 }
 0xaae   : > { %v4222_v1 = vcombine.low %v4111_v61, %v4199_v40  ;;  %v4223_v3 = vcombine.high %v4111_v61, %v4199_v40  ;;  %v5559_v4 = vpop.f32.mrf.mxu0 }
 0xaaf   : > { %v5564_v51 = vpop.f32.mrf.mxu1  ;;  %v4282_v15 = vrot.slane %v4274_v28, %v6457_v55  ;;  %v4289_v30 = vrot.slane %v4275_v46, %v6457_v55 }
 0xab0   : > { %v4230_v7 = vrot.slane %v4222_v1, %v6457_v55  ;;  %v4237_v8 = vrot.slane %v4223_v3, %v6457_v55 }
 0xab1   : > { %v4202_v63 = vpop.f32.mrf.mxu1 }
 0xab2   : > { %v4238_v37 = vcombine.low %v4214_v2, %v4230_v7  ;;  %v4239_v10 = vcombine.high %v4214_v2, %v4230_v7  ;;  %v4254_v25 = vcombine.low %v4221_v6, %v4237_v8  ;;  %v4255_v11 = vcombine.high %v4221_v6, %v4237_v8 }
 0xab3   : > { %v4290_v19 = vcombine.low %v4114_v50, %v4202_v63  ;;  %v4291_v21 = vcombine.high %v4114_v50, %v4202_v63  ;;  %v5565_v26 = vpop.f32.mrf.mxu1  ;;  %v5793_v63 = vld [vmem:[#allocation3 + $0xc0] sm:$0xff]  }
 0xab4   : > { %v4246_v16 = vrot.slane %v4238_v37, %v6460_v62  ;;  %v4253_v31 = vrot.slane %v4239_v10, %v6460_v62  ;;  %v4262_v32 = vrot.slane %v4254_v25, %v6460_v62  ;;  %v4269_v45 = vrot.slane %v4255_v11, %v6460_v62  ;;  %5581 = vmatpush3.bf16.msra.mxu0 %v5793_v63 }
 0xab5   : > { %v4298_v47 = vrot.slane %v4290_v19, %v6457_v55  ;;  %v4305_v33 = vrot.slane %v4291_v21, %v6457_v55  ;;  %v5794_v21 = vld [vmem:[#allocation4 + $0x38] sm:$0xff]   ;;  %5606 = vmatprep.subr.bf16.mxu0 %v6103_v0 }
 0xab6   : > { %v4342_v34 = vcombine.low %v4246_v16, %v4253_v31  ;;  %v5159_v35 = vcombine.high %v4246_v16, %v4253_v31  ;;  %v4358_v20 = vcombine.low %v4262_v32, %v4269_v45  ;;  %v5160_v23 = vcombine.high %v4262_v32, %v4269_v45  ;;  %5587 = vmatpush3.bf16.msra.mxu1 %v5794_v21  ;;  %v5795_v32 = vld [vmem:[#allocation4 + $0x30] sm:$0xff]  }
 0xab7   : > { %v4306_v18 = vcombine.low %v4282_v15, %v4298_v47  ;;  %v4307_v43 = vcombine.high %v4282_v15, %v4298_v47  ;;  %v4322_v14 = vcombine.low %v4289_v30, %v4305_v33  ;;  %v4323_v24 = vcombine.high %v4289_v30, %v4305_v33  ;;  %5588 = vmatprep.subr.bf16.mxu1 %v6103_v0  ;;  %v5796_v15 = vld [vmem:[#allocation4 + $0x28] sm:$0xff]   ;;  %v5797_v30 = vld [vmem:[#allocation4 + $0x20] sm:$0xff]   ;;  %v5798_v47 = vld [vmem:[#allocation4 + $0x18] sm:$0xff]  }
 0xab8   : > { %v4349_v17 = vrot.slane %v4342_v34, %v6457_v55  ;;  %v4357_v38 = vrot.slane %v5159_v35, %v6457_v55  ;;  %v4365_v39 = vrot.slane %v4358_v20, %v6457_v55  ;;  %v4373_v5 = vrot.slane %v5160_v23, %v6457_v55 }
 0xab9   : > { %v4314_v54 = vrot.slane %v4306_v18, %v6460_v62  ;;  %v4321_v56 = vrot.slane %v4307_v43, %v6460_v62  ;;  %v4330_v48 = vrot.slane %v4322_v14, %v6460_v62  ;;  %v4337_v41 = vrot.slane %v4323_v24, %v6460_v62 }
 0xaba   : > { %v4375_v57 = vcombine.high %v4349_v17, %v4357_v38  ;;  %v4391_v59 = vcombine.high %v4365_v39, %v4373_v5  ;;  %v4374_v60 = vcombine.low %v4349_v17, %v4357_v38  ;;  %v4390_v61 = vcombine.low %v4365_v39, %v4373_v5  ;;  %5589 = vmatpush3.bf16.msra.mxu1 %v5795_v32 }
 0xabb   : > { %v4410_v36 = vcombine.low %v4314_v54, %v4321_v56  ;;  %v5161_v22 = vcombine.high %v4314_v54, %v4321_v56  ;;  %v4426_v49 = vcombine.low %v4330_v48, %v4337_v41  ;;  %v5162_v50 = vcombine.high %v4330_v48, %v4337_v41  ;;  %5590 = vmatprep.subr.bf16.mxu1 %v6103_v0  ;;  %v5799_v41 = vld [vmem:[#allocation4 + $0x10] sm:$0xff]  }
 0xabc   : > { %v4382_v29 = vrot.slane %v4374_v60, %v6460_v62  ;;  %v4398_v58 = vrot.slane %v4390_v61, %v6460_v62  ;;  %v4389_v1 = vrot.slane %v4375_v57, %v6460_v62  ;;  %v4405_v3 = vrot.slane %v4391_v59, %v6460_v62  ;;  %v5800_v57 = vld [vmem:[#allocation4 + $0x8] sm:$0xff]   ;;  %v5801_v59 = vld [vmem:[#allocation4] sm:$0xff]  }
 0xabd   : > { %v4417_v9 = vrot.slane %v4410_v36, %v6457_v55  ;;  %v4425_v44 = vrot.slane %v5161_v22, %v6457_v55  ;;  %v4433_v52 = vrot.slane %v4426_v49, %v6457_v55  ;;  %v4441_v40 = vrot.slane %v5162_v50, %v6457_v55  ;;  %v5885_v60 = vld [vmem:[%s7255_s5] sm:$0xf] }
 0xabe   : > { %v4406_v4 = vcombine.low %v4382_v29, %v4398_v58  ;;  %v4408_v37 = vcombine.low %v4389_v1, %v4405_v3  ;;  %v4407_v25 = vcombine.high %v4382_v29, %v4398_v58  ;;  %5591 = vmatpush3.bf16.msra.mxu1 %v5796_v15  ;;  %v4512_v61 = vrot.slane %v5885_v60, %v2413_v53 }
 0xabf   : > { %v4443_v51 = vcombine.high %v4417_v9, %v4425_v44  ;;  %v4459_v2 = vcombine.high %v4433_v52, %v4441_v40  ;;  %v4442_v6 = vcombine.low %v4417_v9, %v4425_v44  ;;  %v4458_v7 = vcombine.low %v4433_v52, %v4441_v40  ;;  %5592 = vmatprep.subr.bf16.mxu1 %v6103_v0 }
 0xac1   : > { %v4457_v8 = vrot.slane %v4443_v51, %v6460_v62  ;;  %v4473_v28 = vrot.slane %v4459_v2, %v6460_v62  ;;  %v4450_v46 = vrot.slane %v4442_v6, %v6460_v62  ;;  %v4466_v55 = vrot.slane %v4458_v7, %v6460_v62  ;;  %v5802_v51 = vld [vmem:[#allocation4 + $0x78] sm:$0xff]   ;;  %v5803_v2 = vld [vmem:[#allocation4 + $0x70] sm:$0xff]   ;;  %v5804_v6 = vld [vmem:[#allocation4 + $0x68] sm:$0xff]  }
 0xac2   : > { %v4409_v62 = vcombine.high %v4389_v1, %v4405_v3  ;;  %5593 = vmatpush3.bf16.msra.mxu1 %v5797_v30  ;;  %v5805_v7 = vld [vmem:[#allocation4 + $0x60] sm:$0xff]  }
 0xac3   : > { %v4476_v10 = vcombine.low %v4457_v8, %v4473_v28  ;;  %v4475_v11 = vcombine.high %v4450_v46, %v4466_v55  ;;  %v4474_v19 = vcombine.low %v4450_v46, %v4466_v55  ;;  %v4477_v31 = vcombine.high %v4457_v8, %v4473_v28  ;;  %5594 = vmatprep.subr.bf16.mxu1 %v6103_v0  ;;  %v5806_v8 = vld [vmem:[#allocation4 + $0x58] sm:$0xff]   ;;  %v5807_v28 = vld [vmem:[#allocation4 + $0x50] sm:$0xff]   ;;  %v5808_v46 = vld [vmem:[#allocation4 + $0x48] sm:$0xff]  }
 0xac4   : > { %v5809_v55 = vld [vmem:[#allocation4 + $0x40] sm:$0xff]  }
 0xac5   : > { %v5719_v26 = vpack.i.bf16 %v4476_v10, %v4408_v37  ;;  %v5714_v16 = vpack.i.bf16 %v4475_v11, %v4407_v25  ;;  %v5724_v45 = vpack.i.bf16 %v4477_v31, %v4409_v62 }
 0xac6   : > { %5595 = vmatpush3.bf16.msra.mxu1 %v5798_v47 }
 0xac7   : > { %5720 = vrot.lane.b32.xlu1 %v5719_v26, %s6105_s24  ;;  %5715 = vrot.lane.b32.xlu0 %v5714_v16, %s6107_s15  ;;  %s6018_s24 = sshll.u32 %s6110_s17, 4  ;;  %s6019_s24 = int_to_ptr.vmem [resolvable:$false] %s6018_s24 }
 0xac8   : > { %5596 = vmatprep.subr.bf16.mxu1 %v6103_v0  ;;  %p6021_p9 = scmp.lt.s32.totalorder %s7206_s26, %s6019_s24 }
 0xaca   : > { %5597 = vmatpush3.bf16.msra.mxu1 %v5799_v41 }
 0xacb   : > { %5725 = vrot.lane.b32.xlu1 %v5724_v45, %s6106_s27  ;;  %5598 = vmatprep.subr.bf16.mxu1 %v6103_v0  ;;  %s6020_s27 = scalar_lea.vmem %s6019_s24, 512 }
 0xacc   : > { %p6022_p12 = scmp.lt.s32.totalorder %s6020_s27, %s6014_s19 }
 0xace   : > { %5599 = vmatpush3.bf16.msra.mxu1 %v5800_v57  ;;  %p6023_p3 = por %p6022_p12, %p6021_p9 }
 0xacf   : > { %5600 = vmatprep.subr.bf16.mxu1 %v6103_v0 }
 0xad0   : > { %p6024_p8 = pnand %p6023_p3, %p6017_p4 }
 0xad2   : > { %5601 = vmatpush3.bf16.msra.mxu1 %v5801_v59 }
 0xb39   : > { %v5721_v33 = vpop.permute.xlu1 %5720  ;;  %v5716_v34 = vpop.permute.xlu0 %5715 }
 0xb3a   : > { %v5718_v35 = vunpack.i.h.bf16 %v5716_v34  ;;  %v5717_v20 = vunpack.i.l.bf16 %v5716_v34  ;;  %v5723_v23 = vunpack.i.h.bf16 %v5721_v33  ;;  %v5722_v18 = vunpack.i.l.bf16 %v5721_v33 }
 0xb3c   : > { %v4502_v43 = vsel %vm1648_vm1, %v4406_v4, %v5717_v20  ;;  %v4503_v14 = vsel %vm1648_vm1, %v4474_v19, %v5718_v35 }
 0xb3d   : > { %v5726_v24 = vpop.permute.xlu1 %5725  ;;  %v4504_v39 = vsel %vm2404_vm5, %v4502_v43, %v5722_v18  ;;  %v4505_v5 = vsel %vm2404_vm5, %v4503_v14, %v5723_v23  ;;  %v5181_v23 = vld [vmem:[%s7259_s9] ss:$0 sm:$0xff] }
 0xb3e   : > { %v5728_v17 = vunpack.i.h.bf16 %v5726_v24  ;;  %v5727_v38 = vunpack.i.l.bf16 %v5726_v24 }
 0xb40   : > { %v4506_v54 = vsel %vm2407_vm6, %v4504_v39, %v5727_v38  ;;  %v4507_v56 = vsel %vm2407_vm6, %v4505_v5, %v5728_v17  ;;  %v5182_v5 = vld [vmem:[%s7257_s7 + $0x1] ss:$0 sm:$0xff] }
 0xb41   : > { %v4508_v48 = vpack.c.bf16 %v4507_v56, %v4506_v54 }
 0xb43   : > { %5583 = vmatmul.mubr.bf16.vlgmr.msra.gmra.mxu0 %v4508_v48 }
 0xb44   : > { %5622 = vmatprep.mubr.msk.bf16.mxu0 %vm6104_vm0, %v6103_v0  ;;  %5607 = vmatpush3.bf16.msra.mxu0 %v5802_v51  ;;  %v5192_v51 = vld [vmem:[%s7259_s9 + $0x1] ss:$0 sm:$0xff] }
 0xb45   : > { %5608 = vmatprep.subr.bf16.mxu0 %v6103_v0 }
 0xb48   : > { %5609 = vmatpush3.bf16.msra.mxu0 %v5803_v2 }
 0xb49   : > { %5610 = vmatprep.subr.bf16.mxu0 %v6103_v0 }
 0xb4c   : > { %5611 = vmatpush3.bf16.msra.mxu0 %v5804_v6 }
 0xb4d   : > { %5612 = vmatprep.subr.bf16.mxu0 %v6103_v0 }
 0xb50   : > { %5613 = vmatpush3.bf16.msra.mxu0 %v5805_v7 }
 0xb51   : > { %5614 = vmatprep.subr.bf16.mxu0 %v6103_v0 }
 0xb54   : > { %5615 = vmatpush3.bf16.msra.mxu0 %v5806_v8 }
 0xb55   : > { %5616 = vmatprep.subr.bf16.mxu0 %v6103_v0 }
 0xb58   : > { %5617 = vmatpush3.bf16.msra.mxu0 %v5807_v28 }
 0xb59   : > { %5618 = vmatprep.subr.bf16.mxu0 %v6103_v0 }
 0xb5c   : > { %5619 = vmatpush3.bf16.msra.mxu0 %v5808_v46 }
 0xb5d   : > { %5620 = vmatprep.subr.bf16.mxu0 %v6103_v0  ;;  %v5180_v0 = vld [vmem:[%s7258_s8] ss:$0 sm:$0xff] }
 0xb60   : > { %5621 = vmatpush3.bf16.msra.mxu0 %v5809_v55 }
 0xc03   : > { %v4595_v36 = vpop.f32.mrf.mxu0 }
 0xc04   : > { %v4596_v49 = vadd.f32 %v4595_v36, %v4512_v61 }
 0xc05   : > { %v5584_v22 = vpop.f32.mrf.mxu0 }
 0xc06   : > { %v7164_v42 = vadd.f32 %v4596_v49, %v6794_v12 }
 0xc07   : > { %v4598_v50 = vpop.f32.mrf.mxu0 }
 0xc08   : > { %v4599_v29 = vadd.f32 %v4598_v50, %v4512_v61 }
 0xc09   : > { %v5585_v58 = vpop.f32.mrf.mxu0 }
 0xc0a   : > { %v7167_v9 = vadd.f32 %v4599_v29, %v6796_v13 }
 0xc0c   : > { %v4623_v44 = vpack.c.bf16 %v7167_v9, %v7164_v42 }
 0xc0e   : > { %5603 = vmatmul.mubr.bf16.vlgmr.msra.gmra.mxu1 %v4623_v44 }
 0xcce   : > { %v4710_v53 = vpop.f32.mrf.mxu1 }
 0xccf   : > { %v4711_v52 = vadd.f32 %v5171_v27, %v4710_v53 }
 0xcd0   : > { %v5604_v40 = vpop.f32.mrf.mxu1 }
 0xcd1   : > { %4717 = vadd.xlane.f32.xlu0 %v4711_v52  ;;  %v4724_v4 = vmul.f32 %v4711_v52, %v4711_v52 }
 0xcd2   : > { %v4713_v1 = vpop.f32.mrf.mxu1 }
 0xcd3   : > { %v4714_v3 = vadd.f32 %v5171_v27, %v4713_v1 }
 0xcd4   : > { %v5605_v12 = vpop.f32.mrf.mxu1 }
 0xcd5   : > { %4726 = vadd.xlane.f32.xlu0 %v4724_v4  ;;  %4719 = vadd.xlane.f32.xlu1 %v4714_v3  ;;  %v4725_v13 = vmul.f32 %v4714_v3, %v4714_v3  ;;  %v5191_v12 = vld [vmem:[%s7258_s8 + $0x1] ss:$0 sm:$0xff] }
 0xcd9   : > { %4728 = vadd.xlane.f32.xlu0 %v4725_v13 }
 0xd5a   : > { %v4718_v63 = vpop.xlane.xlu0 %4717 }
 0xd5b   : > { %v4722_v37 = vmul.f32 0.0078125, %v4718_v63 }
 0xd5d   : > { %v4732_v11 = vmul.f32 %v4722_v37, %v4722_v37  ;;  %v4736_v30 = vsub.f32 %v4711_v52, %v4722_v37 }
 0xd5e   : > { %v4727_v10 = vpop.xlane.xlu0 %4726  ;;  %v4720_v25 = vpop.xlane.xlu1 %4719 }
 0xd5f   : > { %v4730_v19 = vmul.f32 0.0078125, %v4727_v10  ;;  %v4723_v21 = vmul.f32 0.0078125, %v4720_v25 }
 0xd61   : > { %v4734_v26 = vsub.f32 %v4730_v19, %v4732_v11  ;;  %v4733_v32 = vmul.f32 %v4723_v21, %v4723_v21  ;;  %v4737_v34 = vsub.f32 %v4714_v3, %v4723_v21 }
 0xd62   : > { %v4729_v16 = vpop.xlane.xlu0 %4728 }
 0xd63   : > { %v4738_v31 = vadd.f32 1e-05, %v4734_v26  ;;  %v4731_v62 = vmul.f32 0.0078125, %v4729_v16 }
 0xd65   : > { %5875 = vrsqrt.f32 %v4738_v31  ;;  %v4735_v45 = vsub.f32 %v4731_v62, %v4733_v32 }
 0xd67   : > { %v4739_v15 = vadd.f32 1e-05, %v4735_v45 }
 0xd69   : > { %5877 = vrsqrt.f32 %v4739_v15 }
 0xd72   : > { %v5876_v47 = vpop.eup %5875 }
 0xd73   : > { %v4742_v33 = vmul.f32 %v5876_v47, %v4736_v30 }
 0xd75   : > { %v4748_v35 = vmul.f32 %v5180_v0, %v4742_v33 }
 0xd76   : > { %v5878_v20 = vpop.eup %5877 }
 0xd77   : > { %v4743_v18 = vmul.f32 %v5878_v20, %v4737_v34  ;;  %v4754_v14 = vadd.f32 %v5181_v23, %v4748_v35 }
 0xd79   : > { %v4749_v43 = vmul.f32 %v5180_v0, %v4743_v18  ;;  %v4756_v17 = vadd.f32 %v4754_v14, %v7164_v42 }
 0xd7b   : > { %v4755_v24 = vadd.f32 %v5181_v23, %v4749_v43 }
 0xd7d   : > { %v4757_v38 = vadd.f32 %v4755_v24, %v7167_v9 }
 0xd7f   : > { %v4778_v39 = vpack.c.bf16 %v4757_v38, %v4756_v17 }
 0xd81   : > { %5623 = vmatmul.mubr.bf16.vlgmr.msra.gmra.mxu0 %v4778_v39 }
 0xe41   : > { %v4865_v54 = vpop.f32.mrf.mxu0 }
 0xe42   : > { %v4866_v56 = vadd.f32 %v5182_v5, %v4865_v54 }
 0xe43   : > { %v5624_v48 = vpop.f32.mrf.mxu0 }
 0xe44   : > { %4872 = vadd.xlane.f32.xlu1 %v4866_v56  ;;  %v4878_v59 = vmul.f32 %v4866_v56, %v4866_v56 }
 0xe45   : > { %v4868_v41 = vpop.f32.mrf.mxu0 }
 0xe46   : > { %v4869_v57 = vadd.f32 %v5182_v5, %v4868_v41 }
 0xe47   : > { %v5625_v60 = vpop.f32.mrf.mxu0 }
 0xe48   : > { %4880 = vadd.xlane.f32.xlu1 %v4878_v59  ;;  %4874 = vadd.xlane.f32.xlu0 %v4869_v57  ;;  %v4879_v61 = vmul.f32 %v4869_v57, %v4869_v57 }
 0xe4c   : > { %4882 = vadd.xlane.f32.xlu0 %v4879_v61 }
 0xecd   : > { %v4873_v36 = vpop.xlane.xlu1 %4872 }
 0xece   : > { %v4876_v22 = vmul.f32 0.0078125, %v4873_v36 }
 0xed0   : > { %v4886_v29 = vmul.f32 %v4876_v22, %v4876_v22  ;;  %v4890_v3 = vsub.f32 %v4866_v56, %v4876_v22 }
 0xed1   : > { %v4881_v49 = vpop.xlane.xlu1 %4880  ;;  %v4875_v50 = vpop.xlane.xlu0 %4874 }
 0xed2   : > { %v4884_v58 = vmul.f32 0.0078125, %v4881_v49  ;;  %v4877_v42 = vmul.f32 0.0078125, %v4875_v50 }
 0xed4   : > { %v4888_v9 = vsub.f32 %v4884_v58, %v4886_v29  ;;  %v4887_v53 = vmul.f32 %v4877_v42, %v4877_v42  ;;  %v4891_v6 = vsub.f32 %v4869_v57, %v4877_v42 }
 0xed5   : > { %v4883_v44 = vpop.xlane.xlu0 %4882 }
 0xed6   : > { %v4892_v27 = vadd.f32 1e-05, %v4888_v9  ;;  %v4885_v52 = vmul.f32 0.0078125, %v4883_v44 }
 0xed8   : > { %5879 = vrsqrt.f32 %v4892_v27  ;;  %v4889_v40 = vsub.f32 %v4885_v52, %v4887_v53 }
 0xeda   : > { %v4893_v1 = vadd.f32 1e-05, %v4889_v40 }
 0xedc   : > { %5881 = vrsqrt.f32 %v4893_v1 }
 0xee5   : > { %v5880_v4 = vpop.eup %5879 }
 0xee6   : > { %v4896_v13 = vmul.f32 %v5880_v4, %v4890_v3 }
 0xee8   : > { %v4902_v2 = vmul.f32 %v5191_v12, %v4896_v13 }
 0xee9   : > { %v5882_v7 = vpop.eup %5881 }
 0xeea   : > { %v4897_v8 = vmul.f32 %v5882_v7, %v4891_v6  ;;  %v4908_v28 = vadd.f32 %v5192_v51, %v4902_v2 }
 0xeec   : > { %v4903_v46 = vmul.f32 %v5191_v12, %v4897_v8  ;;  %v4910_v55 = vadd.f32 %v4908_v28, %v4756_v17 }
 0xeee   : > { %v4909_v63 = vadd.f32 %v5192_v51, %v4903_v46  ;;  %4912 = vst [vmem:[%s6367_s0] sm:$0xff] %v4910_v55 }
 0xef0   : > { %v4911_v37 = vadd.f32 %v4909_v63, %v4757_v38 }
 0xef2   : > { %4913 = vst [vmem:[%s6367_s0 + $0x8] sm:$0xff] %v4911_v37 }
 0xef3   : > { %6027 = shalt.err (!%p6024_p8)
}
 0xef4   : > { %s6028_s0 = scalar_lea.hbm %s7204_s12, 256  ;;  %s6032_s23 = scalar_lea.hbm %s7260_s10, 512 }
 0xef5   : > { %p6029_p6 = scmp.ne.s32.totalorder %s7204_s12, %s6028_s0  ;;  %p6033_p11 = scmp.lt.s32.totalorder %s7204_s12, %s7260_s10 }
 0xef6   : > { %p6034_p7 = scmp.lt.s32.totalorder %s6032_s23, %s6028_s0 }
 0xef7   : > { %p6030_p13 = pnand %p6029_p6, %p7300_p2 }
 0xef8   : > { %p6035_p10 = por %p6034_p7, %p6033_p11 }
 0xef9   : > { %p6031_p1 = pneg %p6030_p13 }
 0xefb   : > { %p6036_p0 = pnand %p6035_p10, %p6031_p1 }
 0xefd   : > { %6039 = shalt.err (!%p6036_p0)
}
 0xefe   : > { %s6111_s18 = smov 128   ;;  %s6112_s28 = smov 8  }
 0xeff   : > { %5637 = dma.vmem_to_hbm [thread:$0]  (%p7300_p2), %s7206_s26, 256, %s7204_s12, %s4915_s29, %s6111_s18, %s6111_s18, %s6112_s28  }
 0xf00 PF: > { %s7301_s11 = sld [smem:[#allocation29_spill]]  ;;  %s4943_s19 = sand.u32 1, %s6082_s13  }
 0xf01   : > { %p7303_p4 = scmp.ge.s32.totalorder %s6094_s16, 2  ;;  %s4944_s17 = scalar_lea.sflag [#allocation8], %s4943_s19 }
 0xf06   : > { %p7302_p5 = scmp.ne.s32.totalorder %s7301_s11, 0 }
 0xf08   : > { %p5647_p9 = pnand %p7303_p4, %p7302_p5 }
 0xf0a   : > { %p5648_p12 = pneg %p5647_p9 }
 0xf0c   : > { %6077 = dma.done.wait (%p5648_p12), %s4944_s17, 256  }
 0xf0d   : > { %6079 = vsyncadd (%p5648_p12), %s4944_s17, 4294967040  ;;  %s7304_s16 = sld [smem:[#allocation27_spill]]  ;;  %s7307_s13 = smov %s6086_s14 }
 0xf0e   : > { %s7305_s24 = sld [smem:[#allocation26_spill]] }
 0xf0f   : > { %s7306_s15 = sld [smem:[#allocation28_spill]] }
 0xf13   : > { %p26_p3 = scmp.ge.s32.totalorder %s7304_s16, 4  }
 0xf14   : > { %s7308_s14 = smov %s7305_s24 }
 0xf15   :  { %28 = sbr.rel (!%p26_p3) target bundleno = 9 (0x9), region = 133 }
 0xf1a   :  { %4949 = vsyncpa [#allocation7], 1 }
 0xf1b   :  { %4951 = vsyncpa [#allocation7 + $0x1], 1 }
 0xf1c   :  { %4952 = vsyncpa [#allocation10], 1 }
 0xf1d   :  { %4954 = vsyncpa [#allocation10 + $0x1], 1 }
 0xf1e   :  { %4955 = vsyncpa [#allocation8], 1 }
 0xf1f   :  { %4957 = vsyncpa [#allocation8 + $0x1], 1 }
 0xf20   :  { %4958 = vsyncmov [#allocation5] }
 0xf23   :  { %s4959_s25 = vpop.sfrf %4958 }
 0xf24   :  { %p5198_p2 = scmp.ne.s32.totalorder %s4959_s25, 0 }
 0xf26   :  { %4963 = shalt.err (%p5198_p2)  }
 0xf27   :  { %4965 = vsyncmov [#allocation5 + $0x1] }
 0xf2a   :  { %s4966_s22 = vpop.sfrf %4965 }
 0xf2b   :  { %p5199_p8 = scmp.ne.s32.totalorder %s4966_s22, 0 }
 0xf2d   :  { %4970 = shalt.err (%p5199_p8)  }
 0xf2e   :  { %4972 = vsyncmov [#allocation5 + $0x2] }
 0xf31   :  { %s4973_s26 = vpop.sfrf %4972 }
 0xf32   :  { %p5200_p6 = scmp.ne.s32.totalorder %s4973_s26, 0 }
 0xf34   :  { %4977 = shalt.err (%p5200_p6)  }

</bundles_post_ra>
